<compile_context>
chip_gen: v6e
topology: v6e:2x2x1
jax: 0.10.0
libtpu: 0.0.40
codegen_flags: <defaults>
</compile_context>

<pallas_src>
import numpy as np
import jax
import jax.numpy as jnp
from jax.experimental import pallas as pl
from jax.experimental.pallas import tpu as pltpu


# ---------------------------------------------------------------------------
# Model dimensions (scaled-down stand-in for EfficientNet-b4).
# ---------------------------------------------------------------------------
C_IN, HW_IN = 3, 16
OH = OW = 8                      # stem is 3x3 stride-2 -> 8x8 feature map
C_STEM, C_EXP, C_SE, C_HEAD, NUM_CLASSES = 16, 64, 4, 32, 18


def _full_spec(shape):
    """Single full-array block (block_shape == array shape satisfies (8,128))."""
    nd = len(shape)
    return pl.BlockSpec(shape, lambda i, _nd=nd: (0,) * _nd)


# ---------------------------------------------------------------------------
# The one fused kernel.  Layout: activations are [C, M] (channels on sublanes,
# M = N*OH*OW = 128 flattened (n, h, w) positions on lanes).
# ---------------------------------------------------------------------------
def _fused_kernel(cols_ref, shift_ref, pool_ref, bcast_ref,
                  stem_w_ref, stem_b_ref, exp_w_ref, exp_b_ref,
                  dw_w_ref, dw_b_ref, se1_w_ref, se1_b_ref,
                  se2_w_ref, se2_b_ref, proj_w_ref, proj_b_ref,
                  head_w_ref, head_b_ref, fc_w_ref, fc_b_ref,
                  out_ref):
    f32 = jnp.float32
    swish = lambda z: z * jax.nn.sigmoid(z)

    cols = cols_ref[...]                                           # [27, M]

    # Stem 3x3 stride-2 conv as a matmul over im2col'd patches + swish.
    h = swish(jnp.dot(stem_w_ref[...], cols, preferred_element_type=f32)
              + stem_b_ref[...])                                   # [C_STEM, M]

    # MBConv expand 1x1 + swish.
    e = swish(jnp.dot(exp_w_ref[...], h, preferred_element_type=f32)
              + exp_b_ref[...])                                    # [C_EXP, M]

    # Depthwise 3x3 (pad=1): 9 taps, each a matmul against a 0/1 shift matrix
    # that also encodes the zero-padding boundary mask (MXU work, no
    # materialized slices), followed by the per-channel tap weight.
    acc = jnp.zeros_like(e)
    for t in range(9):
        shifted = jnp.dot(e, shift_ref[t], preferred_element_type=f32)  # [C_EXP, M]
        acc = acc + shifted * dw_w_ref[t]                               # [C_EXP,1] bcast
    d = swish(acc + dw_b_ref[...])                                 # [C_EXP, M]

    # Squeeze-excite: GAP (matmul against pooling matrix) -> 2 FCs -> scale.
    pool = pool_ref[...]                                           # [M, N], 1/(OH*OW)
    s_pool = jnp.dot(d, pool, preferred_element_type=f32)          # [C_EXP, N]
    s1 = swish(jnp.dot(se1_w_ref[...], s_pool, preferred_element_type=f32)
               + se1_b_ref[...])                                   # [C_SE, N]
    s2 = jax.nn.sigmoid(jnp.dot(se2_w_ref[...], s1, preferred_element_type=f32)
                        + se2_b_ref[...])                          # [C_EXP, N]
    gate = jnp.dot(s2, bcast_ref[...], preferred_element_type=f32) # [C_EXP, M]
    d = d * gate

    # Project 1x1 (linear) + residual.
    p = jnp.dot(proj_w_ref[...], d, preferred_element_type=f32) + proj_b_ref[...]
    h2 = p + h                                                     # [C_STEM, M]

    # Head 1x1 conv + swish.
    hd = swish(jnp.dot(head_w_ref[...], h2, preferred_element_type=f32)
               + head_b_ref[...])                                  # [C_HEAD, M]

    # Fused GAP + FC (linear ops commute): logits_t[k, n] = fc_w @ mean(hd).
    z = jnp.dot(fc_w_ref[...], hd, preferred_element_type=f32)     # [18, M]
    logits_t = jnp.dot(z, pool, preferred_element_type=f32) + fc_b_ref[...]  # [18, N]

    # Softmax over classes (axis 0 in this layout) == F.softmax(x, dim=1).
    zmax = jnp.max(logits_t, axis=0, keepdims=True)
    ez = jnp.exp(logits_t - zmax)
    out_ref[...] = ez / jnp.sum(ez, axis=0, keepdims=True)         # [18, N]


# ---------------------------------------------------------------------------
# Trace-time structural constants (pure layout plumbing; static shapes).
# ---------------------------------------------------------------------------
def _stem_im2col(x_nhwc):
    """TF-'same' style pad (0,1)/(0,1), 3x3 stride-2 patches -> [N,OH,OW,27]."""
    xp = jnp.pad(x_nhwc, ((0, 0), (0, 1), (0, 1), (0, 0)))
    taps = [xp[:, dy:dy + 2 * OH:2, dx:dx + 2 * OW:2, :]
            for dy in range(3) for dx in range(3)]
    return jnp.concatenate(taps, axis=-1)


def _dw_shift_matrices(n):
    """S[t, m_in, m_out] = 1 iff same sample, h_in=h_out+dy-1, w_in=w_out+dx-1."""
    m = n * OH * OW
    mm = np.arange(m)
    nn, hh, ww = mm // (OH * OW), (mm // OW) % OH, mm % OW
    mats = np.zeros((9, m, m), np.float32)
    for dy in range(3):
        for dx in range(3):
            cond = ((nn[:, None] == nn[None, :])
                    & (hh[:, None] == hh[None, :] + (dy - 1))
                    & (ww[:, None] == ww[None, :] + (dx - 1)))
            mats[3 * dy + dx] = cond.astype(np.float32)
    return mats


# ---------------------------------------------------------------------------
# Deterministic synthetic parameters (BN folded into conv weight + bias).
# Weights are stored [out, in]; biases [out, 1] (column, broadcasts over lanes).
# ---------------------------------------------------------------------------
def init_params(key):
    def dense(k, fan_out, fan_in):
        kw, kb = jax.random.split(k)
        w = jax.random.normal(kw, (fan_out, fan_in), jnp.float32) / np.sqrt(fan_in)
        b = 0.01 * jax.random.normal(kb, (fan_out, 1), jnp.float32)
        return w, b

    ks = jax.random.split(key, 8)
    p = {}
    p["stem_w"], p["stem_b"] = dense(ks[0], C_STEM, 9 * C_IN)      # 3x3 s2 conv
    p["exp_w"], p["exp_b"] = dense(ks[1], C_EXP, C_STEM)           # 1x1 expand
    kdw, kdb = jax.random.split(ks[2])
    p["dw_w"] = jax.random.normal(kdw, (9, C_EXP, 1), jnp.float32) / 3.0
    p["dw_b"] = 0.01 * jax.random.normal(kdb, (C_EXP, 1), jnp.float32)
    p["se1_w"], p["se1_b"] = dense(ks[3], C_SE, C_EXP)             # SE reduce
    p["se2_w"], p["se2_b"] = dense(ks[4], C_EXP, C_SE)             # SE expand
    p["proj_w"], p["proj_b"] = dense(ks[5], C_STEM, C_EXP)         # 1x1 project
    p["head_w"], p["head_b"] = dense(ks[6], C_HEAD, C_STEM)        # 1x1 head conv
    p["fc_w"], p["fc_b"] = dense(ks[7], NUM_CLASSES, C_HEAD)       # classifier
    return p


# ---------------------------------------------------------------------------
# Forward: wrapper does only layout plumbing; all compute is one pallas_call.
# ---------------------------------------------------------------------------
def my_efficientnet_forward(params, x_nchw):
    n = x_nchw.shape[0]
    m = n * OH * OW

    x = jnp.transpose(x_nchw, (0, 2, 3, 1)).astype(jnp.float32)    # NCHW -> NHWC
    cols = _stem_im2col(x)                                         # [N,OH,OW,27]
    cols_t = cols.reshape(m, 9 * C_IN).T                           # [27, M] lane-dense

    # Static structural constants (built with numpy at trace time).
    dw_shift = jnp.asarray(_dw_shift_matrices(n))                  # [9, M, M]
    samp = np.arange(m) // (OH * OW)
    pool_mn = jnp.asarray((samp[:, None] == np.arange(n)[None, :])
                          .astype(np.float32) / (OH * OW))         # [M, N]
    bcast_nm = jnp.asarray((np.arange(n)[:, None] == samp[None, :])
                           .astype(np.float32))                    # [N, M]

    inputs = [cols_t, dw_shift, pool_mn, bcast_nm,
              params["stem_w"], params["stem_b"],
              params["exp_w"], params["exp_b"],
              params["dw_w"], params["dw_b"],
              params["se1_w"], params["se1_b"],
              params["se2_w"], params["se2_b"],
              params["proj_w"], params["proj_b"],
              params["head_w"], params["head_b"],
              params["fc_w"], params["fc_b"]]

    probs_t = pl.pallas_call(
        _fused_kernel,
        out_shape=jax.ShapeDtypeStruct((NUM_CLASSES, n), jnp.float32),
        grid=(1,),
        in_specs=[_full_spec(a.shape) for a in inputs],
        out_specs=_full_spec((NUM_CLASSES, n)),
        compiler_params=pltpu.CompilerParams(vmem_limit_bytes=8 * 1024 * 1024),
    )(*inputs)
    return probs_t.T                                               # [N, 18]


# ---------------------------------------------------------------------------
# Pure-JAX reference (NHWC, no Pallas) for correctness validation.
# ---------------------------------------------------------------------------
def _reference_forward(params, x_nchw):
    swish = lambda z: z * jax.nn.sigmoid(z)

    def lin(z, w, b):                                              # w [out,in], b [out,1]
        return jnp.dot(z, w.T) + b[:, 0]

    x = jnp.transpose(x_nchw, (0, 2, 3, 1)).astype(jnp.float32)
    cols = _stem_im2col(x)                                         # [N,8,8,27]
    h = swish(lin(cols, params["stem_w"], params["stem_b"]))       # [N,8,8,16]
    e = swish(lin(h, params["exp_w"], params["exp_b"]))            # [N,8,8,64]

    ep = jnp.pad(e, ((0, 0), (1, 1), (1, 1), (0, 0)))
    acc = jnp.zeros_like(e)
    for dy in range(3):
        for dx in range(3):
            acc = acc + ep[:, dy:dy + OH, dx:dx + OW, :] * params["dw_w"][3 * dy + dx, :, 0]
    d = swish(acc + params["dw_b"][:, 0])

    s = jnp.mean(d, axis=(1, 2))                                   # [N,64]
    s = swish(lin(s, params["se1_w"], params["se1_b"]))
    s = jax.nn.sigmoid(lin(s, params["se2_w"], params["se2_b"]))
    d = d * s[:, None, None, :]

    p = lin(d, params["proj_w"], params["proj_b"])
    h2 = p + h
    hd = swish(lin(h2, params["head_w"], params["head_b"]))
    g = jnp.mean(hd, axis=(1, 2))                                  # [N,32]
    logits = lin(g, params["fc_w"], params["fc_b"])                # [N,18]
    return jax.nn.softmax(logits, axis=-1)


if __name__ == "__main__":
    key = jax.random.PRNGKey(0)
    kx, kp = jax.random.split(key)
    x = jax.random.normal(kx, (2, C_IN, HW_IN, HW_IN), jnp.float32)   # NCHW like PyTorch
    params = init_params(kp)

    fwd = jax.jit(my_efficientnet_forward)
    out = jax.block_until_ready(fwd(params, x))
    ref = jax.block_until_ready(jax.jit(_reference_forward)(params, x))

    out_np, ref_np = np.asarray(out), np.asarray(ref)
    assert out_np.shape == (2, NUM_CLASSES), out_np.shape
    sums = out_np.sum(axis=1)
    assert np.allclose(sums, 1.0, atol=1e-4), sums
    assert np.all(out_np >= 0.0)
    assert np.allclose(out_np, ref_np, atol=5e-3), float(np.max(np.abs(out_np - ref_np)))
    print("KERNEL_OK")
</pallas_src>

<mosaic_0001>
module attributes {stable_mosaic.version = 11 : i64} {
  func.func @_fused_kernel(%arg0: i32, %arg1: memref<27x128xf32, #tpu.memory_space<vmem>>, %arg2: memref<9x128x128xf32, #tpu.memory_space<vmem>>, %arg3: memref<128x2xf32, #tpu.memory_space<vmem>>, %arg4: memref<2x128xf32, #tpu.memory_space<vmem>>, %arg5: memref<16x27xf32, #tpu.memory_space<vmem>>, %arg6: memref<16x1xf32, #tpu.memory_space<vmem>>, %arg7: memref<64x16xf32, #tpu.memory_space<vmem>>, %arg8: memref<64x1xf32, #tpu.memory_space<vmem>>, %arg9: memref<9x64x1xf32, #tpu.memory_space<vmem>>, %arg10: memref<64x1xf32, #tpu.memory_space<vmem>>, %arg11: memref<4x64xf32, #tpu.memory_space<vmem>>, %arg12: memref<4x1xf32, #tpu.memory_space<vmem>>, %arg13: memref<64x4xf32, #tpu.memory_space<vmem>>, %arg14: memref<64x1xf32, #tpu.memory_space<vmem>>, %arg15: memref<16x64xf32, #tpu.memory_space<vmem>>, %arg16: memref<16x1xf32, #tpu.memory_space<vmem>>, %arg17: memref<32x16xf32, #tpu.memory_space<vmem>>, %arg18: memref<32x1xf32, #tpu.memory_space<vmem>>, %arg19: memref<18x32xf32, #tpu.memory_space<vmem>>, %arg20: memref<18x1xf32, #tpu.memory_space<vmem>>, %arg21: memref<18x2xf32, #tpu.memory_space<vmem>>) attributes {dimension_semantics = [#tpu.dimension_semantics<arbitrary>], iteration_bounds = array<i64: 1>, scalar_prefetch = 0 : i64, scratch_operands = 0 : i64, tpu.core_type = #tpu.core_type<tc>, window_params = [{pipeline_mode = #tpu.pipeline_mode<synchronous>, transform_indices = @transform_0, window_bounds = array<i64: 27, 128>}, {pipeline_mode = #tpu.pipeline_mode<synchronous>, transform_indices = @transform_1, window_bounds = array<i64: 9, 128, 128>}, {pipeline_mode = #tpu.pipeline_mode<synchronous>, transform_indices = @transform_2, window_bounds = array<i64: 128, 2>}, {pipeline_mode = #tpu.pipeline_mode<synchronous>, transform_indices = @transform_3, window_bounds = array<i64: 2, 128>}, {pipeline_mode = #tpu.pipeline_mode<synchronous>, transform_indices = @transform_4, window_bounds = array<i64: 16, 27>}, {pipeline_mode = #tpu.pipeline_mode<synchronous>, transform_indices = @transform_5, window_bounds = array<i64: 16, 1>}, {pipeline_mode = #tpu.pipeline_mode<synchronous>, transform_indices = @transform_6, window_bounds = array<i64: 64, 16>}, {pipeline_mode = #tpu.pipeline_mode<synchronous>, transform_indices = @transform_7, window_bounds = array<i64: 64, 1>}, {pipeline_mode = #tpu.pipeline_mode<synchronous>, transform_indices = @transform_8, window_bounds = array<i64: 9, 64, 1>}, {pipeline_mode = #tpu.pipeline_mode<synchronous>, transform_indices = @transform_9, window_bounds = array<i64: 64, 1>}, {pipeline_mode = #tpu.pipeline_mode<synchronous>, transform_indices = @transform_10, window_bounds = array<i64: 4, 64>}, {pipeline_mode = #tpu.pipeline_mode<synchronous>, transform_indices = @transform_11, window_bounds = array<i64: 4, 1>}, {pipeline_mode = #tpu.pipeline_mode<synchronous>, transform_indices = @transform_12, window_bounds = array<i64: 64, 4>}, {pipeline_mode = #tpu.pipeline_mode<synchronous>, transform_indices = @transform_13, window_bounds = array<i64: 64, 1>}, {pipeline_mode = #tpu.pipeline_mode<synchronous>, transform_indices = @transform_14, window_bounds = array<i64: 16, 64>}, {pipeline_mode = #tpu.pipeline_mode<synchronous>, transform_indices = @transform_15, window_bounds = array<i64: 16, 1>}, {pipeline_mode = #tpu.pipeline_mode<synchronous>, transform_indices = @transform_16, window_bounds = array<i64: 32, 16>}, {pipeline_mode = #tpu.pipeline_mode<synchronous>, transform_indices = @transform_17, window_bounds = array<i64: 32, 1>}, {pipeline_mode = #tpu.pipeline_mode<synchronous>, transform_indices = @transform_18, window_bounds = array<i64: 18, 32>}, {pipeline_mode = #tpu.pipeline_mode<synchronous>, transform_indices = @transform_19, window_bounds = array<i64: 18, 1>}, {pipeline_mode = #tpu.pipeline_mode<synchronous>, transform_indices = @transform_20, window_bounds = array<i64: 18, 2>}]} {
    %c0 = arith.constant 0 : index
    %c0_0 = arith.constant 0 : index
    %0 = vector.load %arg1[%c0, %c0_0] : memref<27x128xf32, #tpu.memory_space<vmem>>, vector<27x128xf32>
    %c0_1 = arith.constant 0 : index
    %c0_2 = arith.constant 0 : index
    %1 = vector.load %arg5[%c0_1, %c0_2] : memref<16x27xf32, #tpu.memory_space<vmem>>, vector<16x27xf32>
    %cst = arith.constant dense<0.000000e+00> : vector<16x128xf32>
    %2 = tpu.matmul %1, %0, %cst {dimension_numbers = #tpu.dot_dimension_numbers<[1], [0], [0], [1], [0, 0, 1, 1], [], []>} : vector<16x27xf32>, vector<27x128xf32>, vector<16x128xf32> -> vector<16x128xf32>
    %c0_3 = arith.constant 0 : index
    %c0_4 = arith.constant 0 : index
    %3 = vector.load %arg6[%c0_3, %c0_4] : memref<16x1xf32, #tpu.memory_space<vmem>>, vector<16x1xf32>
    %4 = vector.broadcast %3 : vector<16x1xf32> to vector<16x128xf32>
    %5 = arith.addf %2, %4 : vector<16x128xf32>
    %6 = arith.negf %5 : vector<16x128xf32>
    %7 = math.exp %6 : vector<16x128xf32>
    %cst_5 = arith.constant 1.000000e+00 : f32
    %8 = vector.broadcast %cst_5 : f32 to vector<16x128xf32>
    %9 = arith.addf %8, %7 : vector<16x128xf32>
    %10 = arith.divf %8, %9 : vector<16x128xf32>
    %11 = arith.mulf %5, %10 : vector<16x128xf32>
    %c0_6 = arith.constant 0 : index
    %c0_7 = arith.constant 0 : index
    %12 = vector.load %arg7[%c0_6, %c0_7] : memref<64x16xf32, #tpu.memory_space<vmem>>, vector<64x16xf32>
    %cst_8 = arith.constant dense<0.000000e+00> : vector<64x128xf32>
    %13 = tpu.matmul %12, %11, %cst_8 {dimension_numbers = #tpu.dot_dimension_numbers<[1], [0], [0], [1], [0, 0, 1, 1], [], []>} : vector<64x16xf32>, vector<16x128xf32>, vector<64x128xf32> -> vector<64x128xf32>
    %c0_9 = arith.constant 0 : index
    %c0_10 = arith.constant 0 : index
    %14 = vector.load %arg8[%c0_9, %c0_10] : memref<64x1xf32, #tpu.memory_space<vmem>>, vector<64x1xf32>
    %15 = vector.broadcast %14 : vector<64x1xf32> to vector<64x128xf32>
    %16 = arith.addf %13, %15 : vector<64x128xf32>
    %17 = arith.negf %16 : vector<64x128xf32>
    %18 = math.exp %17 : vector<64x128xf32>
    %cst_11 = arith.constant 1.000000e+00 : f32
    %19 = vector.broadcast %cst_11 : f32 to vector<64x128xf32>
    %20 = arith.addf %19, %18 : vector<64x128xf32>
    %21 = arith.divf %19, %20 : vector<64x128xf32>
    %22 = arith.mulf %16, %21 : vector<64x128xf32>
    %cst_12 = arith.constant 0.000000e+00 : f32
    %23 = vector.broadcast %cst_12 : f32 to vector<64x128xf32>
    %c0_13 = arith.constant 0 : index
    %c0_14 = arith.constant 0 : index
    %c0_15 = arith.constant 0 : index
    %24 = vector.load %arg2[%c0_13, %c0_14, %c0_15] : memref<9x128x128xf32, #tpu.memory_space<vmem>>, vector<1x128x128xf32>
    %25 = vector.shape_cast %24 : vector<1x128x128xf32> to vector<128x128xf32>
    %cst_16 = arith.constant dense<0.000000e+00> : vector<64x128xf32>
    %26 = tpu.matmul %22, %25, %cst_16 {dimension_numbers = #tpu.dot_dimension_numbers<[1], [0], [0], [1], [0, 0, 1, 1], [], []>} : vector<64x128xf32>, vector<128x128xf32>, vector<64x128xf32> -> vector<64x128xf32>
    %c0_17 = arith.constant 0 : index
    %c0_18 = arith.constant 0 : index
    %c0_19 = arith.constant 0 : index
    %27 = vector.load %arg9[%c0_17, %c0_18, %c0_19] : memref<9x64x1xf32, #tpu.memory_space<vmem>>, vector<1x64x1xf32>
    %28 = vector.shape_cast %27 : vector<1x64x1xf32> to vector<64x1xf32>
    %29 = vector.broadcast %28 : vector<64x1xf32> to vector<64x128xf32>
    %30 = arith.mulf %26, %29 : vector<64x128xf32>
    %31 = arith.addf %23, %30 : vector<64x128xf32>
    %c1 = arith.constant 1 : index
    %c0_20 = arith.constant 0 : index
    %c0_21 = arith.constant 0 : index
    %32 = vector.load %arg2[%c1, %c0_20, %c0_21] : memref<9x128x128xf32, #tpu.memory_space<vmem>>, vector<1x128x128xf32>
    %33 = vector.shape_cast %32 : vector<1x128x128xf32> to vector<128x128xf32>
    %cst_22 = arith.constant dense<0.000000e+00> : vector<64x128xf32>
    %34 = tpu.matmul %22, %33, %cst_22 {dimension_numbers = #tpu.dot_dimension_numbers<[1], [0], [0], [1], [0, 0, 1, 1], [], []>} : vector<64x128xf32>, vector<128x128xf32>, vector<64x128xf32> -> vector<64x128xf32>
    %c1_23 = arith.constant 1 : index
    %c0_24 = arith.constant 0 : index
    %c0_25 = arith.constant 0 : index
    %35 = vector.load %arg9[%c1_23, %c0_24, %c0_25] : memref<9x64x1xf32, #tpu.memory_space<vmem>>, vector<1x64x1xf32>
    %36 = vector.shape_cast %35 : vector<1x64x1xf32> to vector<64x1xf32>
    %37 = vector.broadcast %36 : vector<64x1xf32> to vector<64x128xf32>
    %38 = arith.mulf %34, %37 : vector<64x128xf32>
    %39 = arith.addf %31, %38 : vector<64x128xf32>
    %c2 = arith.constant 2 : index
    %c0_26 = arith.constant 0 : index
    %c0_27 = arith.constant 0 : index
    %40 = vector.load %arg2[%c2, %c0_26, %c0_27] : memref<9x128x128xf32, #tpu.memory_space<vmem>>, vector<1x128x128xf32>
    %41 = vector.shape_cast %40 : vector<1x128x128xf32> to vector<128x128xf32>
    %cst_28 = arith.constant dense<0.000000e+00> : vector<64x128xf32>
    %42 = tpu.matmul %22, %41, %cst_28 {dimension_numbers = #tpu.dot_dimension_numbers<[1], [0], [0], [1], [0, 0, 1, 1], [], []>} : vector<64x128xf32>, vector<128x128xf32>, vector<64x128xf32> -> vector<64x128xf32>
    %c2_29 = arith.constant 2 : index
    %c0_30 = arith.constant 0 : index
    %c0_31 = arith.constant 0 : index
    %43 = vector.load %arg9[%c2_29, %c0_30, %c0_31] : memref<9x64x1xf32, #tpu.memory_space<vmem>>, vector<1x64x1xf32>
    %44 = vector.shape_cast %43 : vector<1x64x1xf32> to vector<64x1xf32>
    %45 = vector.broadcast %44 : vector<64x1xf32> to vector<64x128xf32>
    %46 = arith.mulf %42, %45 : vector<64x128xf32>
    %47 = arith.addf %39, %46 : vector<64x128xf32>
    %c3 = arith.constant 3 : index
    %c0_32 = arith.constant 0 : index
    %c0_33 = arith.constant 0 : index
    %48 = vector.load %arg2[%c3, %c0_32, %c0_33] : memref<9x128x128xf32, #tpu.memory_space<vmem>>, vector<1x128x128xf32>
    %49 = vector.shape_cast %48 : vector<1x128x128xf32> to vector<128x128xf32>
    %cst_34 = arith.constant dense<0.000000e+00> : vector<64x128xf32>
    %50 = tpu.matmul %22, %49, %cst_34 {dimension_numbers = #tpu.dot_dimension_numbers<[1], [0], [0], [1], [0, 0, 1, 1], [], []>} : vector<64x128xf32>, vector<128x128xf32>, vector<64x128xf32> -> vector<64x128xf32>
    %c3_35 = arith.constant 3 : index
    %c0_36 = arith.constant 0 : index
    %c0_37 = arith.constant 0 : index
    %51 = vector.load %arg9[%c3_35, %c0_36, %c0_37] : memref<9x64x1xf32, #tpu.memory_space<vmem>>, vector<1x64x1xf32>
    %52 = vector.shape_cast %51 : vector<1x64x1xf32> to vector<64x1xf32>
    %53 = vector.broadcast %52 : vector<64x1xf32> to vector<64x128xf32>
    %54 = arith.mulf %50, %53 : vector<64x128xf32>
    %55 = arith.addf %47, %54 : vector<64x128xf32>
    %c4 = arith.constant 4 : index
    %c0_38 = arith.constant 0 : index
    %c0_39 = arith.constant 0 : index
    %56 = vector.load %arg2[%c4, %c0_38, %c0_39] : memref<9x128x128xf32, #tpu.memory_space<vmem>>, vector<1x128x128xf32>
    %57 = vector.shape_cast %56 : vector<1x128x128xf32> to vector<128x128xf32>
    %cst_40 = arith.constant dense<0.000000e+00> : vector<64x128xf32>
    %58 = tpu.matmul %22, %57, %cst_40 {dimension_numbers = #tpu.dot_dimension_numbers<[1], [0], [0], [1], [0, 0, 1, 1], [], []>} : vector<64x128xf32>, vector<128x128xf32>, vector<64x128xf32> -> vector<64x128xf32>
    %c4_41 = arith.constant 4 : index
    %c0_42 = arith.constant 0 : index
    %c0_43 = arith.constant 0 : index
    %59 = vector.load %arg9[%c4_41, %c0_42, %c0_43] : memref<9x64x1xf32, #tpu.memory_space<vmem>>, vector<1x64x1xf32>
    %60 = vector.shape_cast %59 : vector<1x64x1xf32> to vector<64x1xf32>
    %61 = vector.broadcast %60 : vector<64x1xf32> to vector<64x128xf32>
    %62 = arith.mulf %58, %61 : vector<64x128xf32>
    %63 = arith.addf %55, %62 : vector<64x128xf32>
    %c5 = arith.constant 5 : index
    %c0_44 = arith.constant 0 : index
    %c0_45 = arith.constant 0 : index
    %64 = vector.load %arg2[%c5, %c0_44, %c0_45] : memref<9x128x128xf32, #tpu.memory_space<vmem>>, vector<1x128x128xf32>
    %65 = vector.shape_cast %64 : vector<1x128x128xf32> to vector<128x128xf32>
    %cst_46 = arith.constant dense<0.000000e+00> : vector<64x128xf32>
    %66 = tpu.matmul %22, %65, %cst_46 {dimension_numbers = #tpu.dot_dimension_numbers<[1], [0], [0], [1], [0, 0, 1, 1], [], []>} : vector<64x128xf32>, vector<128x128xf32>, vector<64x128xf32> -> vector<64x128xf32>
    %c5_47 = arith.constant 5 : index
    %c0_48 = arith.constant 0 : index
    %c0_49 = arith.constant 0 : index
    %67 = vector.load %arg9[%c5_47, %c0_48, %c0_49] : memref<9x64x1xf32, #tpu.memory_space<vmem>>, vector<1x64x1xf32>
    %68 = vector.shape_cast %67 : vector<1x64x1xf32> to vector<64x1xf32>
    %69 = vector.broadcast %68 : vector<64x1xf32> to vector<64x128xf32>
    %70 = arith.mulf %66, %69 : vector<64x128xf32>
    %71 = arith.addf %63, %70 : vector<64x128xf32>
    %c6 = arith.constant 6 : index
    %c0_50 = arith.constant 0 : index
    %c0_51 = arith.constant 0 : index
    %72 = vector.load %arg2[%c6, %c0_50, %c0_51] : memref<9x128x128xf32, #tpu.memory_space<vmem>>, vector<1x128x128xf32>
    %73 = vector.shape_cast %72 : vector<1x128x128xf32> to vector<128x128xf32>
    %cst_52 = arith.constant dense<0.000000e+00> : vector<64x128xf32>
    %74 = tpu.matmul %22, %73, %cst_52 {dimension_numbers = #tpu.dot_dimension_numbers<[1], [0], [0], [1], [0, 0, 1, 1], [], []>} : vector<64x128xf32>, vector<128x128xf32>, vector<64x128xf32> -> vector<64x128xf32>
    %c6_53 = arith.constant 6 : index
    %c0_54 = arith.constant 0 : index
    %c0_55 = arith.constant 0 : index
    %75 = vector.load %arg9[%c6_53, %c0_54, %c0_55] : memref<9x64x1xf32, #tpu.memory_space<vmem>>, vector<1x64x1xf32>
    %76 = vector.shape_cast %75 : vector<1x64x1xf32> to vector<64x1xf32>
    %77 = vector.broadcast %76 : vector<64x1xf32> to vector<64x128xf32>
    %78 = arith.mulf %74, %77 : vector<64x128xf32>
    %79 = arith.addf %71, %78 : vector<64x128xf32>
    %c7 = arith.constant 7 : index
    %c0_56 = arith.constant 0 : index
    %c0_57 = arith.constant 0 : index
    %80 = vector.load %arg2[%c7, %c0_56, %c0_57] : memref<9x128x128xf32, #tpu.memory_space<vmem>>, vector<1x128x128xf32>
    %81 = vector.shape_cast %80 : vector<1x128x128xf32> to vector<128x128xf32>
    %cst_58 = arith.constant dense<0.000000e+00> : vector<64x128xf32>
    %82 = tpu.matmul %22, %81, %cst_58 {dimension_numbers = #tpu.dot_dimension_numbers<[1], [0], [0], [1], [0, 0, 1, 1], [], []>} : vector<64x128xf32>, vector<128x128xf32>, vector<64x128xf32> -> vector<64x128xf32>
    %c7_59 = arith.constant 7 : index
    %c0_60 = arith.constant 0 : index
    %c0_61 = arith.constant 0 : index
    %83 = vector.load %arg9[%c7_59, %c0_60, %c0_61] : memref<9x64x1xf32, #tpu.memory_space<vmem>>, vector<1x64x1xf32>
    %84 = vector.shape_cast %83 : vector<1x64x1xf32> to vector<64x1xf32>
    %85 = vector.broadcast %84 : vector<64x1xf32> to vector<64x128xf32>
    %86 = arith.mulf %82, %85 : vector<64x128xf32>
    %87 = arith.addf %79, %86 : vector<64x128xf32>
    %c8 = arith.constant 8 : index
    %c0_62 = arith.constant 0 : index
    %c0_63 = arith.constant 0 : index
    %88 = vector.load %arg2[%c8, %c0_62, %c0_63] : memref<9x128x128xf32, #tpu.memory_space<vmem>>, vector<1x128x128xf32>
    %89 = vector.shape_cast %88 : vector<1x128x128xf32> to vector<128x128xf32>
    %cst_64 = arith.constant dense<0.000000e+00> : vector<64x128xf32>
    %90 = tpu.matmul %22, %89, %cst_64 {dimension_numbers = #tpu.dot_dimension_numbers<[1], [0], [0], [1], [0, 0, 1, 1], [], []>} : vector<64x128xf32>, vector<128x128xf32>, vector<64x128xf32> -> vector<64x128xf32>
    %c8_65 = arith.constant 8 : index
    %c0_66 = arith.constant 0 : index
    %c0_67 = arith.constant 0 : index
    %91 = vector.load %arg9[%c8_65, %c0_66, %c0_67] : memref<9x64x1xf32, #tpu.memory_space<vmem>>, vector<1x64x1xf32>
    %92 = vector.shape_cast %91 : vector<1x64x1xf32> to vector<64x1xf32>
    %93 = vector.broadcast %92 : vector<64x1xf32> to vector<64x128xf32>
    %94 = arith.mulf %90, %93 : vector<64x128xf32>
    %95 = arith.addf %87, %94 : vector<64x128xf32>
    %c0_68 = arith.constant 0 : index
    %c0_69 = arith.constant 0 : index
    %96 = vector.load %arg10[%c0_68, %c0_69] : memref<64x1xf32, #tpu.memory_space<vmem>>, vector<64x1xf32>
    %97 = vector.broadcast %96 : vector<64x1xf32> to vector<64x128xf32>
    %98 = arith.addf %95, %97 : vector<64x128xf32>
    %99 = arith.negf %98 : vector<64x128xf32>
    %100 = math.exp %99 : vector<64x128xf32>
    %cst_70 = arith.constant 1.000000e+00 : f32
    %101 = vector.broadcast %cst_70 : f32 to vector<64x128xf32>
    %102 = arith.addf %101, %100 : vector<64x128xf32>
    %103 = arith.divf %101, %102 : vector<64x128xf32>
    %104 = arith.mulf %98, %103 : vector<64x128xf32>
    %c0_71 = arith.constant 0 : index
    %c0_72 = arith.constant 0 : index
    %105 = vector.load %arg3[%c0_71, %c0_72] : memref<128x2xf32, #tpu.memory_space<vmem>>, vector<128x2xf32>
    %cst_73 = arith.constant dense<0.000000e+00> : vector<64x2xf32>
    %106 = tpu.matmul %104, %105, %cst_73 {dimension_numbers = #tpu.dot_dimension_numbers<[1], [0], [0], [1], [0, 0, 1, 1], [], []>} : vector<64x128xf32>, vector<128x2xf32>, vector<64x2xf32> -> vector<64x2xf32>
    %c0_74 = arith.constant 0 : index
    %c0_75 = arith.constant 0 : index
    %107 = vector.load %arg11[%c0_74, %c0_75] : memref<4x64xf32, #tpu.memory_space<vmem>>, vector<4x64xf32>
    %cst_76 = arith.constant dense<0.000000e+00> : vector<4x2xf32>
    %108 = tpu.matmul %107, %106, %cst_76 {dimension_numbers = #tpu.dot_dimension_numbers<[1], [0], [0], [1], [0, 0, 1, 1], [], []>} : vector<4x64xf32>, vector<64x2xf32>, vector<4x2xf32> -> vector<4x2xf32>
    %c0_77 = arith.constant 0 : index
    %c0_78 = arith.constant 0 : index
    %109 = vector.load %arg12[%c0_77, %c0_78] : memref<4x1xf32, #tpu.memory_space<vmem>>, vector<4x1xf32>
    %110 = vector.broadcast %109 : vector<4x1xf32> to vector<4x2xf32>
    %111 = arith.addf %108, %110 : vector<4x2xf32>
    %112 = arith.negf %111 : vector<4x2xf32>
    %113 = math.exp %112 : vector<4x2xf32>
    %cst_79 = arith.constant 1.000000e+00 : f32
    %114 = vector.broadcast %cst_79 : f32 to vector<4x2xf32>
    %115 = arith.addf %114, %113 : vector<4x2xf32>
    %116 = arith.divf %114, %115 : vector<4x2xf32>
    %117 = arith.mulf %111, %116 : vector<4x2xf32>
    %c0_80 = arith.constant 0 : index
    %c0_81 = arith.constant 0 : index
    %118 = vector.load %arg13[%c0_80, %c0_81] : memref<64x4xf32, #tpu.memory_space<vmem>>, vector<64x4xf32>
    %cst_82 = arith.constant dense<0.000000e+00> : vector<64x2xf32>
    %119 = tpu.matmul %118, %117, %cst_82 {dimension_numbers = #tpu.dot_dimension_numbers<[1], [0], [0], [1], [0, 0, 1, 1], [], []>} : vector<64x4xf32>, vector<4x2xf32>, vector<64x2xf32> -> vector<64x2xf32>
    %c0_83 = arith.constant 0 : index
    %c0_84 = arith.constant 0 : index
    %120 = vector.load %arg14[%c0_83, %c0_84] : memref<64x1xf32, #tpu.memory_space<vmem>>, vector<64x1xf32>
    %121 = vector.broadcast %120 : vector<64x1xf32> to vector<64x2xf32>
    %122 = arith.addf %119, %121 : vector<64x2xf32>
    %123 = arith.negf %122 : vector<64x2xf32>
    %124 = math.exp %123 : vector<64x2xf32>
    %cst_85 = arith.constant 1.000000e+00 : f32
    %125 = vector.broadcast %cst_85 : f32 to vector<64x2xf32>
    %126 = arith.addf %125, %124 : vector<64x2xf32>
    %127 = arith.divf %125, %126 : vector<64x2xf32>
    %c0_86 = arith.constant 0 : index
    %c0_87 = arith.constant 0 : index
    %128 = vector.load %arg4[%c0_86, %c0_87] : memref<2x128xf32, #tpu.memory_space<vmem>>, vector<2x128xf32>
    %cst_88 = arith.constant dense<0.000000e+00> : vector<64x128xf32>
    %129 = tpu.matmul %127, %128, %cst_88 {dimension_numbers = #tpu.dot_dimension_numbers<[1], [0], [0], [1], [0, 0, 1, 1], [], []>} : vector<64x2xf32>, vector<2x128xf32>, vector<64x128xf32> -> vector<64x128xf32>
    %130 = arith.mulf %104, %129 : vector<64x128xf32>
    %c0_89 = arith.constant 0 : index
    %c0_90 = arith.constant 0 : index
    %131 = vector.load %arg15[%c0_89, %c0_90] : memref<16x64xf32, #tpu.memory_space<vmem>>, vector<16x64xf32>
    %cst_91 = arith.constant dense<0.000000e+00> : vector<16x128xf32>
    %132 = tpu.matmul %131, %130, %cst_91 {dimension_numbers = #tpu.dot_dimension_numbers<[1], [0], [0], [1], [0, 0, 1, 1], [], []>} : vector<16x64xf32>, vector<64x128xf32>, vector<16x128xf32> -> vector<16x128xf32>
    %c0_92 = arith.constant 0 : index
    %c0_93 = arith.constant 0 : index
    %133 = vector.load %arg16[%c0_92, %c0_93] : memref<16x1xf32, #tpu.memory_space<vmem>>, vector<16x1xf32>
    %134 = vector.broadcast %133 : vector<16x1xf32> to vector<16x128xf32>
    %135 = arith.addf %132, %134 : vector<16x128xf32>
    %136 = arith.addf %135, %11 : vector<16x128xf32>
    %c0_94 = arith.constant 0 : index
    %c0_95 = arith.constant 0 : index
    %137 = vector.load %arg17[%c0_94, %c0_95] : memref<32x16xf32, #tpu.memory_space<vmem>>, vector<32x16xf32>
    %cst_96 = arith.constant dense<0.000000e+00> : vector<32x128xf32>
    %138 = tpu.matmul %137, %136, %cst_96 {dimension_numbers = #tpu.dot_dimension_numbers<[1], [0], [0], [1], [0, 0, 1, 1], [], []>} : vector<32x16xf32>, vector<16x128xf32>, vector<32x128xf32> -> vector<32x128xf32>
    %c0_97 = arith.constant 0 : index
    %c0_98 = arith.constant 0 : index
    %139 = vector.load %arg18[%c0_97, %c0_98] : memref<32x1xf32, #tpu.memory_space<vmem>>, vector<32x1xf32>
    %140 = vector.broadcast %139 : vector<32x1xf32> to vector<32x128xf32>
    %141 = arith.addf %138, %140 : vector<32x128xf32>
    %142 = arith.negf %141 : vector<32x128xf32>
    %143 = math.exp %142 : vector<32x128xf32>
    %cst_99 = arith.constant 1.000000e+00 : f32
    %144 = vector.broadcast %cst_99 : f32 to vector<32x128xf32>
    %145 = arith.addf %144, %143 : vector<32x128xf32>
    %146 = arith.divf %144, %145 : vector<32x128xf32>
    %147 = arith.mulf %141, %146 : vector<32x128xf32>
    %c0_100 = arith.constant 0 : index
    %c0_101 = arith.constant 0 : index
    %148 = vector.load %arg19[%c0_100, %c0_101] : memref<18x32xf32, #tpu.memory_space<vmem>>, vector<18x32xf32>
    %cst_102 = arith.constant dense<0.000000e+00> : vector<18x128xf32>
    %149 = tpu.matmul %148, %147, %cst_102 {dimension_numbers = #tpu.dot_dimension_numbers<[1], [0], [0], [1], [0, 0, 1, 1], [], []>} : vector<18x32xf32>, vector<32x128xf32>, vector<18x128xf32> -> vector<18x128xf32>
    %cst_103 = arith.constant dense<0.000000e+00> : vector<18x2xf32>
    %150 = tpu.matmul %149, %105, %cst_103 {dimension_numbers = #tpu.dot_dimension_numbers<[1], [0], [0], [1], [0, 0, 1, 1], [], []>} : vector<18x128xf32>, vector<128x2xf32>, vector<18x2xf32> -> vector<18x2xf32>
    %c0_104 = arith.constant 0 : index
    %c0_105 = arith.constant 0 : index
    %151 = vector.load %arg20[%c0_104, %c0_105] : memref<18x1xf32, #tpu.memory_space<vmem>>, vector<18x1xf32>
    %152 = vector.broadcast %151 : vector<18x1xf32> to vector<18x2xf32>
    %153 = arith.addf %150, %152 : vector<18x2xf32>
    %cst_106 = arith.constant dense<0xFF800000> : vector<2xf32>
    %154 = vector.multi_reduction <maximumf>, %153, %cst_106 [0] : vector<18x2xf32> to vector<2xf32>
    %155 = vector.shape_cast %154 : vector<2xf32> to vector<1x2xf32>
    %156 = vector.broadcast %155 : vector<1x2xf32> to vector<18x2xf32>
    %157 = arith.subf %153, %156 : vector<18x2xf32>
    %158 = math.exp %157 : vector<18x2xf32>
    %cst_107 = arith.constant dense<0.000000e+00> : vector<2xf32>
    %159 = vector.multi_reduction <add>, %158, %cst_107 [0] : vector<18x2xf32> to vector<2xf32>
    %160 = vector.shape_cast %159 : vector<2xf32> to vector<1x2xf32>
    %161 = vector.broadcast %160 : vector<1x2xf32> to vector<18x2xf32>
    %162 = arith.divf %158, %161 : vector<18x2xf32>
    %c0_108 = arith.constant 0 : index
    %c0_109 = arith.constant 0 : index
    %163 = vector.load %arg21[%c0_108, %c0_109] : memref<18x2xf32, #tpu.memory_space<vmem>>, vector<18x2xf32>
    tpu.vector_store %arg21[%c0_108, %c0_109], %162 {strides = array<i32>} : memref<18x2xf32, #tpu.memory_space<vmem>>, vector<18x2xf32>,
    return
  }
  func.func @transform_0(%arg0: i32) -> (i32, i32) {
    %c0_i32 = arith.constant 0 : i32
    %c0_i32_0 = arith.constant 0 : i32
    %c0_i32_1 = arith.constant 0 : i32
    return %c0_i32, %c0_i32_0 : i32, i32
  }
  func.func @transform_1(%arg0: i32) -> (i32, i32, i32) {
    %c0_i32 = arith.constant 0 : i32
    %c0_i32_0 = arith.constant 0 : i32
    %c0_i32_1 = arith.constant 0 : i32
    %c0_i32_2 = arith.constant 0 : i32
    return %c0_i32, %c0_i32_0, %c0_i32_1 : i32, i32, i32
  }
  func.func @transform_2(%arg0: i32) -> (i32, i32) {
    %c0_i32 = arith.constant 0 : i32
    %c0_i32_0 = arith.constant 0 : i32
    %c0_i32_1 = arith.constant 0 : i32
    return %c0_i32, %c0_i32_0 : i32, i32
  }
  func.func @transform_3(%arg0: i32) -> (i32, i32) {
    %c0_i32 = arith.constant 0 : i32
    %c0_i32_0 = arith.constant 0 : i32
    %c0_i32_1 = arith.constant 0 : i32
    return %c0_i32, %c0_i32_0 : i32, i32
  }
  func.func @transform_4(%arg0: i32) -> (i32, i32) {
    %c0_i32 = arith.constant 0 : i32
    %c0_i32_0 = arith.constant 0 : i32
    %c0_i32_1 = arith.constant 0 : i32
    return %c0_i32, %c0_i32_0 : i32, i32
  }
  func.func @transform_5(%arg0: i32) -> (i32, i32) {
    %c0_i32 = arith.constant 0 : i32
    %c0_i32_0 = arith.constant 0 : i32
    %c0_i32_1 = arith.constant 0 : i32
    return %c0_i32, %c0_i32_0 : i32, i32
  }
  func.func @transform_6(%arg0: i32) -> (i32, i32) {
    %c0_i32 = arith.constant 0 : i32
    %c0_i32_0 = arith.constant 0 : i32
    %c0_i32_1 = arith.constant 0 : i32
    return %c0_i32, %c0_i32_0 : i32, i32
  }
  func.func @transform_7(%arg0: i32) -> (i32, i32) {
    %c0_i32 = arith.constant 0 : i32
    %c0_i32_0 = arith.constant 0 : i32
    %c0_i32_1 = arith.constant 0 : i32
    return %c0_i32, %c0_i32_0 : i32, i32
  }
  func.func @transform_8(%arg0: i32) -> (i32, i32, i32) {
    %c0_i32 = arith.constant 0 : i32
    %c0_i32_0 = arith.constant 0 : i32
    %c0_i32_1 = arith.constant 0 : i32
    %c0_i32_2 = arith.constant 0 : i32
    return %c0_i32, %c0_i32_0, %c0_i32_1 : i32, i32, i32
  }
  func.func @transform_9(%arg0: i32) -> (i32, i32) {
    %c0_i32 = arith.constant 0 : i32
    %c0_i32_0 = arith.constant 0 : i32
    %c0_i32_1 = arith.constant 0 : i32
    return %c0_i32, %c0_i32_0 : i32, i32
  }
  func.func @transform_10(%arg0: i32) -> (i32, i32) {
    %c0_i32 = arith.constant 0 : i32
    %c0_i32_0 = arith.constant 0 : i32
    %c0_i32_1 = arith.constant 0 : i32
    return %c0_i32, %c0_i32_0 : i32, i32
  }
  func.func @transform_11(%arg0: i32) -> (i32, i32) {
    %c0_i32 = arith.constant 0 : i32
    %c0_i32_0 = arith.constant 0 : i32
    %c0_i32_1 = arith.constant 0 : i32
    return %c0_i32, %c0_i32_0 : i32, i32
  }
  func.func @transform_12(%arg0: i32) -> (i32, i32) {
    %c0_i32 = arith.constant 0 : i32
    %c0_i32_0 = arith.constant 0 : i32
    %c0_i32_1 = arith.constant 0 : i32
    return %c0_i32, %c0_i32_0 : i32, i32
  }
  func.func @transform_13(%arg0: i32) -> (i32, i32) {
    %c0_i32 = arith.constant 0 : i32
    %c0_i32_0 = arith.constant 0 : i32
    %c0_i32_1 = arith.constant 0 : i32
    return %c0_i32, %c0_i32_0 : i32, i32
  }
  func.func @transform_14(%arg0: i32) -> (i32, i32) {
    %c0_i32 = arith.constant 0 : i32
    %c0_i32_0 = arith.constant 0 : i32
    %c0_i32_1 = arith.constant 0 : i32
    return %c0_i32, %c0_i32_0 : i32, i32
  }
  func.func @transform_15(%arg0: i32) -> (i32, i32) {
    %c0_i32 = arith.constant 0 : i32
    %c0_i32_0 = arith.constant 0 : i32
    %c0_i32_1 = arith.constant 0 : i32
    return %c0_i32, %c0_i32_0 : i32, i32
  }
  func.func @transform_16(%arg0: i32) -> (i32, i32) {
    %c0_i32 = arith.constant 0 : i32
    %c0_i32_0 = arith.constant 0 : i32
    %c0_i32_1 = arith.constant 0 : i32
    return %c0_i32, %c0_i32_0 : i32, i32
  }
  func.func @transform_17(%arg0: i32) -> (i32, i32) {
    %c0_i32 = arith.constant 0 : i32
    %c0_i32_0 = arith.constant 0 : i32
    %c0_i32_1 = arith.constant 0 : i32
    return %c0_i32, %c0_i32_0 : i32, i32
  }
  func.func @transform_18(%arg0: i32) -> (i32, i32) {
    %c0_i32 = arith.constant 0 : i32
    %c0_i32_0 = arith.constant 0 : i32
    %c0_i32_1 = arith.constant 0 : i32
    return %c0_i32, %c0_i32_0 : i32, i32
  }
  func.func @transform_19(%arg0: i32) -> (i32, i32) {
    %c0_i32 = arith.constant 0 : i32
    %c0_i32_0 = arith.constant 0 : i32
    %c0_i32_1 = arith.constant 0 : i32
    return %c0_i32, %c0_i32_0 : i32, i32
  }
  func.func @transform_20(%arg0: i32) -> (i32, i32) {
    %c0_i32 = arith.constant 0 : i32
    %c0_i32_0 = arith.constant 0 : i32
    %c0_i32_1 = arith.constant 0 : i32
    return %c0_i32, %c0_i32_0 : i32, i32
  }
}

</mosaic_0001>

<bundles_post_ra>
// kernel: my_efficientnet_forward.1
= control target key start
LH: loop header
LB: loop body
LE: loop exit
PB: predicated region body
PF: predicated region fallthrough
CT: control target
= control target key end

     0   :  { %vm90_vm0 = vcmask 1042432   ;;  %v4617_v0 = vmov 0   ;;  %vm83_vm1 = vcmask 220160   ;;  %vm239_vm2 = vcmask 130048   ;;  %s6386_s5 = inlined_call_operand.vmem [shape: f32[16,1], index: 5, kind: input, shape index: {}]   ;;  %s6387_s0 = inlined_call_operand.vmem [shape: f32[27,128], index: 0, kind: input, shape index: {}]   ;;  %s6388_s4 = inlined_call_operand.vmem [shape: f32[16,27], index: 4, kind: input, shape index: {}]   ;;  %s6389_s7 = inlined_call_operand.vmem [shape: f32[64,1], index: 7, kind: input, shape index: {}]   ;;  %s6390_s8 = inlined_call_operand.vmem [shape: f32[9,64,1], index: 8, kind: input, shape index: {}]   ;;  %s6391_s6 = inlined_call_operand.vmem [shape: f32[64,16], index: 6, kind: input, shape index: {}]   ;;  %s6392_s9 = inlined_call_operand.vmem [shape: f32[64,1], index: 9, kind: input, shape index: {}]   ;;  %s6393_s11 = inlined_call_operand.vmem [shape: f32[4,1], index: 11, kind: input, shape index: {}]   ;;  %s6394_s13 = inlined_call_operand.vmem [shape: f32[64,1], index: 13, kind: input, shape index: {}]   ;;  %s6395_s15 = inlined_call_operand.vmem [shape: f32[16,1], index: 15, kind: input, shape index: {}]   ;;  %s6396_s17 = inlined_call_operand.vmem [shape: f32[32,1], index: 17, kind: input, shape index: {}]   ;;  %s6397_s19 = inlined_call_operand.vmem [shape: f32[18,1], index: 19, kind: input, shape index: {}]   ;;  %s6398_s1 = inlined_call_operand.vmem [shape: f32[9,128,128], index: 1, kind: input, shape index: {}]   ;;  %s6399_s2 = inlined_call_operand.vmem [shape: f32[128,2], index: 2, kind: input, shape index: {}]   ;;  %s6400_s10 = inlined_call_operand.vmem [shape: f32[4,64], index: 10, kind: input, shape index: {}]   ;;  %s6401_s12 = inlined_call_operand.vmem [shape: f32[64,4], index: 12, kind: input, shape index: {}]   ;;  %s6402_s3 = inlined_call_operand.vmem [shape: f32[2,128], index: 3, kind: input, shape index: {}]   ;;  %s6403_s14 = inlined_call_operand.vmem [shape: f32[16,64], index: 14, kind: input, shape index: {}]   ;;  %s6404_s16 = inlined_call_operand.vmem [shape: f32[32,16], index: 16, kind: input, shape index: {}]   ;;  %s6405_s18 = inlined_call_operand.vmem [shape: f32[18,32], index: 18, kind: input, shape index: {}]   ;;  %s6406_s20 = inlined_call_operand.vmem [shape: f32[18,2], index: 20, kind: output, shape index: {}]  }
   0x1   :  { %6430 = sst [smem:[#allocation78_spill]] %s6386_s5  ;;  %4483 = vset.pattern.permute.xlu0 %v4617_v0  ;;  %4484 = vset.pattern.permute.xlu1 %v4617_v0  ;;  %v183_v63 = vld [vmem:[%s6391_s6] sm:$0xff]  ;;  %vm4619_vm3 = vmmov 0   ;;  %vm2346_vm4 = vcmask 523264   ;;  %vm2483_vm5 = vcmask 31744   ;;  %vm2508_vm6 = vcmask 1043456  }
   0x2   :  { %6431 = sst [smem:[#allocation79_spill]] %s6387_s0  ;;  %3894 = vmatprep.mubr.msk.f32.mxu1 %vm239_vm2, %v183_v63  ;;  %vm2691_vm7 = vcmask 1041408   ;;  %vm2666_vm8 = vcmask 15360   ;;  %vm3061_vm9 = vcmask 261120   ;;  %vm3251_vm10 = vcmask 9216  }
   0x3   :  { %6432 = sst [smem:[#allocation80_spill]] %s6388_s4 }
   0x4   :  { %6433 = sst [smem:[#allocation81_spill]] %s6389_s7 }
   0x5   :  { %6434 = sst [smem:[#allocation82_spill]] %s6390_s8 }
   0x6   :  { %s6435_s23 = sld [smem:[#allocation78_spill]] }
   0x7   :  { %s6436_s25 = sld [smem:[#allocation79_spill]] }
   0x8   :  { %s6437_s21 = sld [smem:[#allocation80_spill]] }
   0x9   :  { %s6438_s26 = sld [smem:[#allocation81_spill]] }
   0xa   :  { %s6439_s4 = sld [smem:[#allocation82_spill]] }
   0xc   :  { %v72_v1 = vld [vmem:[%s6435_s23 + $0x8] sm:$0xff]  ;;  %v71_v4 = vld [vmem:[%s6435_s23] sm:$0xff] }
   0xd   :  { %v68_v2 = vld [vmem:[%s6436_s25 + $0x18] sm:$0x7]  ;;  %v67_v3 = vld [vmem:[%s6436_s25 + $0x10] sm:$0xff]  ;;  %80 = vperm.xlu0 %4483, %v72_v1   ;;  %v66_v5 = vld [vmem:[%s6436_s25 + $0x8] sm:$0xff] }
   0xe   :  { %3879 = vmatprep.subr.msk.mxu0 %vm90_vm0, %v68_v2  ;;  %v69_v6 = vld [vmem:[%s6437_s21] sm:$0xff]  ;;  %v70_v8 = vld [vmem:[%s6437_s21 + $0x8] sm:$0xff] }
   0xf   :  { %3880 = vmatpush3.msk.msra.mxu0 %vm90_vm0, %v68_v2  ;;  %3887 = vmatprep.mubr.msk.f32.mxu0 %vm83_vm1, %v69_v6  ;;  %v65_v7 = vld [vmem:[%s6436_s25] sm:$0xff]  ;;  %v193_v9 = vld [vmem:[%s6438_s26 + $0x10] sm:$0xff]  ;;  %v192_v12 = vld [vmem:[%s6438_s26 + $0x8] sm:$0xff] }
  0x10   :  { %3881 = vmatprep.subr.mxu0 %v67_v3  ;;  %v195_v10 = vld [vmem:[%s6438_s26 + $0x20] sm:$0xff]  ;;  %v197_v13 = vld [vmem:[%s6438_s26 + $0x30] sm:$0xff]  ;;  %v194_v14 = vld [vmem:[%s6438_s26 + $0x18] sm:$0xff] }
  0x11   :  { %3882 = vmatpush3.msra.mxu0 %v67_v3  ;;  %75 = vperm.xlu0 %4483, %v71_v4   ;;  %v191_v11 = vld [vmem:[%s6438_s26] sm:$0xff]  ;;  %v196_v16 = vld [vmem:[%s6438_s26 + $0x28] sm:$0xff]  ;;  %v198_v18 = vld [vmem:[%s6438_s26 + $0x38] sm:$0xff] }
  0x12   :  { %3883 = vmatprep.subr.mxu0 %v66_v5  ;;  %201 = vperm.xlu1 %4484, %v191_v11   ;;  %v546_v15 = vld [vmem:[%s6439_s4] sm:$0xff]  ;;  %v547_v17 = vld [vmem:[%s6439_s4 + $0x8] sm:$0xff]  ;;  %v548_v21 = vld [vmem:[%s6439_s4 + $0x10] sm:$0xff] }
  0x13   :  { %3884 = vmatpush3.msra.mxu0 %v66_v5  ;;  %v3353_v19 = vld [vmem:[%s6439_s4 + $0x80] sm:$0xff]  ;;  %v3330_v22 = vld [vmem:[%s6439_s4 + $0x48] sm:$0xff]  ;;  %v3332_v25 = vld [vmem:[%s6439_s4 + $0x58] sm:$0xff] }
  0x14   :  { %3885 = vmatprep.subr.mxu0 %v65_v7  ;;  %v3329_v20 = vld [vmem:[%s6439_s4 + $0x40] sm:$0xff]  ;;  %v3354_v24 = vld [vmem:[%s6439_s4 + $0x88] sm:$0xff]  ;;  %v3331_v26 = vld [vmem:[%s6439_s4 + $0x50] sm:$0xff] }
  0x15   :  { %3886 = vmatpush3.msra.mxu0 %v65_v7  ;;  %211 = vperm.xlu0 %4483, %v193_v9   ;;  %v3377_v23 = vld [vmem:[%s6439_s4 + $0xc0] sm:$0xff]  ;;  %v3355_v27 = vld [vmem:[%s6439_s4 + $0x90] sm:$0xff]  ;;  %v549_v28 = vld [vmem:[%s6439_s4 + $0x18] sm:$0xff] }
  0x16   :  { %3888 = vmatmul.mubr.msk.f32.vlgmr.msra.gmra.mxu0 %vm83_vm1, %v70_v8  ;;  %206 = vperm.xlu1 %4484, %v192_v12   ;;  %v3356_v29 = vld [vmem:[%s6439_s4 + $0x98] sm:$0xff]  ;;  %v3378_v30 = vld [vmem:[%s6439_s4 + $0xc8] sm:$0xff]  ;;  %v550_v31 = vld [vmem:[%s6439_s4 + $0x20] sm:$0xff] }
  0x17   :  { %v3401_v32 = vld [vmem:[%s6439_s4 + $0x100] sm:$0xff]  ;;  %v3379_v33 = vld [vmem:[%s6439_s4 + $0xd0] sm:$0xff]  ;;  %v3402_v34 = vld [vmem:[%s6439_s4 + $0x108] sm:$0xff] }
  0x18   :  { %v551_v35 = vld [vmem:[%s6439_s4 + $0x28] sm:$0xff]  ;;  %v3333_v36 = vld [vmem:[%s6439_s4 + $0x60] sm:$0xff]  ;;  %v3380_v37 = vld [vmem:[%s6439_s4 + $0xd8] sm:$0xff] }
  0x19   :  { %221 = vperm.xlu0 %4483, %v195_v10   ;;  %v3425_v38 = vld [vmem:[%s6439_s4 + $0x140] sm:$0xff]  ;;  %v3334_v40 = vld [vmem:[%s6439_s4 + $0x68] sm:$0xff]  ;;  %v3404_v43 = vld [vmem:[%s6439_s4 + $0x118] sm:$0xff] }
  0x1a   :  { %216 = vperm.xlu1 %4484, %v194_v14   ;;  %v3357_v39 = vld [vmem:[%s6439_s4 + $0xa0] sm:$0xff]  ;;  %v3426_v42 = vld [vmem:[%s6439_s4 + $0x148] sm:$0xff]  ;;  %v3403_v44 = vld [vmem:[%s6439_s4 + $0x110] sm:$0xff] }
  0x1b   :  { %v3449_v41 = vld [vmem:[%s6439_s4 + $0x180] sm:$0xff]  ;;  %v552_v45 = vld [vmem:[%s6439_s4 + $0x30] sm:$0xff]  ;;  %v3358_v46 = vld [vmem:[%s6439_s4 + $0xa8] sm:$0xff] }
  0x1c   :  { %v3381_v47 = vld [vmem:[%s6439_s4 + $0xe0] sm:$0xff]  ;;  %v3450_v48 = vld [vmem:[%s6439_s4 + $0x188] sm:$0xff]  ;;  %v3335_v50 = vld [vmem:[%s6439_s4 + $0x70] sm:$0xff] }
  0x1d   :  { %231 = vperm.xlu0 %4483, %v197_v13   ;;  %v3473_v49 = vld [vmem:[%s6439_s4 + $0x1c0] sm:$0xff]  ;;  %v3336_v51 = vld [vmem:[%s6439_s4 + $0x78] sm:$0xff]  ;;  %v3427_v52 = vld [vmem:[%s6439_s4 + $0x150] sm:$0xff] }
  0x1e   :  { %226 = vperm.xlu1 %4484, %v196_v16   ;;  %v3428_v53 = vld [vmem:[%s6439_s4 + $0x158] sm:$0xff]  ;;  %v3359_v55 = vld [vmem:[%s6439_s4 + $0xb0] sm:$0xff]  ;;  %v3382_v56 = vld [vmem:[%s6439_s4 + $0xe8] sm:$0xff] }
  0x1f   :  { %v553_v54 = vld [vmem:[%s6439_s4 + $0x38] sm:$0xff]  ;;  %v3451_v57 = vld [vmem:[%s6439_s4 + $0x190] sm:$0xff]  ;;  %v3474_v58 = vld [vmem:[%s6439_s4 + $0x1c8] sm:$0xff] }
  0x20   :  { %v3360_v59 = vld [vmem:[%s6439_s4 + $0xb8] sm:$0xff]  ;;  %v3405_v60 = vld [vmem:[%s6439_s4 + $0x120] sm:$0xff]  ;;  %v3383_v0 = vld [vmem:[%s6439_s4 + $0xf0] sm:$0xff] }
  0x21   :  { %556 = vperm.xlu0 %4483, %v546_v15   ;;  %v3452_v61 = vld [vmem:[%s6439_s4 + $0x198] sm:$0xff]  ;;  %v3497_v62 = vld [vmem:[%s6439_s4 + $0x200] sm:$0xff]  ;;  %v3406_v1 = vld [vmem:[%s6439_s4 + $0x128] sm:$0xff] }
  0x22   :  { %236 = vperm.xlu1 %4484, %v198_v18   ;;  %v3475_v2 = vld [vmem:[%s6439_s4 + $0x1d0] sm:$0xff]  ;;  %v3498_v3 = vld [vmem:[%s6439_s4 + $0x208] sm:$0xff]  ;;  %v3429_v5 = vld [vmem:[%s6439_s4 + $0x160] sm:$0xff] }
  0x23   :  { %v3430_v4 = vld [vmem:[%s6439_s4 + $0x168] sm:$0xff]  ;;  %v3407_v6 = vld [vmem:[%s6439_s4 + $0x130] sm:$0xff]  ;;  %v3384_v7 = vld [vmem:[%s6439_s4 + $0xf8] sm:$0xff] }
  0x24   :  { %v3499_v8 = vld [vmem:[%s6439_s4 + $0x210] sm:$0xff]  ;;  %v3476_v9 = vld [vmem:[%s6439_s4 + $0x1d8] sm:$0xff]  ;;  %v3453_v11 = vld [vmem:[%s6439_s4 + $0x1a0] sm:$0xff] }
  0x25   :  { %561 = vperm.xlu0 %4483, %v547_v17   ;;  %v3408_v10 = vld [vmem:[%s6439_s4 + $0x138] sm:$0xff]  ;;  %v2106_v13 = vld [vmem:[%s6392_s9] sm:$0xff]  ;;  %v3431_v14 = vld [vmem:[%s6439_s4 + $0x170] sm:$0xff] }
  0x26   :  { %743 = vperm.xlu1 %4484, %v3329_v20   ;;  %v3500_v12 = vld [vmem:[%s6439_s4 + $0x218] sm:$0xff]  ;;  %v3454_v15 = vld [vmem:[%s6439_s4 + $0x1a8] sm:$0xff]  ;;  %v3455_v18 = vld [vmem:[%s6439_s4 + $0x1b0] sm:$0xff] }
  0x27   :  { %v3432_v16 = vld [vmem:[%s6439_s4 + $0x178] sm:$0xff]  ;;  %v2107_v17 = vld [vmem:[%s6392_s9 + $0x8] sm:$0xff]  ;;  %v2108_v20 = vld [vmem:[%s6392_s9 + $0x10] sm:$0xff] }
  0x29   :  { %930 = vperm.xlu0 %4483, %v3353_v19   ;;  %v3477_v19 = vld [vmem:[%s6439_s4 + $0x1e0] sm:$0xff] }
  0x2a   :  { %748 = vperm.xlu1 %4484, %v3330_v22   ;;  %v3502_v22 = vld [vmem:[%s6439_s4 + $0x228] sm:$0xff] }
  0x2d   :  { %566 = vperm.xlu0 %4483, %v548_v21   ;;  %v3478_v21 = vld [vmem:[%s6439_s4 + $0x1e8] sm:$0xff] }
  0x2e   :  { %935 = vperm.xlu1 %4484, %v3354_v24   ;;  %v3479_v24 = vld [vmem:[%s6439_s4 + $0x1f0] sm:$0xff] }
  0x31   :  { %1117 = vperm.xlu0 %4483, %v3377_v23   ;;  %v3501_v23 = vld [vmem:[%s6439_s4 + $0x220] sm:$0xff] }
  0x32   :  { %753 = vperm.xlu1 %4484, %v3331_v26   ;;  %v3503_v26 = vld [vmem:[%s6439_s4 + $0x230] sm:$0xff] }
  0x35   :  { %758 = vperm.xlu0 %4483, %v3332_v25   ;;  %v3456_v25 = vld [vmem:[%s6439_s4 + $0x1b8] sm:$0xff] }
  0x36   :  { %571 = vperm.xlu1 %4484, %v549_v28   ;;  %v3504_v28 = vld [vmem:[%s6439_s4 + $0x238] sm:$0xff] }
  0x39   :  { %940 = vperm.xlu0 %4483, %v3355_v27   ;;  %v2109_v27 = vld [vmem:[%s6392_s9 + $0x18] sm:$0xff] }
  0x3a   :  { %1122 = vperm.xlu1 %4484, %v3378_v30   ;;  %v2112_v30 = vld [vmem:[%s6392_s9 + $0x30] sm:$0xff] }
  0x3d   :  { %945 = vperm.xlu0 %4483, %v3356_v29   ;;  %v3480_v29 = vld [vmem:[%s6439_s4 + $0x1f8] sm:$0xff] }
  0x3e   :  { %1304 = vperm.xlu1 %4484, %v3401_v32   ;;  %v2340_v32 = vld [vmem:[%s6393_s11] sm:$0xf] }
  0x41   :  { %576 = vperm.xlu0 %4483, %v550_v31   ;;  %v2110_v31 = vld [vmem:[%s6392_s9 + $0x20] sm:$0xff] }
  0x42   :  { %1309 = vperm.xlu1 %4484, %v3402_v34   ;;  %v2436_v34 = vld [vmem:[%s6394_s13 + $0x8] sm:$0xff] }
  0x45   :  { %1127 = vperm.xlu0 %4483, %v3379_v33   ;;  %v2111_v33 = vld [vmem:[%s6392_s9 + $0x28] sm:$0xff] }
  0x46   :  { %763 = vperm.xlu1 %4484, %v3333_v36   ;;  %v2438_v36 = vld [vmem:[%s6394_s13 + $0x18] sm:$0xff] }
  0x49   :  { %581 = vperm.xlu0 %4483, %v551_v35   ;;  %v2113_v35 = vld [vmem:[%s6392_s9 + $0x38] sm:$0xff] }
  0x4a   :  { %1491 = vperm.xlu1 %4484, %v3425_v38  }
  0x4d   :  { %1132 = vperm.xlu0 %4483, %v3380_v37   ;;  %v2435_v37 = vld [vmem:[%s6394_s13] sm:$0xff] }
  0x4e   :  { %768 = vperm.xlu1 %4484, %v3334_v40   ;;  %v2437_v40 = vld [vmem:[%s6394_s13 + $0x10] sm:$0xff] }
  0x51   :  { %950 = vperm.xlu0 %4483, %v3357_v39   ;;  %v2440_v39 = vld [vmem:[%s6394_s13 + $0x28] sm:$0xff] }
  0x52   :  { %1496 = vperm.xlu1 %4484, %v3426_v42  }
  0x55   :  { %1678 = vperm.xlu0 %4483, %v3449_v41   ;;  %v2442_v41 = vld [vmem:[%s6394_s13 + $0x38] sm:$0xff] }
  0x56   :  { %1314 = vperm.xlu1 %4484, %v3403_v44   ;;  %v2810_v44 = vld [vmem:[%s6395_s15] sm:$0xff] }
  0x59   :  { %1319 = vperm.xlu0 %4483, %v3404_v43   ;;  %v2439_v43 = vld [vmem:[%s6394_s13 + $0x20] sm:$0xff] }
  0x5a   :  { %955 = vperm.xlu1 %4484, %v3358_v46   ;;  %v2441_v46 = vld [vmem:[%s6394_s13 + $0x30] sm:$0xff] }
  0x5d   :  { %586 = vperm.xlu0 %4483, %v552_v45  }
  0x5e   :  { %1683 = vperm.xlu1 %4484, %v3450_v48  }
  0x61   :  { %1137 = vperm.xlu0 %4483, %v3381_v47  }
  0x62   :  { %773 = vperm.xlu1 %4484, %v3335_v50   ;;  %v2911_v50 = vld [vmem:[%s6396_s17 + $0x10] sm:$0xff] }
  0x65   :  { %1865 = vperm.xlu0 %4483, %v3473_v49  }
  0x66   :  { %1501 = vperm.xlu1 %4484, %v3427_v52  }
  0x69   :  { %778 = vperm.xlu0 %4483, %v3336_v51  }
  0x6a   :  { %591 = vperm.xlu1 %4484, %v553_v54   ;;  %v2811_v54 = vld [vmem:[%s6395_s15 + $0x8] sm:$0xff] }
  0x6d   :  { %1506 = vperm.xlu0 %4483, %v3428_v53  }
  0x6e   :  { %1142 = vperm.xlu1 %4484, %v3382_v56  }
  0x71   :  { %960 = vperm.xlu0 %4483, %v3359_v55  }
  0x72   :  { %1870 = vperm.xlu1 %4484, %v3474_v58  }
  0x75   :  { %1688 = vperm.xlu0 %4483, %v3451_v57   ;;  %v2909_v57 = vld [vmem:[%s6396_s17] sm:$0xff] }
  0x76   :  { %1324 = vperm.xlu1 %4484, %v3405_v60   ;;  %v3152_v60 = vld [vmem:[%s6397_s19 + $0x8] sm:$0xff] }
  0x79   :  { %965 = vperm.xlu0 %4483, %v3360_v59   ;;  %v2912_v59 = vld [vmem:[%s6396_s17 + $0x18] sm:$0xff] }
  0x7a   :  { %2052 = vperm.xlu1 %4484, %v3497_v62   ;;  %v2910_v62 = vld [vmem:[%s6396_s17 + $0x8] sm:$0xff] }
  0x7d   :  { %1693 = vperm.xlu0 %4483, %v3452_v61  }
  0x7e   :  { %1329 = vperm.xlu1 %4484, %v3406_v1  }
  0x81   :  { %1147 = vperm.xlu0 %4483, %v3383_v0   ;;  %v3151_v0 = vld [vmem:[%s6397_s19] sm:$0xff] }
  0x82   :  { %2057 = vperm.xlu1 %4484, %v3498_v3  }
  0x85   :  { %1875 = vperm.xlu0 %4483, %v3475_v2  }
  0x86   :  { %1511 = vperm.xlu1 %4484, %v3429_v5  }
  0x88   :  { %v81_v38 = vpop.permute.xlu0 %80 }
  0x89   :  { %1516 = vperm.xlu0 %4483, %v3430_v4   ;;  %v3153_v4 = vld [vmem:[%s6397_s19 + $0x10] sm:$0x3] }
  0x8a   :  { %1152 = vperm.xlu1 %4484, %v3384_v7  }
  0x8c   :  { %v76_v42 = vpop.permute.xlu0 %75 }
  0x8d   :  { %1334 = vperm.xlu0 %4483, %v3407_v6   ;;  %v5046_v45 = vpop.permute.xlu1 %201 }
  0x8e   :  { %1880 = vperm.xlu1 %4484, %v3476_v9  }
  0x90   :  { %v5051_v47 = vpop.permute.xlu0 %211 }
  0x91   :  { %2062 = vperm.xlu0 %4483, %v3499_v8   ;;  %v5059_v55 = vpop.permute.xlu1 %206 }
  0x92   :  { %1698 = vperm.xlu1 %4484, %v3453_v11  }
  0x94   :  { %v5064_v58 = vpop.permute.xlu0 %221 }
  0x95   :  { %1339 = vperm.xlu0 %4483, %v3408_v10   ;;  %v5072_v61 = vpop.permute.xlu1 %216 }
  0x96   :  { %2116 = vperm.xlu1 %4484, %v2106_v13   ;;  %v185_v13 = vld [vmem:[%s6391_s6 + $0x10] sm:$0xff] }
  0x98   :  { %v5077_v63 = vpop.permute.xlu0 %231 }
  0x99   :  { %2067 = vperm.xlu0 %4483, %v3500_v12   ;;  %v5082_v1 = vpop.permute.xlu1 %226  ;;  %v184_v12 = vld [vmem:[%s6391_s6 + $0x8] sm:$0xff] }
  0x9a   :  { %1703 = vperm.xlu1 %4484, %v3454_v15   ;;  %v187_v15 = vld [vmem:[%s6391_s6 + $0x20] sm:$0xff] }
  0x9d   :  { %1521 = vperm.xlu0 %4483, %v3431_v14   ;;  %v5087_v7 = vpop.permute.xlu1 %236  ;;  %v186_v14 = vld [vmem:[%s6391_s6 + $0x18] sm:$0xff] }
  0x9e   :  { %2121 = vperm.xlu1 %4484, %v2107_v17   ;;  %v189_v17 = vld [vmem:[%s6391_s6 + $0x30] sm:$0xff] }
  0xa1   :  { %1526 = vperm.xlu0 %4483, %v3432_v16   ;;  %v188_v16 = vld [vmem:[%s6391_s6 + $0x28] sm:$0xff] }
  0xa2   :  { %1885 = vperm.xlu1 %4484, %v3477_v19   ;;  %v440_v19 = vld [vmem:[%s6398_s1 + $0x78] sm:$0xff] }
  0xa5   :  { %1708 = vperm.xlu0 %4483, %v3455_v18   ;;  %v190_v18 = vld [vmem:[%s6391_s6 + $0x38] sm:$0xff] }
  0xa6   :  { %1890 = vperm.xlu1 %4484, %v3478_v21   ;;  %v439_v21 = vld [vmem:[%s6398_s1 + $0x70] sm:$0xff] }
  0xa9   :  { %2126 = vperm.xlu0 %4483, %v2108_v20   ;;  %v3328_v20 = vld [vmem:[%s6398_s1 + $0xf8] sm:$0xff] }
  0xaa   :  { %2072 = vperm.xlu1 %4484, %v3501_v23   ;;  %3950 = vmatprep.subr.mxu0 %v3328_v20  ;;  %v438_v23 = vld [vmem:[%s6398_s1 + $0x68] sm:$0xff] }
  0xab   :  { %3951 = vmatpush3.msra.mxu0 %v3328_v20 }
  0xad   :  { %2077 = vperm.xlu0 %4483, %v3502_v22   ;;  %v3327_v22 = vld [vmem:[%s6398_s1 + $0xf0] sm:$0xff] }
  0xae   :  { %1713 = vperm.xlu1 %4484, %v3456_v25   ;;  %3952 = vmatprep.subr.mxu0 %v3327_v22  ;;  %v437_v25 = vld [vmem:[%s6398_s1 + $0x60] sm:$0xff] }
  0xaf   :  { %3953 = vmatpush3.msra.mxu0 %v3327_v22 }
  0xb1   :  { %1895 = vperm.xlu0 %4483, %v3479_v24   ;;  %v3326_v24 = vld [vmem:[%s6398_s1 + $0xe8] sm:$0xff] }
  0xb2   :  { %2131 = vperm.xlu1 %4484, %v2109_v27   ;;  %3954 = vmatprep.subr.mxu0 %v3326_v24  ;;  %v436_v27 = vld [vmem:[%s6398_s1 + $0x58] sm:$0xff] }
  0xb3   :  { %3955 = vmatpush3.msra.mxu0 %v3326_v24 }
  0xb5   :  { %2082 = vperm.xlu0 %4483, %v3503_v26   ;;  %v3325_v26 = vld [vmem:[%s6398_s1 + $0xe0] sm:$0xff] }
  0xb6   :  { %1900 = vperm.xlu1 %4484, %v3480_v29   ;;  %3956 = vmatprep.subr.mxu0 %v3325_v26  ;;  %v435_v29 = vld [vmem:[%s6398_s1 + $0x50] sm:$0xff] }
  0xb7   :  { %3957 = vmatpush3.msra.mxu0 %v3325_v26 }
  0xb9   :  { %2087 = vperm.xlu0 %4483, %v3504_v28   ;;  %v3324_v28 = vld [vmem:[%s6398_s1 + $0xd8] sm:$0xff] }
  0xba   :  { %2136 = vperm.xlu1 %4484, %v2110_v31   ;;  %3958 = vmatprep.subr.mxu0 %v3324_v28  ;;  %v434_v31 = vld [vmem:[%s6398_s1 + $0x48] sm:$0xff] }
  0xbb   :  { %3959 = vmatpush3.msra.mxu0 %v3324_v28 }
  0xbd   :  { %2146 = vperm.xlu0 %4483, %v2112_v30   ;;  %v3323_v30 = vld [vmem:[%s6398_s1 + $0xd0] sm:$0xff] }
  0xbe   :  { %2141 = vperm.xlu1 %4484, %v2111_v33   ;;  %3960 = vmatprep.subr.mxu0 %v3323_v30  ;;  %v433_v33 = vld [vmem:[%s6398_s1 + $0x40] sm:$0xff] }
  0xbf   :  { %3961 = vmatpush3.msra.mxu0 %v3323_v30 }
  0xc1   :  { %2343 = vperm.xlu0 %4483, %v2340_v32   ;;  %v3322_v32 = vld [vmem:[%s6398_s1 + $0xc8] sm:$0xff] }
  0xc2   :  { %2151 = vperm.xlu1 %4484, %v2113_v35   ;;  %3962 = vmatprep.subr.mxu0 %v3322_v32  ;;  %v432_v35 = vld [vmem:[%s6398_s1 + $0x38] sm:$0xff] }
  0xc3   :  { %3963 = vmatpush3.msra.mxu0 %v3322_v32 }
  0xc5   :  { %2450 = vperm.xlu0 %4483, %v2436_v34   ;;  %v3321_v34 = vld [vmem:[%s6398_s1 + $0xc0] sm:$0xff] }
  0xc6   :  { %2445 = vperm.xlu1 %4484, %v2435_v37   ;;  %3964 = vmatprep.subr.mxu0 %v3321_v34  ;;  %v431_v37 = vld [vmem:[%s6398_s1 + $0x30] sm:$0xff] }
  0xc7   :  { %3965 = vmatpush3.msra.mxu0 %v3321_v34 }
  0xc9   :  { %2460 = vperm.xlu0 %4483, %v2438_v36   ;;  %v3320_v36 = vld [vmem:[%s6398_s1 + $0xb8] sm:$0xff] }
  0xca   :  { %2455 = vperm.xlu1 %4484, %v2437_v40   ;;  %3966 = vmatprep.subr.mxu0 %v3320_v36  ;;  %v3318_v40 = vld [vmem:[%s6398_s1 + $0xa8] sm:$0xff] }
  0xcb   :  { %3967 = vmatpush3.msra.mxu0 %v3320_v36  ;;  %v3375_v36 = vld [vmem:[%s6398_s1 + $0x1f0] sm:$0xff] }
  0xcd   :  { %2470 = vperm.xlu0 %4483, %v2440_v39   ;;  %v430_v39 = vld [vmem:[%s6398_s1 + $0x28] sm:$0xff] }
  0xce   :  { %2465 = vperm.xlu1 %4484, %v2439_v43   ;;  %v428_v43 = vld [vmem:[%s6398_s1 + $0x18] sm:$0xff] }
  0xd1   :  { %2480 = vperm.xlu0 %4483, %v2442_v41   ;;  %v429_v41 = vld [vmem:[%s6398_s1 + $0x20] sm:$0xff] }
  0xd2   :  { %2475 = vperm.xlu1 %4484, %v2441_v46   ;;  %v427_v46 = vld [vmem:[%s6398_s1 + $0x10] sm:$0xff] }
  0xd5   :  { %2814 = vperm.xlu0 %4483, %v2810_v44   ;;  %v3316_v44 = vld [vmem:[%s6398_s1 + $0x98] sm:$0xff] }
  0xd6   :  { %v3889_v48 = vpop.f32.mrf.mxu0  ;;  %2819 = vperm.xlu1 %4484, %v2811_v54   ;;  %v5229_v54 = vld [vmem:[%s6398_s1 + $0x1f8] sm:$0xff] }
  0xd7   :  { %v166_v49 = vadd.f32 %v3889_v48, %v81_v38  ;;  %v3319_v38 = vld [vmem:[%s6398_s1 + $0xb0] sm:$0xff] }
  0xd8   :  { %v160_v51 = vpop.f32.mrf.mxu0  ;;  %3968 = vmatprep.subr.mxu0 %v3319_v38  ;;  %v3315_v48 = vld [vmem:[%s6398_s1 + $0x90] sm:$0xff] }
  0xd9   :  { %v3296_v52 = vmul.f32 -1.442695, %v166_v49  ;;  %v161_v53 = vadd.f32 %v160_v51, %v76_v42  ;;  %2925 = vperm.xlu0 %4483, %v2911_v50   ;;  %3969 = vmatpush3.msra.mxu0 %v3319_v38  ;;  %v3317_v42 = vld [vmem:[%s6398_s1 + $0xa0] sm:$0xff]  ;;  %v3314_v50 = vld [vmem:[%s6398_s1 + $0x88] sm:$0xff] }
  0xda   :  { %2930 = vperm.xlu1 %4484, %v2912_v59   ;;  %3970 = vmatprep.subr.mxu0 %v3318_v40  ;;  %v425_v51 = vld [vmem:[%s6398_s1] sm:$0xff] }
  0xdb   :  { %4485 = vpow2.f32 %v3296_v52  ;;  %v3295_v56 = vmul.f32 -1.442695, %v161_v53  ;;  %3971 = vmatpush3.msra.mxu0 %v3318_v40  ;;  %v3313_v52 = vld [vmem:[%s6398_s1 + $0x80] sm:$0xff]  ;;  %v3350_v40 = vld [vmem:[%s6398_s1 + $0x168] sm:$0xff] }
  0xdc   :  { %3972 = vmatprep.subr.mxu0 %v3317_v42 }
  0xdd   :  { %4487 = vpow2.f32 %v3295_v56  ;;  %2915 = vperm.xlu0 %4483, %v2909_v57   ;;  %3973 = vmatpush3.msra.mxu0 %v3317_v42 }
  0xde   :  { %2920 = vperm.xlu1 %4484, %v2910_v62   ;;  %3974 = vmatprep.subr.mxu0 %v3316_v44 }
  0xdf   :  { %3975 = vmatpush3.msra.mxu0 %v3316_v44  ;;  %v3349_v44 = vld [vmem:[%s6398_s1 + $0x160] sm:$0xff] }
  0xe0   :  { %3976 = vmatprep.subr.mxu0 %v3315_v48 }
  0xe1   :  { %3161 = vperm.xlu0 %4483, %v3152_v60   ;;  %3977 = vmatpush3.msra.mxu0 %v3315_v48 }
  0xe2   :  { %3156 = vperm.xlu1 %4484, %v3151_v0   ;;  %3978 = vmatprep.subr.mxu0 %v3314_v50 }
  0xe3   :  { %3979 = vmatpush3.msra.mxu0 %v3314_v50  ;;  %v3348_v50 = vld [vmem:[%s6398_s1 + $0x158] sm:$0xff] }
  0xe4   :  { %3980 = vmatprep.subr.mxu0 %v3313_v52 }
  0xe5   :  { %3981 = vmatpush3.msra.mxu0 %v3313_v52 }
  0xe6   :  { %3166 = vperm.xlu1 %4484, %v3153_v4   ;;  %4038 = vmatprep.subr.mxu0 %v5229_v54 }
  0xe8   :  { %v4486_v2 = vpop.eup %4485 }
  0xe9   :  { %v176_v3 = vadd.f32 1.0, %v4486_v2 }
  0xea   :  { %v4488_v5 = vpop.eup %4487 }
  0xeb   :  { %4489 = vrcp.f32 %v176_v3  ;;  %v175_v6 = vadd.f32 1.0, %v4488_v5 }
  0xed   :  { %4491 = vrcp.f32 %v175_v6 }
  0xf8   :  { %v4490_v8 = vpop.eup %4489 }
  0xf9   :  { %v5089_v9 = vmul.f32 %v4490_v8, %v166_v49  ;;  %v426_v49 = vld [vmem:[%s6398_s1 + $0x8] sm:$0xff] }
  0xfa   :  { %v4492_v10 = vpop.eup %4491 }
  0xfb   :  { %6440 = vst [vmem:[#allocation2_spill] sm:$0xff] %v5089_v9  ;;  %v5091_v11 = vmul.f32 %v4492_v10, %v161_v53  ;;  %3890 = vmatprep.subr.mxu1 %v5089_v9  ;;  %v5224_v53 = vld [vmem:[%s6398_s1 + $0x178] sm:$0xff] }
  0xfc   :  { %3891 = vmatpush3.msra.mxu1 %v5089_v9  ;;  %v5860_v9 = vld [vmem:[%s6399_s2 + $0x28] sm:$0xff] }
  0xfd   :  { %6441 = vst [vmem:[#allocation3_spill] sm:$0xff] %v5091_v11  ;;  %3892 = vmatprep.subr.mxu1 %v5091_v11  ;;  %6468 = vst [vmem:[#allocation30_spill] sm:$0xff] %v5860_v9 }
  0xfe   :  { %3893 = vmatpush3.msra.mxu1 %v5091_v11 }
  0xff   :  { %3895 = vmatmul.mubr.msk.f32.vlgmr.msra.gmra.mxu1 %vm239_vm2, %v184_v12  ;;  %3906 = vmatprep.subr.mxu1 %v440_v19 }
 0x100   :  { %3897 = vmatprep.mubr.msk.f32.mxu1 %vm239_vm2, %v185_v13  ;;  %3907 = vmatpush3.msra.mxu1 %v440_v19 }
 0x101   :  { %3908 = vmatprep.subr.mxu1 %v439_v21 }
 0x102   :  { %3909 = vmatpush3.msra.mxu1 %v439_v21 }
 0x103   :  { %3898 = vmatmul.mubr.msk.f32.gmra.mxu1 %vm239_vm2, %v186_v14  ;;  %3910 = vmatprep.subr.mxu1 %v438_v23 }
 0x104   :  { %3900 = vmatprep.mubr.msk.f32.mxu1 %vm239_vm2, %v187_v15  ;;  %3911 = vmatpush3.msra.mxu1 %v438_v23 }
 0x105   :  { %3912 = vmatprep.subr.mxu1 %v437_v25 }
 0x106   :  { %3913 = vmatpush3.msra.mxu1 %v437_v25 }
 0x107   :  { %3901 = vmatmul.mubr.msk.f32.gmra.mxu1 %vm239_vm2, %v188_v16  ;;  %3914 = vmatprep.subr.mxu1 %v436_v27 }
 0x108   :  { %3903 = vmatprep.mubr.msk.f32.mxu1 %vm239_vm2, %v189_v17  ;;  %3915 = vmatpush3.msra.mxu1 %v436_v27 }
 0x109   :  { %3916 = vmatprep.subr.mxu1 %v435_v29 }
 0x10a   :  { %3917 = vmatpush3.msra.mxu1 %v435_v29 }
 0x10b   :  { %3904 = vmatmul.mubr.msk.f32.gmra.mxu1 %vm239_vm2, %v190_v18  ;;  %3918 = vmatprep.subr.mxu1 %v434_v31 }
 0x10c   :  { %3919 = vmatpush3.msra.mxu1 %v434_v31 }
 0x10d   :  { %3920 = vmatprep.subr.mxu1 %v433_v33 }
 0x10e   :  { %3921 = vmatpush3.msra.mxu1 %v433_v33 }
 0x10f   :  { %3922 = vmatprep.subr.mxu1 %v432_v35 }
 0x110   :  { %3923 = vmatpush3.msra.mxu1 %v432_v35  ;;  %v3351_v35 = vld [vmem:[%s6398_s1 + $0x170] sm:$0xff] }
 0x111   :  { %3924 = vmatprep.subr.mxu1 %v431_v37 }
 0x112   :  { %3925 = vmatpush3.msra.mxu1 %v431_v37 }
 0x113   :  { %3926 = vmatprep.subr.mxu1 %v430_v39 }
 0x114   :  { %3927 = vmatpush3.msra.mxu1 %v430_v39 }
 0x115   :  { %3928 = vmatprep.subr.mxu1 %v429_v41 }
 0x116   :  { %3929 = vmatpush3.msra.mxu1 %v429_v41  ;;  %v3374_v41 = vld [vmem:[%s6398_s1 + $0x1e8] sm:$0xff] }
 0x117   :  { %3930 = vmatprep.subr.mxu1 %v428_v43 }
 0x118   :  { %3931 = vmatpush3.msra.mxu1 %v428_v43 }
 0x119   :  { %3932 = vmatprep.subr.mxu1 %v427_v46 }
 0x11a   :  { %3933 = vmatpush3.msra.mxu1 %v427_v46  ;;  %v3373_v46 = vld [vmem:[%s6398_s1 + $0x1e0] sm:$0xff] }
 0x11b   :  { %3934 = vmatprep.subr.mxu1 %v426_v49 }
 0x11c   :  { %3935 = vmatpush3.msra.mxu1 %v426_v49 }
 0x11d   :  { %3936 = vmatprep.subr.mxu1 %v425_v51 }
 0x11e   :  { %3937 = vmatpush3.msra.mxu1 %v425_v51  ;;  %v3372_v51 = vld [vmem:[%s6398_s1 + $0x1d8] sm:$0xff] }
 0x11f   :  { %3994 = vmatprep.subr.mxu1 %v5224_v53 }
 0x1bf   :  { %v3896_v56 = vpop.f32.mrf.mxu1 }
 0x1c0   :  { %v336_v57 = vadd.f32 %v3896_v56, %v5059_v55  ;;  %v3371_v56 = vld [vmem:[%s6398_s1 + $0x1d0] sm:$0xff] }
 0x1c1   :  { %v330_v59 = vpop.f32.mrf.mxu1 }
 0x1c2   :  { %v3306_v60 = vmul.f32 -1.442695, %v336_v57  ;;  %v331_v62 = vadd.f32 %v330_v59, %v5046_v45 }
 0x1c3   :  { %v3899_v0 = vpop.f32.mrf.mxu1 }
 0x1c4   :  { %4493 = vpow2.f32 %v3306_v60  ;;  %v3305_v2 = vmul.f32 -1.442695, %v331_v62  ;;  %v5236_v3 = vadd.f32 %v3899_v0, %v5072_v61  ;;  %v3346_v60 = vld [vmem:[%s6398_s1 + $0x148] sm:$0xff] }
 0x1c5   :  { %v340_v4 = vpop.f32.mrf.mxu1 }
 0x1c6   :  { %4495 = vpow2.f32 %v3305_v2  ;;  %v3308_v5 = vmul.f32 -1.442695, %v5236_v3  ;;  %v341_v6 = vadd.f32 %v340_v4, %v5051_v47  ;;  %v3345_v2 = vld [vmem:[%s6398_s1 + $0x140] sm:$0xff]  ;;  %v3344_v4 = vld [vmem:[%s6398_s1 + $0x138] sm:$0xff] }
 0x1c7   :  { %v3902_v8 = vpop.f32.mrf.mxu1 }
 0x1c8   :  { %4497 = vpow2.f32 %v3308_v5  ;;  %v3307_v10 = vmul.f32 -1.442695, %v341_v6  ;;  %v5241_v55 = vadd.f32 %v3902_v8, %v5082_v1  ;;  %v3368_v5 = vld [vmem:[%s6398_s1 + $0x1b8] sm:$0xff]  ;;  %v3367_v8 = vld [vmem:[%s6398_s1 + $0x1b0] sm:$0xff] }
 0x1c9   :  { %v350_v12 = vpop.f32.mrf.mxu1 }
 0x1ca   :  { %4499 = vpow2.f32 %v3307_v10  ;;  %v3310_v45 = vmul.f32 -1.442695, %v5241_v55  ;;  %v5245_v13 = vadd.f32 %v350_v12, %v5064_v58  ;;  %v3342_v10 = vld [vmem:[%s6398_s1 + $0x128] sm:$0xff]  ;;  %v3341_v12 = vld [vmem:[%s6398_s1 + $0x120] sm:$0xff] }
 0x1cb   :  { %v3905_v61 = vpop.f32.mrf.mxu1 }
 0x1cc   :  { %v3309_v14 = vmul.f32 -1.442695, %v5245_v13  ;;  %v5249_v15 = vadd.f32 %v3905_v61, %v5087_v7  ;;  %4501 = vpow2.f32 %v3310_v45  ;;  %v3365_v45 = vld [vmem:[%s6398_s1 + $0x1a0] sm:$0xff]  ;;  %v3364_v61 = vld [vmem:[%s6398_s1 + $0x198] sm:$0xff] }
 0x1cd   :  { %v360_v47 = vpop.f32.mrf.mxu1 }
 0x1ce   :  { %4503 = vpow2.f32 %v3309_v14  ;;  %v5252_v16 = vadd.f32 %v360_v47, %v5077_v63  ;;  %v3312_v1 = vmul.f32 -1.442695, %v5249_v15  ;;  %v3339_v14 = vld [vmem:[%s6398_s1 + $0x110] sm:$0xff]  ;;  %v3338_v47 = vld [vmem:[%s6398_s1 + $0x108] sm:$0xff] }
 0x1d0   :  { %v3311_v17 = vmul.f32 -1.442695, %v5252_v16 }
 0x1d1   :  { %v4494_v18 = vpop.eup %4493 }
 0x1d2   :  { %v394_v19 = vadd.f32 1.0, %v4494_v18  ;;  %4505 = vpow2.f32 %v3311_v17  ;;  %v3361_v17 = vld [vmem:[%s6398_s1 + $0x180] sm:$0xff]  ;;  %v3400_v18 = vld [vmem:[%s6398_s1 + $0x278] sm:$0xff] }
 0x1d3   :  { %v4496_v58 = vpop.eup %4495  ;;  %4507 = vpow2.f32 %v3312_v1  ;;  %v3337_v1 = vld [vmem:[%s6398_s1 + $0x100] sm:$0xff] }
 0x1d4   :  { %v393_v20 = vadd.f32 1.0, %v4496_v58  ;;  %4509 = vrcp.f32 %v394_v19  ;;  %v3424_v19 = vld [vmem:[%s6398_s1 + $0x2f8] sm:$0xff]  ;;  %v3399_v58 = vld [vmem:[%s6398_s1 + $0x270] sm:$0xff] }
 0x1d5   :  { %v4498_v21 = vpop.eup %4497 }
 0x1d6   :  { %4511 = vrcp.f32 %v393_v20  ;;  %v396_v22 = vadd.f32 1.0, %v4498_v21  ;;  %v3423_v20 = vld [vmem:[%s6398_s1 + $0x2f0] sm:$0xff]  ;;  %v3398_v21 = vld [vmem:[%s6398_s1 + $0x268] sm:$0xff] }
 0x1d7   :  { %v4500_v7 = vpop.eup %4499 }
 0x1d8   :  { %v395_v23 = vadd.f32 1.0, %v4500_v7  ;;  %v3422_v7 = vld [vmem:[%s6398_s1 + $0x2e8] sm:$0xff] }
 0x1d9   :  { %v4502_v24 = vpop.eup %4501 }
 0x1da   :  { %4513 = vrcp.f32 %v395_v23  ;;  %v398_v26 = vadd.f32 1.0, %v4502_v24  ;;  %v3421_v23 = vld [vmem:[%s6398_s1 + $0x2e0] sm:$0xff]  ;;  %v3396_v24 = vld [vmem:[%s6398_s1 + $0x258] sm:$0xff] }
 0x1db   :  { %v4504_v63 = vpop.eup %4503  ;;  %4515 = vrcp.f32 %v396_v22  ;;  %v3397_v22 = vld [vmem:[%s6398_s1 + $0x260] sm:$0xff] }
 0x1dc   :  { %v397_v25 = vadd.f32 1.0, %v4504_v63  ;;  %v3420_v63 = vld [vmem:[%s6398_s1 + $0x2d8] sm:$0xff] }
 0x1de   :  { %4517 = vrcp.f32 %v397_v25  ;;  %v3395_v25 = vld [vmem:[%s6398_s1 + $0x250] sm:$0xff] }
 0x1df   :  { %v4506_v27 = vpop.eup %4505  ;;  %4519 = vrcp.f32 %v398_v26  ;;  %v3419_v26 = vld [vmem:[%s6398_s1 + $0x2d0] sm:$0xff] }
 0x1e0   :  { %v4508_v28 = vpop.eup %4507  ;;  %v399_v29 = vadd.f32 1.0, %v4506_v27  ;;  %v3394_v27 = vld [vmem:[%s6398_s1 + $0x248] sm:$0xff] }
 0x1e1   :  { %v4510_v30 = vpop.eup %4509  ;;  %v400_v32 = vadd.f32 1.0, %v4508_v28  ;;  %v3418_v28 = vld [vmem:[%s6398_s1 + $0x2c8] sm:$0xff] }
 0x1e2   :  { %4521 = vrcp.f32 %v399_v29  ;;  %v5258_v34 = vmul.f32 %v4510_v30, %v336_v57  ;;  %v3393_v29 = vld [vmem:[%s6398_s1 + $0x240] sm:$0xff] }
 0x1e3   :  { %v4512_v31 = vpop.eup %4511  ;;  %4523 = vrcp.f32 %v400_v32  ;;  %v3417_v30 = vld [vmem:[%s6398_s1 + $0x2c0] sm:$0xff]  ;;  %v3416_v32 = vld [vmem:[%s6398_s1 + $0x2b8] sm:$0xff] }
 0x1e4   :  { %v5256_v33 = vmul.f32 %v4512_v31, %v331_v62  ;;  %v3370_v62 = vld [vmem:[%s6398_s1 + $0x1c8] sm:$0xff]  ;;  %v3392_v31 = vld [vmem:[%s6398_s1 + $0x238] sm:$0xff] }
 0x1e6   :  { %3938 = vmatprep.mubr.f32.mxu1 %v5256_v33  ;;  %3982 = vmatprep.mubr.f32.mxu0 %v5256_v33 }
 0x1e7   :  { %v4514_v37 = vpop.eup %4513  ;;  %3939 = vmatmul.mubr.f32.vlgmr.msra.gmra.mxu1 %v5258_v34  ;;  %3983 = vmatmul.mubr.f32.vlgmr.msra.gmra.mxu0 %v5258_v34 }
 0x1e8   :  { %v4516_v38 = vpop.eup %4515  ;;  %v5270_v39 = vmul.f32 %v4514_v37, %v341_v6  ;;  %3995 = vmatpush3.msra.mxu1 %v5224_v53  ;;  %4039 = vmatpush3.msra.mxu0 %v5229_v54  ;;  %v3347_v54 = vld [vmem:[%s6398_s1 + $0x150] sm:$0xff]  ;;  %v3390_v37 = vld [vmem:[%s6398_s1 + $0x228] sm:$0xff] }
 0x1e9   :  { %3996 = vmatprep.subr.mxu1 %v3351_v35  ;;  %4040 = vmatprep.subr.mxu0 %v3375_v36  ;;  %v5281_v43 = vmul.f32 %v4516_v38, %v5236_v3  ;;  %v3369_v3 = vld [vmem:[%s6398_s1 + $0x1c0] sm:$0xff]  ;;  %v3343_v6 = vld [vmem:[%s6398_s1 + $0x130] sm:$0xff]  ;;  %v3414_v38 = vld [vmem:[%s6398_s1 + $0x2a8] sm:$0xff] }
 0x1ea   :  { %3997 = vmatpush3.msra.mxu1 %v3351_v35  ;;  %4041 = vmatpush3.msra.mxu0 %v3375_v36  ;;  %v3391_v35 = vld [vmem:[%s6398_s1 + $0x230] sm:$0xff] }
 0x1eb   :  { %v4518_v42 = vpop.eup %4517  ;;  %3941 = vmatprep.mubr.f32.mxu1 %v5270_v39  ;;  %3985 = vmatprep.mubr.f32.mxu0 %v5270_v39  ;;  %v3415_v36 = vld [vmem:[%s6398_s1 + $0x2b0] sm:$0xff] }
 0x1ec   :  { %3998 = vmatprep.subr.mxu1 %v3350_v40  ;;  %4042 = vmatprep.subr.mxu0 %v3374_v41  ;;  %v5292_v48 = vmul.f32 %v4518_v42, %v5245_v13  ;;  %v4520_v49 = vpop.eup %4519  ;;  %v3340_v13 = vld [vmem:[%s6398_s1 + $0x118] sm:$0xff] }
 0x1ed   :  { %3942 = vmatmul.mubr.f32.gmra.mxu1 %v5281_v43  ;;  %3986 = vmatmul.mubr.f32.gmra.mxu0 %v5281_v43  ;;  %v5303_v53 = vmul.f32 %v4520_v49, %v5241_v55  ;;  %v3366_v55 = vld [vmem:[%s6398_s1 + $0x1a8] sm:$0xff]  ;;  %v3388_v42 = vld [vmem:[%s6398_s1 + $0x218] sm:$0xff]  ;;  %v3411_v49 = vld [vmem:[%s6398_s1 + $0x290] sm:$0xff] }
 0x1ee   :  { %3999 = vmatpush3.msra.mxu1 %v3350_v40  ;;  %4043 = vmatpush3.msra.mxu0 %v3374_v41  ;;  %v3389_v40 = vld [vmem:[%s6398_s1 + $0x220] sm:$0xff] }
 0x1ef   :  { %4000 = vmatprep.subr.mxu1 %v3349_v44  ;;  %4044 = vmatprep.subr.mxu0 %v3373_v46  ;;  %v4522_v52 = vpop.eup %4521  ;;  %v3413_v41 = vld [vmem:[%s6398_s1 + $0x2a0] sm:$0xff] }
 0x1f0   :  { %4001 = vmatpush3.msra.mxu1 %v3349_v44  ;;  %4045 = vmatpush3.msra.mxu0 %v3373_v46  ;;  %v5314_v57 = vmul.f32 %v4522_v52, %v5252_v16  ;;  %v4524_v59 = vpop.eup %4523  ;;  %v3362_v16 = vld [vmem:[%s6398_s1 + $0x188] sm:$0xff]  ;;  %v3412_v44 = vld [vmem:[%s6398_s1 + $0x298] sm:$0xff]  ;;  %v3387_v46 = vld [vmem:[%s6398_s1 + $0x210] sm:$0xff] }
 0x1f1   :  { %3944 = vmatprep.mubr.f32.mxu1 %v5292_v48  ;;  %3988 = vmatprep.mubr.f32.mxu0 %v5292_v48  ;;  %v5325_v0 = vmul.f32 %v4524_v59, %v5249_v15  ;;  %v3363_v15 = vld [vmem:[%s6398_s1 + $0x190] sm:$0xff]  ;;  %v3385_v52 = vld [vmem:[%s6398_s1 + $0x200] sm:$0xff]  ;;  %v3472_v59 = vld [vmem:[%s6398_s1 + $0x3f8] sm:$0xff] }
 0x1f2   :  { %4002 = vmatprep.subr.mxu1 %v3348_v50  ;;  %4046 = vmatprep.subr.mxu0 %v3372_v51 }
 0x1f3   :  { %3945 = vmatmul.mubr.f32.gmra.mxu1 %v5303_v53  ;;  %3989 = vmatmul.mubr.f32.gmra.mxu0 %v5303_v53 }
 0x1f4   :  { %4003 = vmatpush3.msra.mxu1 %v3348_v50  ;;  %4047 = vmatpush3.msra.mxu0 %v3372_v51  ;;  %v3386_v50 = vld [vmem:[%s6398_s1 + $0x208] sm:$0xff] }
 0x1f5   :  { %4004 = vmatprep.subr.mxu1 %v3347_v54  ;;  %4048 = vmatprep.subr.mxu0 %v3371_v56  ;;  %v3410_v51 = vld [vmem:[%s6398_s1 + $0x288] sm:$0xff] }
 0x1f6   :  { %4005 = vmatpush3.msra.mxu1 %v3347_v54  ;;  %4049 = vmatpush3.msra.mxu0 %v3371_v56  ;;  %v3409_v54 = vld [vmem:[%s6398_s1 + $0x280] sm:$0xff]  ;;  %v3448_v56 = vld [vmem:[%s6398_s1 + $0x378] sm:$0xff] }
 0x1f7   :  { %3947 = vmatprep.mubr.f32.mxu1 %v5314_v57  ;;  %3991 = vmatprep.mubr.f32.mxu0 %v5314_v57 }
 0x1f8   :  { %4006 = vmatprep.subr.mxu1 %v3346_v60  ;;  %4050 = vmatprep.subr.mxu0 %v3370_v62 }
 0x1f9   :  { %3948 = vmatmul.mubr.f32.gmra.mxu1 %v5325_v0  ;;  %3992 = vmatmul.mubr.f32.gmra.mxu0 %v5325_v0 }
 0x1fa   :  { %4007 = vmatpush3.msra.mxu1 %v3346_v60  ;;  %4051 = vmatpush3.msra.mxu0 %v3370_v62  ;;  %v3447_v60 = vld [vmem:[%s6398_s1 + $0x370] sm:$0xff] }
 0x1fb   :  { %4008 = vmatprep.subr.mxu1 %v3345_v2  ;;  %4026 = vmatprep.mubr.f32.mxu1 %v5256_v33  ;;  %v3471_v62 = vld [vmem:[%s6398_s1 + $0x3f0] sm:$0xff] }
 0x1fc   :  { %4052 = vmatprep.subr.mxu0 %v3369_v3  ;;  %4070 = vmatprep.mubr.f32.mxu0 %v5256_v33 }
 0x1fd   :  { %4009 = vmatpush3.msra.mxu1 %v3345_v2  ;;  %4053 = vmatpush3.msra.mxu0 %v3369_v3  ;;  %v3446_v2 = vld [vmem:[%s6398_s1 + $0x368] sm:$0xff] }
 0x1fe   :  { %4010 = vmatprep.subr.mxu1 %v3344_v4  ;;  %4054 = vmatprep.subr.mxu0 %v3368_v5  ;;  %v3470_v3 = vld [vmem:[%s6398_s1 + $0x3e8] sm:$0xff] }
 0x1ff   :  { %4011 = vmatpush3.msra.mxu1 %v3344_v4  ;;  %4055 = vmatpush3.msra.mxu0 %v3368_v5  ;;  %v3445_v4 = vld [vmem:[%s6398_s1 + $0x360] sm:$0xff] }
 0x200   :  { %4012 = vmatprep.subr.mxu1 %v3343_v6  ;;  %4056 = vmatprep.subr.mxu0 %v3367_v8  ;;  %v3469_v5 = vld [vmem:[%s6398_s1 + $0x3e0] sm:$0xff] }
 0x201   :  { %4013 = vmatpush3.msra.mxu1 %v3343_v6  ;;  %4057 = vmatpush3.msra.mxu0 %v3367_v8  ;;  %v3444_v6 = vld [vmem:[%s6398_s1 + $0x358] sm:$0xff] }
 0x202   :  { %4014 = vmatprep.subr.mxu1 %v3342_v10  ;;  %4058 = vmatprep.subr.mxu0 %v3366_v55  ;;  %v3468_v8 = vld [vmem:[%s6398_s1 + $0x3d8] sm:$0xff] }
 0x203   :  { %4015 = vmatpush3.msra.mxu1 %v3342_v10  ;;  %4059 = vmatpush3.msra.mxu0 %v3366_v55  ;;  %v3443_v10 = vld [vmem:[%s6398_s1 + $0x350] sm:$0xff] }
 0x204   :  { %4016 = vmatprep.subr.mxu1 %v3341_v12  ;;  %4060 = vmatprep.subr.mxu0 %v3365_v45  ;;  %v3467_v55 = vld [vmem:[%s6398_s1 + $0x3d0] sm:$0xff] }
 0x205   :  { %4017 = vmatpush3.msra.mxu1 %v3341_v12  ;;  %4061 = vmatpush3.msra.mxu0 %v3365_v45  ;;  %v3442_v12 = vld [vmem:[%s6398_s1 + $0x348] sm:$0xff] }
 0x206   :  { %4018 = vmatprep.subr.mxu1 %v3340_v13  ;;  %4062 = vmatprep.subr.mxu0 %v3364_v61  ;;  %v3466_v45 = vld [vmem:[%s6398_s1 + $0x3c8] sm:$0xff] }
 0x207   :  { %4019 = vmatpush3.msra.mxu1 %v3340_v13  ;;  %4063 = vmatpush3.msra.mxu0 %v3364_v61  ;;  %v3441_v13 = vld [vmem:[%s6398_s1 + $0x340] sm:$0xff] }
 0x208   :  { %4020 = vmatprep.subr.mxu1 %v3339_v14  ;;  %4064 = vmatprep.subr.mxu0 %v3363_v15  ;;  %v3465_v61 = vld [vmem:[%s6398_s1 + $0x3c0] sm:$0xff] }
 0x209   :  { %4021 = vmatpush3.msra.mxu1 %v3339_v14  ;;  %4065 = vmatpush3.msra.mxu0 %v3363_v15  ;;  %v3440_v14 = vld [vmem:[%s6398_s1 + $0x338] sm:$0xff] }
 0x20a   :  { %4022 = vmatprep.subr.mxu1 %v3338_v47  ;;  %4066 = vmatprep.subr.mxu0 %v3362_v16  ;;  %v3464_v15 = vld [vmem:[%s6398_s1 + $0x3b8] sm:$0xff] }
 0x20b   :  { %4023 = vmatpush3.msra.mxu1 %v3338_v47  ;;  %4067 = vmatpush3.msra.mxu0 %v3362_v16  ;;  %v3439_v47 = vld [vmem:[%s6398_s1 + $0x330] sm:$0xff] }
 0x20c   :  { %4024 = vmatprep.subr.mxu1 %v3337_v1  ;;  %4068 = vmatprep.subr.mxu0 %v3361_v17  ;;  %v3463_v16 = vld [vmem:[%s6398_s1 + $0x3b0] sm:$0xff] }
 0x20d   :  { %4025 = vmatpush3.msra.mxu1 %v3337_v1  ;;  %4069 = vmatpush3.msra.mxu0 %v3361_v17  ;;  %v3438_v1 = vld [vmem:[%s6398_s1 + $0x328] sm:$0xff] }
 0x20e   :  { %4027 = vmatmul.mubr.f32.vlgmr.msra.gmra.mxu1 %v5258_v34  ;;  %4071 = vmatmul.mubr.f32.vlgmr.msra.gmra.mxu0 %v5258_v34  ;;  %v3462_v17 = vld [vmem:[%s6398_s1 + $0x3a8] sm:$0xff] }
 0x20f   :  { %4082 = vmatprep.subr.mxu1 %v3400_v18  ;;  %4126 = vmatprep.subr.mxu0 %v3424_v19 }
 0x210   :  { %4029 = vmatprep.mubr.f32.mxu1 %v5270_v39  ;;  %4073 = vmatprep.mubr.f32.mxu0 %v5270_v39 }
 0x211   :  { %4083 = vmatpush3.msra.mxu1 %v3400_v18  ;;  %4127 = vmatpush3.msra.mxu0 %v3424_v19  ;;  %v3437_v18 = vld [vmem:[%s6398_s1 + $0x320] sm:$0xff] }
 0x212   :  { %4084 = vmatprep.subr.mxu1 %v3399_v58  ;;  %4128 = vmatprep.subr.mxu0 %v3423_v20  ;;  %v3461_v19 = vld [vmem:[%s6398_s1 + $0x3a0] sm:$0xff] }
 0x213   :  { %4085 = vmatpush3.msra.mxu1 %v3399_v58  ;;  %4129 = vmatpush3.msra.mxu0 %v3423_v20  ;;  %v3436_v58 = vld [vmem:[%s6398_s1 + $0x318] sm:$0xff] }
 0x214   :  { %4030 = vmatmul.mubr.f32.gmra.mxu1 %v5281_v43  ;;  %4074 = vmatmul.mubr.f32.gmra.mxu0 %v5281_v43  ;;  %v3460_v20 = vld [vmem:[%s6398_s1 + $0x398] sm:$0xff] }
 0x215   :  { %4086 = vmatprep.subr.mxu1 %v3398_v21  ;;  %4130 = vmatprep.subr.mxu0 %v3422_v7 }
 0x216   :  { %4032 = vmatprep.mubr.f32.mxu1 %v5292_v48  ;;  %4076 = vmatprep.mubr.f32.mxu0 %v5292_v48 }
 0x217   :  { %4087 = vmatpush3.msra.mxu1 %v3398_v21  ;;  %4131 = vmatpush3.msra.mxu0 %v3422_v7  ;;  %v3435_v21 = vld [vmem:[%s6398_s1 + $0x310] sm:$0xff] }
 0x218   :  { %4088 = vmatprep.subr.mxu1 %v3397_v22  ;;  %4132 = vmatprep.subr.mxu0 %v3421_v23  ;;  %v3459_v7 = vld [vmem:[%s6398_s1 + $0x390] sm:$0xff] }
 0x219   :  { %4089 = vmatpush3.msra.mxu1 %v3397_v22  ;;  %4133 = vmatpush3.msra.mxu0 %v3421_v23  ;;  %v3434_v22 = vld [vmem:[%s6398_s1 + $0x308] sm:$0xff] }
 0x21a   :  { %4033 = vmatmul.mubr.f32.gmra.mxu1 %v5303_v53  ;;  %4077 = vmatmul.mubr.f32.gmra.mxu0 %v5303_v53  ;;  %v3458_v23 = vld [vmem:[%s6398_s1 + $0x388] sm:$0xff] }
 0x21b   :  { %4090 = vmatprep.subr.mxu1 %v3396_v24  ;;  %4134 = vmatprep.subr.mxu0 %v3420_v63 }
 0x21c   :  { %4035 = vmatprep.mubr.f32.mxu1 %v5314_v57  ;;  %4079 = vmatprep.mubr.f32.mxu0 %v5314_v57 }
 0x21d   :  { %4091 = vmatpush3.msra.mxu1 %v3396_v24  ;;  %4135 = vmatpush3.msra.mxu0 %v3420_v63  ;;  %v3433_v24 = vld [vmem:[%s6398_s1 + $0x300] sm:$0xff] }
 0x21e   :  { %4092 = vmatprep.subr.mxu1 %v3395_v25  ;;  %4136 = vmatprep.subr.mxu0 %v3419_v26  ;;  %v3457_v63 = vld [vmem:[%s6398_s1 + $0x380] sm:$0xff] }
 0x21f   :  { %4093 = vmatpush3.msra.mxu1 %v3395_v25  ;;  %4137 = vmatpush3.msra.mxu0 %v3419_v26  ;;  %v3496_v25 = vld [vmem:[%s6398_s1 + $0x478] sm:$0xff]  ;;  %v3495_v26 = vld [vmem:[%s6398_s1 + $0x470] sm:$0xff] }
 0x220   :  { %4036 = vmatmul.mubr.f32.gmra.mxu1 %v5325_v0  ;;  %4080 = vmatmul.mubr.f32.gmra.mxu0 %v5325_v0 }
 0x221   :  { %4094 = vmatprep.subr.mxu1 %v3394_v27  ;;  %4138 = vmatprep.subr.mxu0 %v3418_v28 }
 0x222   :  { %4095 = vmatpush3.msra.mxu1 %v3394_v27  ;;  %4114 = vmatprep.mubr.f32.mxu1 %v5256_v33  ;;  %v3494_v27 = vld [vmem:[%s6398_s1 + $0x468] sm:$0xff] }
 0x223   :  { %4139 = vmatpush3.msra.mxu0 %v3418_v28  ;;  %4158 = vmatprep.mubr.f32.mxu0 %v5256_v33  ;;  %v3493_v28 = vld [vmem:[%s6398_s1 + $0x460] sm:$0xff] }
 0x224   :  { %4096 = vmatprep.subr.mxu1 %v3393_v29  ;;  %4140 = vmatprep.subr.mxu0 %v3417_v30 }
 0x225   :  { %4097 = vmatpush3.msra.mxu1 %v3393_v29  ;;  %4141 = vmatpush3.msra.mxu0 %v3417_v30  ;;  %v3492_v29 = vld [vmem:[%s6398_s1 + $0x458] sm:$0xff]  ;;  %v5634_v30 = vpop.permute.xlu1 %743 }
 0x226   :  { %4098 = vmatprep.subr.mxu1 %v3392_v31  ;;  %4142 = vmatprep.subr.mxu0 %v3416_v32 }
 0x227   :  { %4099 = vmatpush3.msra.mxu1 %v3392_v31  ;;  %4143 = vmatpush3.msra.mxu0 %v3416_v32  ;;  %v3491_v31 = vld [vmem:[%s6398_s1 + $0x450] sm:$0xff]  ;;  %v5641_v32 = vpop.permute.xlu0 %556 }
 0x228   :  { %4100 = vmatprep.subr.mxu1 %v3391_v35  ;;  %4144 = vmatprep.subr.mxu0 %v3415_v36 }
 0x229   :  { %4101 = vmatpush3.msra.mxu1 %v3391_v35  ;;  %4145 = vmatpush3.msra.mxu0 %v3415_v36  ;;  %v3490_v35 = vld [vmem:[%s6398_s1 + $0x448] sm:$0xff]  ;;  %v3489_v36 = vld [vmem:[%s6398_s1 + $0x440] sm:$0xff] }
 0x22a   :  { %4102 = vmatprep.subr.mxu1 %v3390_v37  ;;  %4146 = vmatprep.subr.mxu0 %v3414_v38 }
 0x22b   :  { %4103 = vmatpush3.msra.mxu1 %v3390_v37  ;;  %4147 = vmatpush3.msra.mxu0 %v3414_v38  ;;  %v5652_v37 = vpop.permute.xlu1 %748  ;;  %v3488_v38 = vld [vmem:[%s6398_s1 + $0x438] sm:$0xff] }
 0x22c   :  { %4104 = vmatprep.subr.mxu1 %v3389_v40  ;;  %4148 = vmatprep.subr.mxu0 %v3413_v41 }
 0x22d   :  { %4105 = vmatpush3.msra.mxu1 %v3389_v40  ;;  %4149 = vmatpush3.msra.mxu0 %v3413_v41  ;;  %v5659_v40 = vpop.permute.xlu0 %561  ;;  %v3487_v41 = vld [vmem:[%s6398_s1 + $0x430] sm:$0xff] }
 0x22e   :  { %4106 = vmatprep.subr.mxu1 %v3388_v42  ;;  %4150 = vmatprep.subr.mxu0 %v3412_v44 }
 0x22f   :  { %4107 = vmatpush3.msra.mxu1 %v3388_v42  ;;  %4151 = vmatpush3.msra.mxu0 %v3412_v44  ;;  %v3486_v42 = vld [vmem:[%s6398_s1 + $0x428] sm:$0xff]  ;;  %v5667_v44 = vpop.permute.xlu1 %935 }
 0x230   :  { %4108 = vmatprep.subr.mxu1 %v3387_v46  ;;  %4152 = vmatprep.subr.mxu0 %v3411_v49 }
 0x231   :  { %4109 = vmatpush3.msra.mxu1 %v3387_v46  ;;  %4153 = vmatpush3.msra.mxu0 %v3411_v49  ;;  %v5672_v46 = vpop.permute.xlu0 %930  ;;  %v3484_v49 = vld [vmem:[%s6398_s1 + $0x418] sm:$0xff] }
 0x232   :  { %4110 = vmatprep.subr.mxu1 %v3386_v50  ;;  %4154 = vmatprep.subr.mxu0 %v3410_v51 }
 0x233   :  { %4111 = vmatpush3.msra.mxu1 %v3386_v50  ;;  %4155 = vmatpush3.msra.mxu0 %v3410_v51  ;;  %v3483_v50 = vld [vmem:[%s6398_s1 + $0x410] sm:$0xff]  ;;  %v5680_v51 = vpop.permute.xlu1 %753 }
 0x234   :  { %4112 = vmatprep.subr.mxu1 %v3385_v52  ;;  %4156 = vmatprep.subr.mxu0 %v3409_v54 }
 0x235   :  { %4113 = vmatpush3.msra.mxu1 %v3385_v52  ;;  %4157 = vmatpush3.msra.mxu0 %v3409_v54  ;;  %v3482_v52 = vld [vmem:[%s6398_s1 + $0x408] sm:$0xff]  ;;  %v5685_v54 = vpop.permute.xlu0 %566 }
 0x236   :  { %4115 = vmatmul.mubr.f32.vlgmr.msra.gmra.mxu1 %v5258_v34  ;;  %4159 = vmatmul.mubr.f32.vlgmr.msra.gmra.mxu0 %v5258_v34 }
 0x237   :  { %4170 = vmatprep.subr.mxu1 %v3448_v56  ;;  %4214 = vmatprep.subr.mxu0 %v3472_v59 }
 0x238   :  { %4117 = vmatprep.mubr.f32.mxu1 %v5270_v39  ;;  %4161 = vmatprep.mubr.f32.mxu0 %v5270_v39 }
 0x239   :  { %4171 = vmatpush3.msra.mxu1 %v3448_v56  ;;  %4215 = vmatpush3.msra.mxu0 %v3472_v59  ;;  %v3481_v56 = vld [vmem:[%s6398_s1 + $0x400] sm:$0xff]  ;;  %v5690_v59 = vpop.permute.xlu1 %571 }
 0x23a   :  { %4172 = vmatprep.subr.mxu1 %v3447_v60  ;;  %4216 = vmatprep.subr.mxu0 %v3471_v62 }
 0x23b   :  { %4173 = vmatpush3.msra.mxu1 %v3447_v60  ;;  %4217 = vmatpush3.msra.mxu0 %v3471_v62  ;;  %v5692_v60 = vpop.permute.xlu0 %1117 }
 0x23c   :  { %4118 = vmatmul.mubr.f32.gmra.mxu1 %v5281_v43  ;;  %4162 = vmatmul.mubr.f32.gmra.mxu0 %v5281_v43 }
 0x23d   :  { %4174 = vmatprep.subr.mxu1 %v3446_v2  ;;  %4218 = vmatprep.subr.mxu0 %v3470_v3  ;;  %v5696_v62 = vpop.permute.xlu1 %1122 }
 0x23e   :  { %4120 = vmatprep.mubr.f32.mxu1 %v5292_v48  ;;  %4164 = vmatprep.mubr.f32.mxu0 %v5292_v48 }
 0x23f   :  { %4175 = vmatpush3.msra.mxu1 %v3446_v2  ;;  %4219 = vmatpush3.msra.mxu0 %v3470_v3  ;;  %v5700_v2 = vpop.permute.xlu0 %758 }
 0x240   :  { %4176 = vmatprep.subr.mxu1 %v3445_v4  ;;  %4220 = vmatprep.subr.mxu0 %v3469_v5 }
 0x241   :  { %4177 = vmatpush3.msra.mxu1 %v3445_v4  ;;  %4221 = vmatpush3.msra.mxu0 %v3469_v5  ;;  %v5704_v3 = vpop.permute.xlu1 %1304 }
 0x242   :  { %4121 = vmatmul.mubr.f32.gmra.mxu1 %v5303_v53  ;;  %4165 = vmatmul.mubr.f32.gmra.mxu0 %v5303_v53  ;;  %6442 = vst [vmem:[#allocation4_spill] sm:$0xff] %v5704_v3 }
 0x243   :  { %4178 = vmatprep.subr.mxu1 %v3444_v6  ;;  %4222 = vmatprep.subr.mxu0 %v3468_v8  ;;  %v5706_v4 = vpop.permute.xlu0 %940 }
 0x244   :  { %4123 = vmatprep.mubr.f32.mxu1 %v5314_v57  ;;  %4167 = vmatprep.mubr.f32.mxu0 %v5314_v57 }
 0x245   :  { %4179 = vmatpush3.msra.mxu1 %v3444_v6  ;;  %4223 = vmatpush3.msra.mxu0 %v3468_v8 }
 0x246   :  { %4180 = vmatprep.subr.mxu1 %v3443_v10  ;;  %4224 = vmatprep.subr.mxu0 %v3467_v55 }
 0x247   :  { %4181 = vmatpush3.msra.mxu1 %v3443_v10  ;;  %4225 = vmatpush3.msra.mxu0 %v3467_v55 }
 0x248   :  { %4124 = vmatmul.mubr.f32.gmra.mxu1 %v5325_v0  ;;  %4168 = vmatmul.mubr.f32.gmra.mxu0 %v5325_v0 }
 0x249   :  { %4182 = vmatprep.subr.mxu1 %v3442_v12  ;;  %4226 = vmatprep.subr.mxu0 %v3466_v45 }
 0x24a   :  { %4183 = vmatpush3.msra.mxu1 %v3442_v12  ;;  %4202 = vmatprep.mubr.f32.mxu1 %v5256_v33 }
 0x24b   :  { %4227 = vmatpush3.msra.mxu0 %v3466_v45  ;;  %4246 = vmatprep.mubr.f32.mxu0 %v5256_v33 }
 0x24c   :  { %4184 = vmatprep.subr.mxu1 %v3441_v13  ;;  %4228 = vmatprep.subr.mxu0 %v3465_v61 }
 0x24d   :  { %4185 = vmatpush3.msra.mxu1 %v3441_v13  ;;  %4229 = vmatpush3.msra.mxu0 %v3465_v61 }
 0x24e   :  { %4186 = vmatprep.subr.mxu1 %v3440_v14  ;;  %4230 = vmatprep.subr.mxu0 %v3464_v15 }
 0x24f   :  { %4187 = vmatpush3.msra.mxu1 %v3440_v14  ;;  %4231 = vmatpush3.msra.mxu0 %v3464_v15 }
 0x250   :  { %4188 = vmatprep.subr.mxu1 %v3439_v47  ;;  %4232 = vmatprep.subr.mxu0 %v3463_v16 }
 0x251   :  { %4189 = vmatpush3.msra.mxu1 %v3439_v47  ;;  %4233 = vmatpush3.msra.mxu0 %v3463_v16 }
 0x252   :  { %4190 = vmatprep.subr.mxu1 %v3438_v1  ;;  %4234 = vmatprep.subr.mxu0 %v3462_v17 }
 0x253   :  { %4191 = vmatpush3.msra.mxu1 %v3438_v1  ;;  %4235 = vmatpush3.msra.mxu0 %v3462_v17 }
 0x254   :  { %4192 = vmatprep.subr.mxu1 %v3437_v18  ;;  %4236 = vmatprep.subr.mxu0 %v3461_v19 }
 0x255   :  { %4193 = vmatpush3.msra.mxu1 %v3437_v18  ;;  %4237 = vmatpush3.msra.mxu0 %v3461_v19  ;;  %v5758_v19 = vld [vmem:[%s6399_s2 + $0x78] sm:$0xff] }
 0x256   :  { %4194 = vmatprep.subr.mxu1 %v3436_v58  ;;  %4238 = vmatprep.subr.mxu0 %v3460_v20  ;;  %6452 = vst [vmem:[#allocation14_spill] sm:$0xff] %v5758_v19 }
 0x257   :  { %4195 = vmatpush3.msra.mxu1 %v3436_v58  ;;  %4239 = vmatpush3.msra.mxu0 %v3460_v20  ;;  %v5767_v20 = vld [vmem:[%s6399_s2 + $0x70] sm:$0xff] }
 0x258   :  { %4196 = vmatprep.subr.mxu1 %v3435_v21  ;;  %4240 = vmatprep.subr.mxu0 %v3459_v7  ;;  %6454 = vst [vmem:[#allocation16_spill] sm:$0xff] %v5767_v20 }
 0x259   :  { %4197 = vmatpush3.msra.mxu1 %v3435_v21  ;;  %4241 = vmatpush3.msra.mxu0 %v3459_v7  ;;  %v5776_v7 = vld [vmem:[%s6399_s2 + $0x68] sm:$0xff] }
 0x25a   :  { %4198 = vmatprep.subr.mxu1 %v3434_v22  ;;  %4242 = vmatprep.subr.mxu0 %v3458_v23  ;;  %6455 = vst [vmem:[#allocation17_spill] sm:$0xff] %v5776_v7 }
 0x25b   :  { %4199 = vmatpush3.msra.mxu1 %v3434_v22  ;;  %4243 = vmatpush3.msra.mxu0 %v3458_v23  ;;  %v5785_v23 = vld [vmem:[%s6399_s2 + $0x60] sm:$0xff] }
 0x25c   :  { %4200 = vmatprep.subr.mxu1 %v3433_v24  ;;  %4244 = vmatprep.subr.mxu0 %v3457_v63  ;;  %6457 = vst [vmem:[#allocation19_spill] sm:$0xff] %v5785_v23 }
 0x25d   :  { %4201 = vmatpush3.msra.mxu1 %v3433_v24  ;;  %4245 = vmatpush3.msra.mxu0 %v3457_v63 }
 0x25e   :  { %4203 = vmatmul.mubr.f32.vlgmr.msra.gmra.mxu1 %v5258_v34  ;;  %4247 = vmatmul.mubr.f32.vlgmr.msra.gmra.mxu0 %v5258_v34 }
 0x25f   :  { %4258 = vmatprep.subr.mxu1 %v3496_v25  ;;  %4205 = vmatprep.mubr.f32.mxu1 %v5270_v39 }
 0x260   :  { %4249 = vmatprep.mubr.f32.mxu0 %v5270_v39  ;;  %4259 = vmatpush3.msra.mxu1 %v3496_v25 }
 0x261   :  { %4260 = vmatprep.subr.mxu1 %v3495_v26  ;;  %4302 = vmatprep.subr.mxu0 %v5758_v19 }
 0x262   :  { %4261 = vmatpush3.msra.mxu1 %v3495_v26  ;;  %4250 = vmatmul.mubr.f32.gmra.mxu0 %v5281_v43  ;;  %v5798_v26 = vld [vmem:[%s6399_s2 + $0x58] sm:$0xff] }
 0x263   :  { %4206 = vmatmul.mubr.f32.gmra.mxu1 %v5281_v43  ;;  %4262 = vmatprep.subr.mxu1 %v3494_v27  ;;  %6458 = vst [vmem:[#allocation20_spill] sm:$0xff] %v5798_v26 }
 0x264   :  { %4208 = vmatprep.mubr.f32.mxu1 %v5292_v48  ;;  %4252 = vmatprep.mubr.f32.mxu0 %v5292_v48 }
 0x265   :  { %4263 = vmatpush3.msra.mxu1 %v3494_v27  ;;  %4303 = vmatpush3.msra.mxu0 %v5758_v19  ;;  %v5805_v27 = vld [vmem:[%s6399_s2 + $0x50] sm:$0xff] }
 0x266   :  { %4264 = vmatprep.subr.mxu1 %v3493_v28  ;;  %4253 = vmatmul.mubr.f32.gmra.mxu0 %v5303_v53  ;;  %6459 = vst [vmem:[#allocation21_spill] sm:$0xff] %v5805_v27 }
 0x267   :  { %4265 = vmatpush3.msra.mxu1 %v3493_v28  ;;  %4255 = vmatprep.mubr.f32.mxu0 %v5314_v57 }
 0x268   :  { %4209 = vmatmul.mubr.f32.gmra.mxu1 %v5303_v53  ;;  %4266 = vmatprep.subr.mxu1 %v3492_v29 }
 0x269   :  { %4211 = vmatprep.mubr.f32.mxu1 %v5314_v57  ;;  %4267 = vmatpush3.msra.mxu1 %v3492_v29 }
 0x26a   :  { %4268 = vmatprep.subr.mxu1 %v3491_v31  ;;  %4256 = vmatmul.mubr.f32.gmra.mxu0 %v5325_v0 }
 0x26b   :  { %4269 = vmatpush3.msra.mxu1 %v3491_v31  ;;  %4304 = vmatprep.subr.mxu0 %v5767_v20 }
 0x26c   :  { %4212 = vmatmul.mubr.f32.gmra.mxu1 %v5325_v0  ;;  %4270 = vmatprep.subr.mxu1 %v3490_v35 }
 0x26d   :  { %4271 = vmatpush3.msra.mxu1 %v3490_v35  ;;  %4290 = vmatprep.mubr.f32.mxu1 %v5256_v33  ;;  %v3485_v33 = vld [vmem:[%s6398_s1 + $0x420] sm:$0xff]  ;;  %v5818_v35 = vld [vmem:[%s6399_s2 + $0x48] sm:$0xff] }
 0x26e   :  { %4272 = vmatprep.subr.mxu1 %v3489_v36  ;;  %4305 = vmatpush3.msra.mxu0 %v5767_v20  ;;  %6461 = vst [vmem:[#allocation23_spill] sm:$0xff] %v5818_v35 }
 0x26f   :  { %4273 = vmatpush3.msra.mxu1 %v3489_v36  ;;  %4306 = vmatprep.subr.mxu0 %v5776_v7 }
 0x270   :  { %4274 = vmatprep.subr.mxu1 %v3488_v38  ;;  %4307 = vmatpush3.msra.mxu0 %v5776_v7 }
 0x271   :  { %4275 = vmatpush3.msra.mxu1 %v3488_v38  ;;  %4308 = vmatprep.subr.mxu0 %v5785_v23  ;;  %v5827_v38 = vld [vmem:[%s6399_s2 + $0x40] sm:$0xff] }
 0x272   :  { %4276 = vmatprep.subr.mxu1 %v3487_v41  ;;  %4309 = vmatpush3.msra.mxu0 %v5785_v23  ;;  %6463 = vst [vmem:[#allocation25_spill] sm:$0xff] %v5827_v38  ;;  %v5891_v23 = vld [vmem:[%s6399_s2 + $0x10] sm:$0xff] }
 0x273   :  { %4277 = vmatpush3.msra.mxu1 %v3487_v41  ;;  %4310 = vmatprep.subr.mxu0 %v5798_v26  ;;  %6473 = vst [vmem:[#allocation35_spill] sm:$0xff] %v5891_v23 }
 0x274   :  { %4278 = vmatprep.subr.mxu1 %v3486_v42  ;;  %4311 = vmatpush3.msra.mxu0 %v5798_v26 }
 0x275   :  { %4279 = vmatpush3.msra.mxu1 %v3486_v42  ;;  %4312 = vmatprep.subr.mxu0 %v5805_v27 }
 0x276   :  { %4280 = vmatprep.subr.mxu1 %v3485_v33  ;;  %4313 = vmatpush3.msra.mxu0 %v5805_v27  ;;  %v5880_v27 = vld [vmem:[%s6399_s2 + $0x18] sm:$0xff] }
 0x277   :  { %4281 = vmatpush3.msra.mxu1 %v3485_v33  ;;  %4314 = vmatprep.subr.mxu0 %v5818_v35  ;;  %v5838_v33 = vld [vmem:[%s6399_s2 + $0x38] sm:$0xff]  ;;  %6471 = vst [vmem:[#allocation33_spill] sm:$0xff] %v5880_v27 }
 0x278   :  { %4282 = vmatprep.subr.mxu1 %v3484_v49  ;;  %4315 = vmatpush3.msra.mxu0 %v5818_v35  ;;  %6464 = vst [vmem:[#allocation26_spill] sm:$0xff] %v5838_v33 }
 0x279   :  { %4283 = vmatpush3.msra.mxu1 %v3484_v49  ;;  %4316 = vmatprep.subr.mxu0 %v5827_v38 }
 0x27a   :  { %4284 = vmatprep.subr.mxu1 %v3483_v50  ;;  %4317 = vmatpush3.msra.mxu0 %v5827_v38 }
 0x27b   :  { %4285 = vmatpush3.msra.mxu1 %v3483_v50  ;;  %4318 = vmatprep.subr.mxu0 %v5838_v33  ;;  %v5847_v50 = vld [vmem:[%s6399_s2 + $0x30] sm:$0xff] }
 0x27c   :  { %4286 = vmatprep.subr.mxu1 %v3482_v52  ;;  %4319 = vmatpush3.msra.mxu0 %v5838_v33  ;;  %6466 = vst [vmem:[#allocation28_spill] sm:$0xff] %v5847_v50  ;;  %v5867_v33 = vld [vmem:[%s6399_s2 + $0x20] sm:$0xff] }
 0x27d   :  { %4287 = vmatpush3.msra.mxu1 %v3482_v52  ;;  %4320 = vmatprep.subr.mxu0 %v5847_v50  ;;  %6469 = vst [vmem:[#allocation31_spill] sm:$0xff] %v5867_v33 }
 0x27e   :  { %4288 = vmatprep.subr.mxu1 %v3481_v56  ;;  %4321 = vmatpush3.msra.mxu0 %v5847_v50 }
 0x27f   :  { %4289 = vmatpush3.msra.mxu1 %v3481_v56  ;;  %4322 = vmatprep.subr.mxu0 %v5860_v9 }
 0x280   :  { %4291 = vmatmul.mubr.f32.vlgmr.msra.gmra.mxu1 %v5258_v34  ;;  %v5709_v34 = vpop.permute.xlu1 %1309  ;;  %4323 = vmatpush3.msra.mxu0 %v5860_v9 }
 0x281   :  { %4293 = vmatprep.mubr.f32.mxu1 %v5270_v39  ;;  %v5711_v39 = vpop.permute.xlu0 %945  ;;  %4324 = vmatprep.subr.mxu0 %v5867_v33 }
 0x282   :  { %4325 = vmatpush3.msra.mxu0 %v5867_v33  ;;  %v5899_v33 = vld [vmem:[%s6399_s2 + $0x8] sm:$0xff] }
 0x283   :  { %4326 = vmatprep.subr.mxu0 %v5880_v27  ;;  %6474 = vst [vmem:[#allocation36_spill] sm:$0xff] %v5899_v33 }
 0x284   :  { %4294 = vmatmul.mubr.f32.gmra.mxu1 %v5281_v43  ;;  %v5713_v5 = vpop.permute.xlu1 %763  ;;  %4327 = vmatpush3.msra.mxu0 %v5880_v27  ;;  %v5905_v27 = vld [vmem:[%s6399_s2] sm:$0xff] }
 0x285   :  { %4296 = vmatprep.mubr.f32.mxu1 %v5292_v48  ;;  %v5715_v43 = vpop.permute.xlu0 %576  ;;  %4328 = vmatprep.subr.mxu0 %v5891_v23  ;;  %6475 = vst [vmem:[#allocation37_spill] sm:$0xff] %v5905_v27 }
 0x286   :  { %4329 = vmatpush3.msra.mxu0 %v5891_v23 }
 0x287   :  { %4330 = vmatprep.subr.mxu0 %v5899_v33 }
 0x288   :  { %4297 = vmatmul.mubr.f32.gmra.mxu1 %v5303_v53  ;;  %v5717_v48 = vpop.permute.xlu1 %1491  ;;  %4331 = vmatpush3.msra.mxu0 %v5899_v33 }
 0x289   :  { %4299 = vmatprep.mubr.f32.mxu1 %v5314_v57  ;;  %6443 = vst [vmem:[#allocation5_spill] sm:$0xff] %v5717_v48  ;;  %v5719_v6 = vpop.permute.xlu0 %1127  ;;  %4332 = vmatprep.subr.mxu0 %v5905_v27 }
 0x28a   :  { %6444 = vst [vmem:[#allocation6_spill] sm:$0xff] %v5719_v6  ;;  %4333 = vmatpush3.msra.mxu0 %v5905_v27 }
 0x28c   :  { %4300 = vmatmul.mubr.f32.gmra.mxu1 %v5325_v0  ;;  %v5721_v53 = vpop.permute.xlu1 %768 }
 0x28d   :  { %v5723_v57 = vpop.permute.xlu0 %581 }
 0x290   :  { %v5725_v8 = vpop.permute.xlu1 %1496 }
 0x291   :  { %6445 = vst [vmem:[#allocation7_spill] sm:$0xff] %v5725_v8  ;;  %v5727_v10 = vpop.permute.xlu0 %1132 }
 0x294   :  { %v5729_v0 = vpop.permute.xlu1 %1314 }
 0x295   :  { %6446 = vst [vmem:[#allocation8_spill] sm:$0xff] %v5729_v0  ;;  %v5731_v55 = vpop.permute.xlu0 %950 }
 0x298   :  { %v5733_v12 = vpop.permute.xlu1 %955 }
 0x299   :  { %v5735_v45 = vpop.permute.xlu0 %1678 }
 0x29a   :  { %6447 = vst [vmem:[#allocation9_spill] sm:$0xff] %v5735_v45 }
 0x29c   :  { %v5737_v13 = vpop.permute.xlu1 %1683 }
 0x29d   :  { %6448 = vst [vmem:[#allocation10_spill] sm:$0xff] %v5737_v13  ;;  %v5739_v61 = vpop.permute.xlu0 %1319 }
 0x29e   :  { %6449 = vst [vmem:[#allocation11_spill] sm:$0xff] %v5739_v61 }
 0x2a0   :  { %v5741_v14 = vpop.permute.xlu1 %773 }
 0x2a1   :  { %v5743_v15 = vpop.permute.xlu0 %586 }
 0x2a4   :  { %v5745_v47 = vpop.permute.xlu1 %1501 }
 0x2a5   :  { %6450 = vst [vmem:[#allocation12_spill] sm:$0xff] %v5745_v47  ;;  %v5747_v16 = vpop.permute.xlu0 %1137 }
 0x2a6   :  { %6451 = vst [vmem:[#allocation13_spill] sm:$0xff] %v5747_v16 }
 0x2a7   :  { %v5749_v1 = vpop.f32.mrf.mxu1  ;;  %v5787_v24 = vpop.f32.mrf.mxu0 }
 0x2a8   :  { %v5751_v17 = vpop.permute.xlu1 %591 }
 0x2a9   :  { %v5753_v18 = vpop.f32.mrf.mxu1  ;;  %v5761_v58 = vpop.permute.xlu0 %1865 }
 0x2aa   :  { %6453 = vst [vmem:[#allocation15_spill] sm:$0xff] %v5761_v58  ;;  %v5807_v28 = vpop.f32.mrf.mxu0 }
 0x2ac   :  { %v5779_v22 = vpop.permute.xlu1 %1142 }
 0x2ad   :  { %v5770_v21 = vpop.f32.mrf.mxu1  ;;  %6456 = vst [vmem:[#allocation18_spill] sm:$0xff] %v5779_v22  ;;  %v5790_v63 = vpop.permute.xlu0 %778 }
 0x2ae   :  { %v5829_v41 = vpop.f32.mrf.mxu0 }
 0x2af   :  { %v5792_v25 = vpop.f32.mrf.mxu1 }
 0x2b0   :  { %v5810_v29 = vpop.permute.xlu1 %1870  ;;  %v5849_v52 = vpop.f32.mrf.mxu0 }
 0x2b1   :  { %6460 = vst [vmem:[#allocation22_spill] sm:$0xff] %v5810_v29  ;;  %v5821_v36 = vpop.permute.xlu0 %1506 }
 0x2b2   :  { %6462 = vst [vmem:[#allocation24_spill] sm:$0xff] %v5821_v36 }
 0x2b3   :  { %v5812_v31 = vpop.f32.mrf.mxu1  ;;  %v5869_v38 = vpop.f32.mrf.mxu0 }
 0x2b4   :  { %v5841_v49 = vpop.permute.xlu1 %1324 }
 0x2b5   :  { %v5832_v42 = vpop.f32.mrf.mxu1  ;;  %6465 = vst [vmem:[#allocation27_spill] sm:$0xff] %v5841_v49  ;;  %v5852_v56 = vpop.permute.xlu0 %960 }
 0x2b6   :  { %6467 = vst [vmem:[#allocation29_spill] sm:$0xff] %v5852_v56  ;;  %v5893_v7 = vpop.f32.mrf.mxu0 }
 0x2b8   :  { %v5872_v35 = vpop.permute.xlu1 %2052 }
 0x2b9   :  { %v5854_v11 = vpop.f32.mrf.mxu1  ;;  %6470 = vst [vmem:[#allocation32_spill] sm:$0xff] %v5872_v35  ;;  %v5883_v9 = vpop.permute.xlu0 %1688 }
 0x2ba   :  { %6472 = vst [vmem:[#allocation34_spill] sm:$0xff] %v5883_v9  ;;  %v5913_v35 = vpop.f32.mrf.mxu0 }
 0x2bb   :  { %v5874_v50 = vpop.f32.mrf.mxu1 }
 0x2bc   :  { %v5908_v20 = vpop.permute.xlu1 %1329  ;;  %v5921_v29 = vpop.f32.mrf.mxu0 }
 0x2bd   :  { %6476 = vst [vmem:[#allocation38_spill] sm:$0xff] %v5908_v20  ;;  %v5916_v58 = vpop.permute.xlu0 %965 }
 0x2c0   :  { %v5923_v9 = vpop.permute.xlu1 %2057 }
 0x2c1   :  { %6477 = vst [vmem:[#allocation39_spill] sm:$0xff] %v5923_v9  ;;  %v5927_v36 = vpop.permute.xlu0 %1693 }
 0x2c2   :  { %6478 = vst [vmem:[#allocation40_spill] sm:$0xff] %v5927_v36 }
 0x2c4   :  { %v5933_v13 = vpop.permute.xlu1 %1511 }
 0x2c5   :  { %6479 = vst [vmem:[#allocation41_spill] sm:$0xff] %v5933_v13  ;;  %v5937_v49 = vpop.permute.xlu0 %1147 }
 0x2c6   :  { %6480 = vst [vmem:[#allocation42_spill] sm:$0xff] %v5937_v49 }
 0x2c8   :  { %v5943_v20 = vpop.permute.xlu1 %1152 }
 0x2c9   :  { %6482 = vst [vmem:[#allocation44_spill] sm:$0xff] %v5943_v20  ;;  %v5947_v0 = vpop.permute.xlu0 %1875 }
 0x2ca   :  { %6484 = vst [vmem:[#allocation46_spill] sm:$0xff] %v5947_v0 }
 0x2cc   :  { %v5953_v61 = vpop.permute.xlu1 %1880 }
 0x2cd   :  { %6486 = vst [vmem:[#allocation48_spill] sm:$0xff] %v5953_v61  ;;  %v5957_v56 = vpop.permute.xlu0 %1516 }
 0x2ce   :  { %v5885_v26 = vpop.f32.mrf.mxu1  ;;  %v5925_v47 = vpop.f32.mrf.mxu0  ;;  %6488 = vst [vmem:[#allocation50_spill] sm:$0xff] %v5957_v56 }
 0x2d0   :  { %v5910_v19 = vpop.f32.mrf.mxu1  ;;  %v5931_v33 = vpop.f32.mrf.mxu0 }
 0x2d1   :  { %v5963_v3 = vpop.permute.xlu1 %1698  ;;  %v5969_v0 = vpop.permute.xlu0 %1334 }
 0x2d2   :  { %6490 = vst [vmem:[#allocation52_spill] sm:$0xff] %v5963_v3  ;;  %6493 = vst [vmem:[#allocation55_spill] sm:$0xff] %v5969_v0 }
 0x2d4   :  { %v5919_v23 = vpop.f32.mrf.mxu1  ;;  %v5939_v27 = vpop.f32.mrf.mxu0 }
 0x2d5   :  { %6481 = vst [vmem:[#allocation43_spill] sm:$0xff] %v5939_v27  ;;  %v5975_v61 = vpop.permute.xlu1 %2116  ;;  %v5979_v56 = vpop.permute.xlu0 %2062 }
 0x2d6   :  { %v5929_v45 = vpop.f32.mrf.mxu1  ;;  %v5945_v9 = vpop.f32.mrf.mxu0  ;;  %6496 = vst [vmem:[#allocation58_spill] sm:$0xff] %v5975_v61  ;;  %6498 = vst [vmem:[#allocation60_spill] sm:$0xff] %v5979_v56 }
 0x2d7   :  { %6483 = vst [vmem:[#allocation45_spill] sm:$0xff] %v5945_v9 }
 0x2d9   :  { %v5985_v3 = vpop.permute.xlu1 %1703 }
 0x2da   :  { %v5935_v48 = vpop.f32.mrf.mxu1  ;;  %v5951_v16 = vpop.f32.mrf.mxu0  ;;  %6501 = vst [vmem:[#allocation63_spill] sm:$0xff] %v5985_v3 }
 0x2db   :  { %6485 = vst [vmem:[#allocation47_spill] sm:$0xff] %v5951_v16 }
 0x2dc   :  { %v5941_v8 = vpop.f32.mrf.mxu1  ;;  %v5961_v22 = vpop.f32.mrf.mxu0 }
 0x2dd   :  { %6489 = vst [vmem:[#allocation51_spill] sm:$0xff] %v5961_v22 }
 0x2e0   :  { %v5949_v36 = vpop.f32.mrf.mxu1  ;;  %v5967_v6 = vpop.f32.mrf.mxu0 }
 0x2e1   :  { %6492 = vst [vmem:[#allocation54_spill] sm:$0xff] %v5967_v6  ;;  %v5989_v6 = vpop.permute.xlu0 %1339 }
 0x2e2   :  { %v5955_v13 = vpop.f32.mrf.mxu1  ;;  %v5973_v16 = vpop.f32.mrf.mxu0  ;;  %6503 = vst [vmem:[#allocation65_spill] sm:$0xff] %v5989_v6 }
 0x2e3   :  { %6487 = vst [vmem:[#allocation49_spill] sm:$0xff] %v5955_v13  ;;  %6495 = vst [vmem:[#allocation57_spill] sm:$0xff] %v5973_v16  ;;  %v5995_v16 = vpop.permute.xlu1 %2121 }
 0x2e4   :  { %6506 = vst [vmem:[#allocation68_spill] sm:$0xff] %v5995_v16 }
 0x2f6   :  { %v5959_v49 = vpop.f32.mrf.mxu1  ;;  %v5977_v13 = vpop.f32.mrf.mxu0 }
 0x2f7   :  { %6497 = vst [vmem:[#allocation59_spill] sm:$0xff] %v5977_v13  ;;  %v5999_v13 = vpop.permute.xlu0 %2067 }
 0x2f8   :  { %v5965_v20 = vpop.f32.mrf.mxu1  ;;  %v5983_v22 = vpop.f32.mrf.mxu0  ;;  %6508 = vst [vmem:[#allocation70_spill] sm:$0xff] %v5999_v13 }
 0x2f9   :  { %6491 = vst [vmem:[#allocation53_spill] sm:$0xff] %v5965_v20  ;;  %6500 = vst [vmem:[#allocation62_spill] sm:$0xff] %v5983_v22  ;;  %v6005_v22 = vpop.permute.xlu1 %1885 }
 0x2fa   :  { %6510 = vst [vmem:[#allocation72_spill] sm:$0xff] %v6005_v22  ;;  %v782_v22 = vmul.f32 %v5787_v24, %v5652_v37 }
 0x2fc   :  { %v5971_v9 = vpop.f32.mrf.mxu1  ;;  %v5991_v0 = vpop.f32.mrf.mxu0 }
 0x2fd   :  { %6494 = vst [vmem:[#allocation56_spill] sm:$0xff] %v5971_v9  ;;  %6504 = vst [vmem:[#allocation66_spill] sm:$0xff] %v5991_v0 }
 0x2fe   :  { %v5981_v27 = vpop.f32.mrf.mxu1  ;;  %v5997_v61 = vpop.f32.mrf.mxu0 }
 0x2ff   :  { %6499 = vst [vmem:[#allocation61_spill] sm:$0xff] %v5981_v27  ;;  %6507 = vst [vmem:[#allocation69_spill] sm:$0xff] %v5997_v61 }
 0x302   :  { %v5987_v20 = vpop.f32.mrf.mxu1  ;;  %v6003_v27 = vpop.f32.mrf.mxu0 }
 0x303   :  { %6502 = vst [vmem:[#allocation64_spill] sm:$0xff] %v5987_v20  ;;  %6509 = vst [vmem:[#allocation71_spill] sm:$0xff] %v6003_v27  ;;  %v6009_v20 = vpop.permute.xlu0 %1521  ;;  %v595_v27 = vmul.f32 %v5749_v1, %v5659_v40  ;;  %v783_v40 = vmul.f32 %v5680_v51, %v5849_v52  ;;  %v598_v51 = vmul.f32 %v5715_v43, %v5832_v42  ;;  %v6521_v42 = vld [vmem:[#allocation18_spill] sm:$0xff] }
 0x304   :  { %v5993_v9 = vpop.f32.mrf.mxu1  ;;  %6511 = vst [vmem:[#allocation73_spill] sm:$0xff] %v6009_v20  ;;  %v6013_v0 = vpop.f32.mrf.mxu0  ;;  %v594_v20 = vmul.f32 %v5641_v32, %v5753_v18  ;;  %v599_v32 = vmul.f32 %v5812_v31, %v5723_v57  ;;  %v785_v18 = vmul.f32 %v5713_v5, %v5893_v7  ;;  %v971_v57 = vmul.f32 %v5919_v23, %v5711_v39  ;;  %v6519_v31 = vld [vmem:[#allocation53_spill] sm:$0xff] }
 0x305   :  { %6505 = vst [vmem:[#allocation67_spill] sm:$0xff] %v5993_v9  ;;  %6512 = vst [vmem:[#allocation74_spill] sm:$0xff] %v6013_v0  ;;  %v6015_v9 = vpop.permute.xlu1 %1890  ;;  %v781_v0 = vmul.f32 %v5634_v30, %v5807_v28  ;;  %v786_v30 = vmul.f32 %v5869_v38, %v5721_v53  ;;  %v970_v53 = vmul.f32 %v5706_v4, %v5929_v45  ;;  %v6518_v28 = vld [vmem:[#allocation6_spill] sm:$0xff] }
 0x306   :  { %6513 = vst [vmem:[#allocation75_spill] sm:$0xff] %v6015_v9  ;;  %v597_v9 = vmul.f32 %v5770_v21, %v5690_v59  ;;  %v601_v5 = vmul.f32 %v5854_v11, %v5751_v17  ;;  %v788_v39 = vmul.f32 %v5913_v35, %v5790_v63  ;;  %v600_v4 = vmul.f32 %v5743_v15, %v5874_v50 }
 0x307   :  { %v6021_v13 = vpop.permute.xlu0 %1526  ;;  %v794_v43 = vadd.f32 %v786_v30, %v599_v32  ;;  %v787_v45 = vmul.f32 %v5741_v14, %v5921_v29  ;;  %v972_v11 = vmul.f32 %v5731_v55, %v5941_v8  ;;  %v1156_v15 = vmul.f32 %v5925_v47, %v5696_v62  ;;  %v6516_v8 = vld [vmem:[#allocation43_spill] sm:$0xff]  ;;  %v6520_v62 = vld [vmem:[#allocation4_spill] sm:$0xff]  ;;  %v6524_v32 = vld [vmem:[#allocation29_spill] sm:$0xff] }
 0x308   :  { %v6001_v56 = vpop.f32.mrf.mxu1  ;;  %v6019_v61 = vpop.f32.mrf.mxu0  ;;  %6515 = vst [vmem:[#allocation77_spill] sm:$0xff] %v6021_v13  ;;  %v596_v13 = vmul.f32 %v5685_v54, %v5792_v25  ;;  %v968_v54 = vmul.f32 %v5672_v46, %v5910_v19  ;;  %v789_v25 = vadd.f32 %v781_v0, %v594_v20  ;;  %v793_v0 = vadd.f32 %v785_v18, %v598_v51  ;;  %v6526_v51 = vld [vmem:[#allocation56_spill] sm:$0xff] }
 0x309   :  { %6514 = vst [vmem:[#allocation76_spill] sm:$0xff] %v6019_v61  ;;  %v784_v61 = vmul.f32 %v5829_v41, %v5700_v2  ;;  %v6047_v59 = vpop.permute.xlu1 %2072  ;;  %v969_v2 = vmul.f32 %v5885_v26, %v5667_v44  ;;  %v790_v44 = vadd.f32 %v782_v22, %v595_v27  ;;  %v1155_v14 = vmul.f32 %v5692_v60, %v5931_v33  ;;  %v6517_v27 = vld [vmem:[#allocation45_spill] sm:$0xff]  ;;  %v6522_v33 = vld [vmem:[#allocation47_spill] sm:$0xff] }
 0x30a   :  { %v6007_v3 = vpop.f32.mrf.mxu1  ;;  %v6045_v37 = vpop.f32.mrf.mxu0  ;;  %v791_v46 = vadd.f32 %v783_v40, %v596_v13  ;;  %v976_v22 = vadd.f32 %v968_v54, %v789_v25  ;;  %v975_v23 = vmul.f32 %v5949_v36, %v5916_v58  ;;  %v796_v63 = vadd.f32 %v788_v39, %v601_v5  ;;  %v6523_v40 = vld [vmem:[#allocation49_spill] sm:$0xff]  ;;  %v6525_v54 = vld [vmem:[#allocation11_spill] sm:$0xff]  ;;  %v6531_v39 = vld [vmem:[#allocation38_spill] sm:$0xff] }
 0x30b   :  { %v6063_v24 = vpop.permute.xlu0 %1708  ;;  %v792_v26 = vadd.f32 %v784_v61, %v597_v9  ;;  %v977_v7 = vadd.f32 %v969_v2, %v790_v44  ;;  %v973_v9 = vmul.f32 %v5935_v48, %v5733_v12  ;;  %v1343_v48 = vmul.f32 %v5959_v49, %v5709_v34  ;;  %v6528_v44 = vld [vmem:[#allocation13_spill] sm:$0xff] }
 0x30c   :  { %v978_v61 = vadd.f32 %v970_v53, %v791_v46  ;;  %v1158_v55 = vmul.f32 %v6516_v8, %v5727_v10  ;;  %v1157_v29 = vmul.f32 %v6518_v28, %v6517_v27  ;;  %v1342_v47 = vmul.f32 %v6520_v62, %v6519_v31  ;;  %v6527_v53 = vld [vmem:[#allocation51_spill] sm:$0xff]  ;;  %v6529_v46 = vld [vmem:[#allocation61_spill] sm:$0xff]  ;;  %v6541_v28 = vld [vmem:[#allocation62_spill] sm:$0xff] }
 0x30d   :  { %v979_v13 = vadd.f32 %v971_v57, %v792_v26  ;;  %v6081_v20 = vpop.permute.xlu1 %1713  ;;  %v795_v60 = vadd.f32 %v787_v45, %v600_v4  ;;  %v1164_v38 = vadd.f32 %v1156_v15, %v977_v7  ;;  %v1163_v58 = vadd.f32 %v1155_v14, %v976_v22  ;;  %v6532_v4 = vld [vmem:[#allocation64_spill] sm:$0xff]  ;;  %v6537_v14 = vld [vmem:[#allocation67_spill] sm:$0xff]  ;;  %v6539_v8 = vld [vmem:[#allocation57_spill] sm:$0xff] }
 0x30e   :  { %v981_v36 = vadd.f32 %v973_v9, %v794_v43  ;;  %v1165_v34 = vadd.f32 %v1157_v29, %v978_v61  ;;  %v1160_v49 = vmul.f32 %v6522_v33, %v6521_v42  ;;  %v980_v50 = vadd.f32 %v972_v11, %v793_v0  ;;  %v6530_v43 = vld [vmem:[#allocation8_spill] sm:$0xff]  ;;  %v6534_v0 = vld [vmem:[#allocation54_spill] sm:$0xff]  ;;  %v6535_v61 = vld [vmem:[#allocation7_spill] sm:$0xff] }
 0x30f   :  { %v6099_v35 = vpop.permute.xlu0 %2126  ;;  %v1166_v41 = vadd.f32 %v1158_v55, %v979_v13  ;;  %v983_v10 = vadd.f32 %v975_v23, %v796_v63  ;;  %v974_v30 = vmul.f32 %v6524_v32, %v6523_v40  ;;  %v1351_v2 = vadd.f32 %v1343_v48, %v1164_v38  ;;  %v6533_v9 = vld [vmem:[#allocation44_spill] sm:$0xff]  ;;  %v6536_v11 = vld [vmem:[#allocation59_spill] sm:$0xff]  ;;  %v6540_v55 = vld [vmem:[#allocation42_spill] sm:$0xff] }
 0x310   :  { %v1345_v18 = vmul.f32 %v6526_v51, %v6525_v54  ;;  %v1159_v25 = vmul.f32 %v6528_v44, %v6527_v53  ;;  %v1350_v26 = vadd.f32 %v1342_v47, %v1163_v58  ;;  %v1344_v5 = vmul.f32 %v6530_v43, %v6529_v46  ;;  %v6538_v23 = vld [vmem:[#allocation27_spill] sm:$0xff]  ;;  %v6542_v29 = vld [vmem:[#allocation5_spill] sm:$0xff]  ;;  %v6543_v62 = vld [vmem:[#allocation10_spill] sm:$0xff] }
 0x311   :  { %v1347_v45 = vmul.f32 %v6532_v4, %v6531_v39  ;;  %v6115_v7 = vpop.permute.xlu1 %2131  ;;  %v1168_v22 = vadd.f32 %v1160_v49, %v981_v36  ;;  %v1162_v13 = vmul.f32 %v6534_v0, %v6533_v9  ;;  %v1530_v15 = vmul.f32 %v6536_v11, %v6535_v61  ;;  %v6544_v51 = vld [vmem:[#allocation9_spill] sm:$0xff]  ;;  %v6545_v44 = vld [vmem:[#allocation24_spill] sm:$0xff]  ;;  %v6548_v4 = vld [vmem:[#allocation55_spill] sm:$0xff] }
 0x312   :  { %v1346_v48 = vmul.f32 %v6538_v23, %v6537_v14  ;;  %v1167_v63 = vadd.f32 %v1159_v25, %v980_v50  ;;  %v1161_v27 = vmul.f32 %v6540_v55, %v6539_v8  ;;  %v1529_v31 = vmul.f32 %v6542_v29, %v6541_v28  ;;  %v6546_v25 = vld [vmem:[#allocation66_spill] sm:$0xff]  ;;  %v6547_v39 = vld [vmem:[#allocation65_spill] sm:$0xff] }
 0x313   :  { %v6129_v58 = vpop.permute.xlu0 %2077  ;;  %v1170_v36 = vadd.f32 %v1162_v13, %v983_v10  ;;  %v982_v42 = vadd.f32 %v974_v30, %v795_v60  ;;  %v1538_v33 = vadd.f32 %v1530_v15, %v1351_v2  ;;  %v1353_v49 = vadd.f32 %v1345_v18, %v1166_v41  ;;  %v6549_v60 = vld [vmem:[#allocation69_spill] sm:$0xff]  ;;  %v6550_v30 = vld [vmem:[#allocation12_spill] sm:$0xff]  ;;  %v6551_v2 = vld [vmem:[#allocation50_spill] sm:$0xff] }
 0x314   :  { %v1537_v32 = vadd.f32 %v1529_v31, %v1350_v26  ;;  %v1352_v54 = vadd.f32 %v1344_v5, %v1165_v34  ;;  %v1355_v50 = vadd.f32 %v1347_v45, %v1168_v22  ;;  %v1532_v46 = vmul.f32 %v6546_v25, %v6545_v44  ;;  %v6552_v18 = vld [vmem:[#allocation71_spill] sm:$0xff]  ;;  %v6553_v5 = vld [vmem:[#allocation40_spill] sm:$0xff]  ;;  %v6554_v13 = vld [vmem:[#allocation74_spill] sm:$0xff] }
 0x315   :  { %v1354_v43 = vadd.f32 %v1346_v48, %v1167_v63  ;;  %v1348_v10 = vmul.f32 %v6548_v4, %v6007_v3  ;;  %v1531_v41 = vmul.f32 %v6550_v30, %v6549_v60  ;;  %v1534_v34 = vmul.f32 %v6552_v18, %v6551_v2  ;;  %v1901_v22 = vpop.permute.xlu1 %1900  ;;  %v6555_v61 = vld [vmem:[#allocation41_spill] sm:$0xff]  ;;  %v6556_v11 = vld [vmem:[#allocation34_spill] sm:$0xff]  ;;  %v6563_v44 = vld [vmem:[#allocation63_spill] sm:$0xff] }
 0x316   :  { %v1169_v9 = vadd.f32 %v1161_v27, %v982_v42  ;;  %v1540_v0 = vadd.f32 %v1532_v46, %v1353_v49  ;;  %v6557_v48 = vld [vmem:[#allocation22_spill] sm:$0xff]  ;;  %v6558_v29 = vld [vmem:[#allocation77_spill] sm:$0xff]  ;;  %v6559_v27 = vld [vmem:[#allocation76_spill] sm:$0xff] }
 0x317   :  { %v1539_v14 = vadd.f32 %v1531_v41, %v1352_v54  ;;  %v1542_v23 = vadd.f32 %v1534_v34, %v1355_v50  ;;  %v6151_v55 = vpop.permute.xlu0 %1895  ;;  %v1536_v31 = vmul.f32 %v6559_v27, %v6558_v29  ;;  %v6561_v50 = vld [vmem:[#allocation39_spill] sm:$0xff]  ;;  %v6564_v25 = vld [vmem:[#allocation52_spill] sm:$0xff]  ;;  %v6567_v18 = vld [vmem:[#allocation46_spill] sm:$0xff] }
 0x318   :  { %v6573_v27 = vld [vmem:[#allocation72_spill] sm:$0xff] }
 0x319   :  { %v2137_v30 = vpop.permute.xlu1 %2136 }
 0x31e   :  { %v6011_v6 = vpop.f32.mrf.mxu1  ;;  %v6061_v21 = vpop.f32.mrf.mxu0 }
 0x31f   :  { %v1717_v47 = vmul.f32 %v6011_v6, %v6543_v62  ;;  %v1349_v6 = vmul.f32 %v6001_v56, %v6547_v39  ;;  %v1533_v56 = vmul.f32 %v6555_v61, %v6554_v13  ;;  %v1904_v63 = vmul.f32 %v6061_v21, %v6557_v48  ;;  %v6562_v21 = vld [vmem:[#allocation73_spill] sm:$0xff]  ;;  %v6570_v48 = vld [vmem:[#allocation58_spill] sm:$0xff] }
 0x320   :  { %v6017_v16 = vpop.f32.mrf.mxu1  ;;  %v6079_v17 = vpop.f32.mrf.mxu0  ;;  %v1356_v62 = vadd.f32 %v1348_v10, %v1169_v9 }
 0x321   :  { %v1716_v53 = vmul.f32 %v6544_v51, %v6017_v16  ;;  %v1725_v26 = vadd.f32 %v1717_v47, %v1538_v33  ;;  %v1357_v28 = vadd.f32 %v1349_v6, %v1170_v36  ;;  %v6560_v33 = vld [vmem:[#allocation15_spill] sm:$0xff]  ;;  %v6565_v6 = vld [vmem:[#allocation48_spill] sm:$0xff] }
 0x322   :  { %v6103_v52 = vpop.f32.mrf.mxu0 }
 0x323   :  { %v6039_v1 = vpop.f32.mrf.mxu1  ;;  %v1724_v8 = vadd.f32 %v1716_v53, %v1537_v32  ;;  %v1912_v42 = vadd.f32 %v1904_v63, %v1725_v26  ;;  %v1535_v32 = vmul.f32 %v6562_v21, %v6045_v37  ;;  %v1906_v4 = vmul.f32 %v6103_v52, %v6565_v6  ;;  %v2083_v52 = vpop.permute.xlu0 %2082  ;;  %v6571_v63 = vld [vmem:[#allocation60_spill] sm:$0xff] }
 0x324   :  { %v1825_v38 = vpop.f32.mrf.mxu0  ;;  %v1719_v16 = vmul.f32 %v6039_v1, %v6553_v5  ;;  %v1541_v1 = vadd.f32 %v1533_v56, %v1354_v43  ;;  %v1544_v41 = vadd.f32 %v1536_v31, %v1357_v28  ;;  %v6572_v28 = vld [vmem:[#allocation75_spill] sm:$0xff] }
 0x325   :  { %v6065_v19 = vpop.f32.mrf.mxu1  ;;  %v1543_v2 = vadd.f32 %v1535_v32, %v1356_v62  ;;  %v1905_v34 = vmul.f32 %v6567_v18, %v1825_v38 }
 0x326   :  { %v4254_v45 = vpop.f32.mrf.mxu0  ;;  %v1718_v3 = vmul.f32 %v6556_v11, %v6065_v19  ;;  %v1903_v19 = vmul.f32 %v6560_v33, %v6079_v17  ;;  %v1727_v49 = vadd.f32 %v1719_v16, %v1540_v0  ;;  %v6566_v17 = vld [vmem:[#allocation32_spill] sm:$0xff]  ;;  %v6569_v0 = vld [vmem:[#allocation70_spill] sm:$0xff]  ;;  %v2142_v33 = vpop.permute.xlu1 %2141 }
 0x327   :  { %v6568_v16 = vld [vmem:[#allocation68_spill] sm:$0xff]  ;;  %v1908_v29 = vmul.f32 %v4254_v45, %v6572_v28  ;;  %v2088_v32 = vpop.permute.xlu0 %2087 }
 0x328   :  { %v6091_v12 = vpop.f32.mrf.mxu1  ;;  %v1835_v54 = vpop.f32.mrf.mxu0  ;;  %v1726_v53 = vadd.f32 %v1718_v3, %v1539_v14  ;;  %v1911_v39 = vadd.f32 %v1903_v19, %v1724_v8  ;;  %v1914_v5 = vadd.f32 %v1906_v4, %v1727_v49 }
 0x329   :  { %v1721_v36 = vmul.f32 %v6091_v12, %v6563_v44  ;;  %v1907_v31 = vmul.f32 %v6573_v27, %v1835_v54 }
 0x32a   :  { %v1648_v57 = vpop.f32.mrf.mxu1  ;;  %v4257_v12 = vpop.f32.mrf.mxu0  ;;  %v1913_v61 = vadd.f32 %v1905_v34, %v1726_v53 }
 0x32b   :  { %v1720_v46 = vmul.f32 %v6564_v25, %v1648_v57  ;;  %v1729_v56 = vadd.f32 %v1721_v36, %v1542_v23 }
 0x32c   :  { %v4213_v40 = vpop.f32.mrf.mxu1  ;;  %v1845_v23 = vpop.f32.mrf.mxu0 }
 0x32d   :  { %v1723_v37 = vmul.f32 %v4213_v40, %v6081_v20  ;;  %v1728_v11 = vadd.f32 %v1720_v46, %v1541_v1  ;;  %v1916_v19 = vadd.f32 %v1908_v29, %v1729_v56 }
 0x32e   :  { %v1658_v15 = vpop.f32.mrf.mxu1 }
 0x32f   :  { %v1722_v3 = vmul.f32 %v6063_v24, %v1658_v15  ;;  %v1731_v62 = vadd.f32 %v1723_v37, %v1544_v41  ;;  %v1915_v49 = vadd.f32 %v1907_v31, %v1728_v11 }
 0x340   :  { %v4292_v47 = vpop.f32.mrf.mxu1 }
 0x341   :  { %v2091_v51 = vmul.f32 %v4292_v47, %v6561_v50  ;;  %v1910_v47 = vmul.f32 %v4257_v12, %v1901_v22  ;;  %v1730_v50 = vadd.f32 %v1722_v3, %v1543_v2 }
 0x342   :  { %v2002_v43 = vpop.f32.mrf.mxu1 }
 0x343   :  { %v2099_v10 = vadd.f32 %v2091_v51, %v1912_v42  ;;  %v2090_v60 = vmul.f32 %v6566_v17, %v2002_v43  ;;  %v1918_v53 = vadd.f32 %v1910_v47, %v1731_v62  ;;  %v2152_v17 = vpop.permute.xlu1 %2151 }
 0x344   :  { %v4295_v26 = vpop.f32.mrf.mxu1 }
 0x345   :  { %v6169_v57 = vadd.f32 %v6568_v16, %v2099_v10  ;;  %v2098_v9 = vadd.f32 %v2090_v60, %v1911_v39  ;;  %v2093_v13 = vmul.f32 %v4295_v26, %v6569_v0 }
 0x346   :  { %v2012_v14 = vpop.f32.mrf.mxu1 }
 0x347   :  { %v3506_v38 = vmul.f32 -1.442695, %v6169_v57  ;;  %v6175_v20 = vadd.f32 %v6570_v48, %v2098_v9  ;;  %v2101_v40 = vadd.f32 %v2093_v13, %v1914_v5  ;;  %v2092_v8 = vmul.f32 %v6571_v63, %v2012_v14 }
 0x348   :  { %v4298_v42 = vpop.f32.mrf.mxu1 }
 0x349   :  { %4525 = vpow2.f32 %v3506_v38  ;;  %v3505_v24 = vmul.f32 -1.442695, %v6175_v20  ;;  %v6182_v15 = vadd.f32 %v6115_v7, %v2101_v40  ;;  %v2100_v1 = vadd.f32 %v2092_v8, %v1913_v61 }
 0x34a   :  { %v2095_v51 = vmul.f32 %v4298_v42, %v6129_v58  ;;  %v2022_v45 = vpop.f32.mrf.mxu1  ;;  %v1909_v7 = vmul.f32 %v6151_v55, %v1845_v23  ;;  %v2147_v55 = vpop.permute.xlu0 %2146 }
 0x34b   :  { %4527 = vpow2.f32 %v3505_v24  ;;  %v3508_v54 = vmul.f32 -1.442695, %v6182_v15  ;;  %v6187_v22 = vadd.f32 %v6099_v35, %v2100_v1  ;;  %v2094_v21 = vmul.f32 %v6047_v59, %v2022_v45 }
 0x34c   :  { %v2103_v44 = vadd.f32 %v2095_v51, %v1916_v19  ;;  %v4301_v36 = vpop.f32.mrf.mxu1  ;;  %v1917_v43 = vadd.f32 %v1909_v7, %v1730_v50 }
 0x34d   :  { %4529 = vpow2.f32 %v3508_v54  ;;  %v3507_v25 = vmul.f32 -1.442695, %v6187_v22  ;;  %v2102_v46 = vadd.f32 %v2094_v21, %v1915_v49  ;;  %v2097_v58 = vmul.f32 %v4301_v36, %v2088_v32  ;;  %v2339_v32 = vld [vmem:[%s6400_s10] sm:$0xf] }
 0x34e   :  { %v2159_v39 = vadd.f32 %v2142_v33, %v2103_v44  ;;  %v2032_v6 = vpop.f32.mrf.mxu1  ;;  %v4618_v33 = vmov 0.0   ;;  %v2344_v7 = vpop.permute.xlu0 %2343 }
 0x34f   :  { %4531 = vpow2.f32 %v3507_v25  ;;  %v2158_v4 = vadd.f32 %v2137_v30, %v2102_v46  ;;  %v2105_v35 = vadd.f32 %v2097_v58, %v1918_v53  ;;  %v2096_v10 = vmul.f32 %v2083_v52, %v2032_v6  ;;  %4346 = vmatprep.subr.mxu1 %v4618_v33  ;;  %4362 = vmatprep.mubr.msk.f32.mxu1 %vm4619_vm3, %v4618_v33  ;;  %v2427_v53 = vld [vmem:[%s6401_s12] sm:$0xff] }
 0x350   :  { %v3510_v59 = vmul.f32 -1.442695, %v2159_v39 }
 0x351   :  { %v3509_v60 = vmul.f32 -1.442695, %v2158_v4  ;;  %v2161_v41 = vadd.f32 %v2152_v17, %v2105_v35  ;;  %v2104_v2 = vadd.f32 %v2096_v10, %v1917_v43  ;;  %v2429_v35 = vld [vmem:[%s6401_s12 + $0x10] sm:$0xff]  ;;  %v2430_v10 = vld [vmem:[%s6401_s12 + $0x18] sm:$0xff]  ;;  %v2431_v17 = vld [vmem:[%s6401_s12 + $0x20] sm:$0xff] }
 0x352   :  { %4533 = vpow2.f32 %v3510_v59  ;;  %v2432_v59 = vld [vmem:[%s6401_s12 + $0x28] sm:$0xff] }
 0x353   :  { %4535 = vpow2.f32 %v3509_v60  ;;  %v3512_v18 = vmul.f32 -1.442695, %v2161_v41  ;;  %v2160_v34 = vadd.f32 %v2147_v55, %v2104_v2  ;;  %v2433_v60 = vld [vmem:[%s6401_s12 + $0x30] sm:$0xff]  ;;  %v2665_v2 = vld [vmem:[%s6402_s3] sm:$0x3]  ;;  %v2451_v55 = vpop.permute.xlu0 %2450 }
 0x355   :  { %4537 = vpow2.f32 %v3512_v18  ;;  %v3511_v37 = vmul.f32 -1.442695, %v2160_v34  ;;  %v2446_v18 = vpop.permute.xlu1 %2445 }
 0x356   :  { %v4526_v26 = vpop.eup %4525 }
 0x357   :  { %v2187_v5 = vadd.f32 1.0, %v4526_v26  ;;  %4539 = vpow2.f32 %v3511_v37 }
 0x358   :  { %v4528_v12 = vpop.eup %4527 }
 0x359   :  { %v2186_v16 = vadd.f32 1.0, %v4528_v12  ;;  %4541 = vrcp.f32 %v2187_v5  ;;  %v2456_v5 = vpop.permute.xlu1 %2455 }
 0x35a   :  { %v4530_v30 = vpop.eup %4529 }
 0x35b   :  { %4543 = vrcp.f32 %v2186_v16  ;;  %v2189_v9 = vadd.f32 1.0, %v4530_v30 }
 0x35c   :  { %v4532_v0 = vpop.eup %4531 }
 0x35d   :  { %v2188_v13 = vadd.f32 1.0, %v4532_v0  ;;  %4545 = vrcp.f32 %v2189_v9 }
 0x35f   :  { %v4534_v52 = vpop.eup %4533  ;;  %4547 = vrcp.f32 %v2188_v13 }
 0x360   :  { %v4536_v61 = vpop.eup %4535  ;;  %v2191_v56 = vadd.f32 1.0, %v4534_v52 }
 0x361   :  { %v2190_v11 = vadd.f32 1.0, %v4536_v61 }
 0x362   :  { %v4538_v3 = vpop.eup %4537  ;;  %4549 = vrcp.f32 %v2191_v56 }
 0x363   :  { %4551 = vrcp.f32 %v2190_v11  ;;  %v2193_v14 = vadd.f32 1.0, %v4538_v3  ;;  %v2466_v3 = vpop.permute.xlu1 %2465 }
 0x364   :  { %v4540_v38 = vpop.eup %4539 }
 0x365   :  { %v2192_v48 = vadd.f32 1.0, %v4540_v38  ;;  %4553 = vrcp.f32 %v2193_v14 }
 0x366   :  { %v4542_v40 = vpop.eup %4541 }
 0x367   :  { %4555 = vrcp.f32 %v2192_v48  ;;  %v6196_v28 = vmul.f32 %v4542_v40, %v6169_v57 }
 0x368   :  { %v4544_v63 = vpop.eup %4543 }
 0x369   :  { %v6193_v8 = vmul.f32 %v4544_v63, %v6175_v20 }
 0x36a   :  { %v4546_v29 = vpop.eup %4545 }
 0x36b   :  { %4334 = vmatprep.mubr.f32.mxu0 %v6193_v8  ;;  %v6204_v62 = vmul.f32 %v4546_v29, %v6182_v15 }
 0x36c   :  { %v4548_v27 = vpop.eup %4547  ;;  %4335 = vmatmul.mubr.f32.vlgmr.msra.gmra.mxu0 %v6196_v28 }
 0x36d   :  { %v6201_v31 = vmul.f32 %v4548_v27, %v6187_v22 }
 0x36f   :  { %v4550_v47 = vpop.eup %4549  ;;  %4337 = vmatprep.mubr.f32.mxu0 %v6201_v31 }
 0x370   :  { %v4552_v20 = vpop.eup %4551  ;;  %4338 = vmatmul.mubr.f32.gmra.mxu0 %v6204_v62  ;;  %v6210_v42 = vmul.f32 %v4550_v47, %v2159_v39 }
 0x371   :  { %v6208_v57 = vmul.f32 %v4552_v20, %v2158_v4  ;;  %v2428_v4 = vld [vmem:[%s6401_s12 + $0x8] sm:$0xff] }
 0x372   :  { %v4554_v23 = vpop.eup %4553 }
 0x373   :  { %4340 = vmatprep.mubr.f32.mxu0 %v6208_v57  ;;  %v6216_v15 = vmul.f32 %v4554_v23, %v2161_v41  ;;  %v2434_v41 = vld [vmem:[%s6401_s12 + $0x38] sm:$0xff] }
 0x374   :  { %v4556_v24 = vpop.eup %4555  ;;  %4341 = vmatmul.mubr.f32.gmra.mxu0 %v6210_v42 }
 0x375   :  { %v6214_v1 = vmul.f32 %v4556_v24, %v2160_v34  ;;  %v2461_v34 = vpop.permute.xlu0 %2460  ;;  %v2476_v24 = vpop.permute.xlu1 %2475 }
 0x377   :  { %4343 = vmatprep.mubr.f32.mxu0 %v6214_v1 }
 0x378   :  { %4344 = vmatmul.mubr.f32.gmra.mxu0 %v6216_v15 }
 0x379   :  { %4367 = vmatprep.mubr.msk.f32.mxu0 %vm2483_vm5, %v2427_v53  ;;  %v2471_v52 = vpop.permute.xlu0 %2470 }
 0x37d   :  { %v2481_v27 = vpop.permute.xlu0 %2480 }
 0x42c   :  { %v4336_v19 = vpop.f32.mrf.mxu0 }
 0x42e   :  { %v2300_v49 = vpop.f32.mrf.mxu0 }
 0x430   :  { %v4339_v50 = vpop.f32.mrf.mxu0 }
 0x432   :  { %v2310_v51 = vpop.f32.mrf.mxu0 }
 0x434   :  { %v4342_v45 = vpop.f32.mrf.mxu0 }
 0x436   :  { %v2320_v54 = vpop.f32.mrf.mxu0 }
 0x438   :  { %v4345_v22 = vpop.f32.mrf.mxu0 }
 0x439   :  { %4347 = vmatpush3.msra.mxu1 %v4345_v22 }
 0x43a   :  { %v2330_v21 = vpop.f32.mrf.mxu0  ;;  %4348 = vmatprep.subr.mxu1 %v4618_v33 }
 0x43b   :  { %4349 = vmatpush3.msra.mxu1 %v2330_v21 }
 0x43c   :  { %4350 = vmatprep.subr.mxu1 %v4618_v33 }
 0x43d   :  { %4351 = vmatpush3.msra.mxu1 %v4342_v45 }
 0x43e   :  { %4352 = vmatprep.subr.mxu1 %v4618_v33 }
 0x43f   :  { %4353 = vmatpush3.msra.mxu1 %v2320_v54 }
 0x440   :  { %4354 = vmatprep.subr.mxu1 %v4618_v33 }
 0x441   :  { %4355 = vmatpush3.msra.mxu1 %v4339_v50 }
 0x442   :  { %4356 = vmatprep.subr.mxu1 %v4618_v33 }
 0x443   :  { %4357 = vmatpush3.msra.mxu1 %v2310_v51 }
 0x444   :  { %4358 = vmatprep.subr.mxu1 %v4618_v33 }
 0x445   :  { %4359 = vmatpush3.msra.mxu1 %v4336_v19 }
 0x446   :  { %4360 = vmatprep.subr.mxu1 %v4618_v33 }
 0x447   :  { %4361 = vmatpush3.msra.mxu1 %v2300_v49 }
 0x448   :  { %4363 = vmatmul.mubr.msk.f32.vlgmr.msra.gmra.mxu1 %vm2346_vm4, %v2339_v32  ;;  %4379 = vmatprep.subr.msk.mxu1 %vm2691_vm7, %v2665_v2 }
 0x449   :  { %4380 = vmatpush3.msk.msra.mxu1 %vm2691_vm7, %v2665_v2  ;;  %v6576_v2 = vld [vmem:[#allocation17_spill] sm:$0xff] }
 0x44a   :  { %4439 = vmatprep.subr.mxu1 %v4618_v33 }
 0x508   :  { %v2416_v44 = vpop.f32.mrf.mxu1 }
 0x509   :  { %v2417_v36 = vadd.f32 %v2416_v44, %v2344_v7 }
 0x50a   :  { %v4364_v25 = vpop.f32.mrf.mxu1 }
 0x50b   :  { %v3514_v46 = vmul.f32 -1.442695, %v2417_v36 }
 0x50d   :  { %4557 = vpow2.f32 %v3514_v46 }
 0x51a   :  { %v4558_v58 = vpop.eup %4557 }
 0x51b   :  { %v2423_v43 = vadd.f32 1.0, %v4558_v58 }
 0x51d   :  { %4559 = vrcp.f32 %v2423_v43 }
 0x52a   :  { %v4560_v39 = vpop.eup %4559 }
 0x52b   :  { %v2426_v6 = vmul.f32 %v4560_v39, %v2417_v36 }
 0x52d   :  { %4365 = vmatprep.subr.msk.mxu0 %vm2508_vm6, %v2426_v6 }
 0x52e   :  { %4366 = vmatpush3.msk.msra.mxu0 %vm2508_vm6, %v2426_v6 }
 0x52f   :  { %4368 = vmatmul.mubr.msk.f32.vlgmr.msra.gmra.mxu0 %vm2483_vm5, %v2428_v4 }
 0x530   :  { %4370 = vmatprep.mubr.msk.f32.mxu0 %vm2483_vm5, %v2429_v35 }
 0x533   :  { %4371 = vmatmul.mubr.msk.f32.gmra.mxu0 %vm2483_vm5, %v2430_v10 }
 0x534   :  { %4373 = vmatprep.mubr.msk.f32.mxu0 %vm2483_vm5, %v2431_v17  ;;  %v6574_v17 = vld [vmem:[#allocation14_spill] sm:$0xff] }
 0x537   :  { %4374 = vmatmul.mubr.msk.f32.gmra.mxu0 %vm2483_vm5, %v2432_v59 }
 0x538   :  { %4376 = vmatprep.mubr.msk.f32.mxu0 %vm2483_vm5, %v2433_v60 }
 0x53b   :  { %4377 = vmatmul.mubr.msk.f32.gmra.mxu0 %vm2483_vm5, %v2434_v41  ;;  %v6575_v41 = vld [vmem:[#allocation16_spill] sm:$0xff] }
 0x5ef   :  { %v4369_v37 = vpop.f32.mrf.mxu0 }
 0x5f0   :  { %v2584_v26 = vadd.f32 %v4369_v37, %v2451_v55  ;;  %v6578_v37 = vld [vmem:[#allocation20_spill] sm:$0xff] }
 0x5f1   :  { %v2578_v12 = vpop.f32.mrf.mxu0 }
 0x5f2   :  { %v3525_v16 = vmul.f32 -1.442695, %v2584_v26  ;;  %v2579_v30 = vadd.f32 %v2578_v12, %v2446_v18  ;;  %v6579_v12 = vld [vmem:[#allocation21_spill] sm:$0xff] }
 0x5f3   :  { %v4372_v9 = vpop.f32.mrf.mxu0 }
 0x5f4   :  { %4561 = vpow2.f32 %v3525_v16  ;;  %v3524_v0 = vmul.f32 -1.442695, %v2579_v30  ;;  %v2594_v13 = vadd.f32 %v4372_v9, %v2461_v34  ;;  %v6577_v34 = vld [vmem:[#allocation19_spill] sm:$0xff]  ;;  %v6581_v30 = vld [vmem:[#allocation25_spill] sm:$0xff]  ;;  %v6582_v9 = vld [vmem:[#allocation26_spill] sm:$0xff] }
 0x5f5   :  { %v2588_v61 = vpop.f32.mrf.mxu0  ;;  %v6580_v16 = vld [vmem:[#allocation23_spill] sm:$0xff] }
 0x5f6   :  { %4563 = vpow2.f32 %v3524_v0  ;;  %v3527_v56 = vmul.f32 -1.442695, %v2594_v13  ;;  %v2589_v11 = vadd.f32 %v2588_v61, %v2456_v5  ;;  %v6583_v0 = vld [vmem:[#allocation28_spill] sm:$0xff]  ;;  %v6584_v13 = vld [vmem:[#allocation30_spill] sm:$0xff]  ;;  %v6586_v61 = vld [vmem:[#allocation33_spill] sm:$0xff] }
 0x5f7   :  { %v4375_v14 = vpop.f32.mrf.mxu0 }
 0x5f8   :  { %4565 = vpow2.f32 %v3527_v56  ;;  %v3526_v38 = vmul.f32 -1.442695, %v2589_v11  ;;  %v2604_v48 = vadd.f32 %v4375_v14, %v2471_v52  ;;  %v6585_v52 = vld [vmem:[#allocation31_spill] sm:$0xff]  ;;  %v6588_v11 = vld [vmem:[#allocation36_spill] sm:$0xff]  ;;  %v2808_v14 = vld [vmem:[%s6403_s14] sm:$0xff] }
 0x5f9   :  { %v2598_v40 = vpop.f32.mrf.mxu0  ;;  %v6587_v56 = vld [vmem:[#allocation35_spill] sm:$0xff]  ;;  %4409 = vmatprep.mubr.msk.f32.mxu0 %vm2346_vm4, %v2808_v14 }
 0x5fa   :  { %4567 = vpow2.f32 %v3526_v38  ;;  %v3529_v63 = vmul.f32 -1.442695, %v2604_v48  ;;  %v2599_v29 = vadd.f32 %v2598_v40, %v2466_v3  ;;  %v6589_v3 = vld [vmem:[#allocation37_spill] sm:$0xff] }
 0x5fb   :  { %v4378_v47 = vpop.f32.mrf.mxu0 }
 0x5fc   :  { %4569 = vpow2.f32 %v3529_v63  ;;  %v3528_v20 = vmul.f32 -1.442695, %v2599_v29  ;;  %v2614_v23 = vadd.f32 %v4378_v47, %v2481_v27 }
 0x5fd   :  { %v2608_v19 = vpop.f32.mrf.mxu0 }
 0x5fe   :  { %4571 = vpow2.f32 %v3528_v20  ;;  %v3531_v49 = vmul.f32 -1.442695, %v2614_v23  ;;  %v2609_v50 = vadd.f32 %v2608_v19, %v2476_v24 }
 0x600   :  { %4573 = vpow2.f32 %v3531_v49  ;;  %v3530_v51 = vmul.f32 -1.442695, %v2609_v50 }
 0x601   :  { %v4562_v45 = vpop.eup %4561 }
 0x602   :  { %4575 = vpow2.f32 %v3530_v51  ;;  %v2642_v22 = vadd.f32 1.0, %v4562_v45 }
 0x603   :  { %v4564_v54 = vpop.eup %4563 }
 0x604   :  { %v2641_v21 = vadd.f32 1.0, %v4564_v54  ;;  %v6590_v54 = vld [vmem:[#allocation2_spill] sm:$0xff] }
 0x605   :  { %v4566_v32 = vpop.eup %4565 }
 0x606   :  { %4577 = vrcp.f32 %v2641_v21  ;;  %v2644_v7 = vadd.f32 1.0, %v4566_v32  ;;  %v6591_v32 = vld [vmem:[#allocation3_spill] sm:$0xff] }
 0x607   :  { %v4568_v53 = vpop.eup %4567  ;;  %4579 = vrcp.f32 %v2642_v22 }
 0x608   :  { %v2643_v44 = vadd.f32 1.0, %v4568_v53 }
 0x609   :  { %v4570_v36 = vpop.eup %4569 }
 0x60a   :  { %4581 = vrcp.f32 %v2643_v44  ;;  %v2646_v46 = vadd.f32 1.0, %v4570_v36  ;;  %v2907_v44 = vld [vmem:[%s6404_s16 + $0x10] sm:$0xff]  ;;  %v2908_v36 = vld [vmem:[%s6404_s16 + $0x18] sm:$0xff] }
 0x60b   :  { %v4572_v25 = vpop.eup %4571  ;;  %4583 = vrcp.f32 %v2644_v7  ;;  %v2906_v7 = vld [vmem:[%s6404_s16 + $0x8] sm:$0xff] }
 0x60c   :  { %v2645_v58 = vadd.f32 1.0, %v4572_v25 }
 0x60d   :  { %v4574_v43 = vpop.eup %4573 }
 0x60e   :  { %4585 = vrcp.f32 %v2645_v58  ;;  %v2648_v6 = vadd.f32 1.0, %v4574_v43 }
 0x60f   :  { %v4576_v39 = vpop.eup %4575  ;;  %4587 = vrcp.f32 %v2646_v46 }
 0x610   :  { %v2647_v4 = vadd.f32 1.0, %v4576_v39 }
 0x612   :  { %4589 = vrcp.f32 %v2647_v4 }
 0x613   :  { %v4578_v35 = vpop.eup %4577  ;;  %4591 = vrcp.f32 %v2648_v6 }
 0x614   :  { %v4580_v10 = vpop.eup %4579  ;;  %4381 = vmatprep.mubr.msk.f32.mxu1 %vm2666_vm8, %v4578_v35 }
 0x615   :  { %4382 = vmatmul.mubr.msk.f32.vlgmr.msra.gmra.mxu1 %vm2666_vm8, %v4580_v10 }
 0x616   :  { %4440 = vmatpush3.msra.mxu1 %v6574_v17 }
 0x617   :  { %v4582_v59 = vpop.eup %4581  ;;  %4441 = vmatprep.subr.mxu1 %v4618_v33 }
 0x618   :  { %v4584_v60 = vpop.eup %4583  ;;  %4384 = vmatprep.mubr.msk.f32.mxu1 %vm2666_vm8, %v4582_v59  ;;  %4442 = vmatpush3.msra.mxu1 %v6575_v41 }
 0x619   :  { %4385 = vmatmul.mubr.msk.f32.gmra.mxu1 %vm2666_vm8, %v4584_v60  ;;  %4443 = vmatprep.subr.mxu1 %v4618_v33 }
 0x61a   :  { %4444 = vmatpush3.msra.mxu1 %v6576_v2 }
 0x61b   :  { %v4586_v55 = vpop.eup %4585  ;;  %4445 = vmatprep.subr.mxu1 %v4618_v33 }
 0x61c   :  { %v4588_v18 = vpop.eup %4587  ;;  %4387 = vmatprep.mubr.msk.f32.mxu1 %vm2666_vm8, %v4586_v55  ;;  %4446 = vmatpush3.msra.mxu1 %v6577_v34 }
 0x61d   :  { %4388 = vmatmul.mubr.msk.f32.gmra.mxu1 %vm2666_vm8, %v4588_v18  ;;  %4447 = vmatprep.subr.mxu1 %v4618_v33 }
 0x61e   :  { %4448 = vmatpush3.msra.mxu1 %v6578_v37 }
 0x61f   :  { %v4590_v26 = vpop.eup %4589  ;;  %4449 = vmatprep.subr.mxu1 %v4618_v33 }
 0x620   :  { %v4592_v5 = vpop.eup %4591  ;;  %4390 = vmatprep.mubr.msk.f32.mxu1 %vm2666_vm8, %v4590_v26  ;;  %4450 = vmatpush3.msra.mxu1 %v6579_v12 }
 0x621   :  { %4391 = vmatmul.mubr.msk.f32.gmra.mxu1 %vm2666_vm8, %v4592_v5  ;;  %4451 = vmatprep.subr.mxu1 %v4618_v33 }
 0x622   :  { %4452 = vmatpush3.msra.mxu1 %v6580_v16  ;;  %4471 = vmatprep.mubr.msk.f32.mxu1 %vm4619_vm3, %v4618_v33 }
 0x623   :  { %4453 = vmatprep.subr.mxu1 %v4618_v33 }
 0x624   :  { %4454 = vmatpush3.msra.mxu1 %v6581_v30 }
 0x625   :  { %4455 = vmatprep.subr.mxu1 %v4618_v33 }
 0x626   :  { %4456 = vmatpush3.msra.mxu1 %v6582_v9 }
 0x627   :  { %4457 = vmatprep.subr.mxu1 %v4618_v33 }
 0x628   :  { %4458 = vmatpush3.msra.mxu1 %v6583_v0 }
 0x629   :  { %4459 = vmatprep.subr.mxu1 %v4618_v33 }
 0x62a   :  { %4460 = vmatpush3.msra.mxu1 %v6584_v13 }
 0x62b   :  { %4461 = vmatprep.subr.mxu1 %v4618_v33 }
 0x62c   :  { %4462 = vmatpush3.msra.mxu1 %v6585_v52 }
 0x62d   :  { %4463 = vmatprep.subr.mxu1 %v4618_v33 }
 0x62e   :  { %4464 = vmatpush3.msra.mxu1 %v6586_v61 }
 0x62f   :  { %4465 = vmatprep.subr.mxu1 %v4618_v33 }
 0x630   :  { %4466 = vmatpush3.msra.mxu1 %v6587_v56 }
 0x631   :  { %4467 = vmatprep.subr.mxu1 %v4618_v33 }
 0x632   :  { %4468 = vmatpush3.msra.mxu1 %v6588_v11 }
 0x633   :  { %4469 = vmatprep.subr.mxu1 %v4618_v33 }
 0x634   :  { %4470 = vmatpush3.msra.mxu1 %v6589_v3 }
 0x6d5   :  { %v4383_v38 = vpop.f32.mrf.mxu1 }
 0x6d7   :  { %v2761_v48 = vpop.f32.mrf.mxu1 }
 0x6d9   :  { %v4386_v40 = vpop.f32.mrf.mxu1 }
 0x6da   :  { %v2803_v50 = vmul.f32 %v4386_v40, %v6204_v62  ;;  %v3060_v40 = vld [vmem:[%s6405_s18 + $0x10] sm:$0x3] }
 0x6db   :  { %v2771_v63 = vpop.f32.mrf.mxu1 }
 0x6dc   :  { %v2802_v51 = vmul.f32 %v2771_v63, %v6201_v31  ;;  %v2905_v31 = vld [vmem:[%s6404_s16] sm:$0xff] }
 0x6dd   :  { %v4389_v29 = vpop.f32.mrf.mxu1 }
 0x6de   :  { %v2805_v19 = vmul.f32 %v4389_v29, %v6210_v42  ;;  %v2800_v42 = vmul.f32 %v2761_v48, %v6193_v8  ;;  %v2815_v8 = vpop.permute.xlu0 %2814  ;;  %v3059_v48 = vld [vmem:[%s6405_s18 + $0x8] sm:$0xff] }
 0x6df   :  { %v2781_v27 = vpop.f32.mrf.mxu1 }
 0x6e0   :  { %v2804_v49 = vmul.f32 %v2781_v27, %v6208_v57  ;;  %v2809_v57 = vld [vmem:[%s6403_s14 + $0x8] sm:$0xff] }
 0x6e1   :  { %v4392_v47 = vpop.f32.mrf.mxu1 }
 0x6e2   :  { %v2807_v20 = vmul.f32 %v4392_v47, %v6216_v15  ;;  %v2926_v46 = vpop.permute.xlu0 %2925 }
 0x6e3   :  { %v2791_v23 = vpop.f32.mrf.mxu1 }
 0x6e4   :  { %v2806_v24 = vmul.f32 %v2791_v23, %v6214_v1  ;;  %4393 = vmatprep.subr.mxu0 %v2807_v20  ;;  %v2801_v1 = vmul.f32 %v4383_v38, %v6196_v28  ;;  %v2820_v28 = vpop.permute.xlu1 %2819  ;;  %v3058_v38 = vld [vmem:[%s6405_s18] sm:$0xff] }
 0x6e5   :  { %4394 = vmatpush3.msra.mxu0 %v2807_v20 }
 0x6e6   :  { %4395 = vmatprep.subr.mxu0 %v2806_v24  ;;  %v2916_v6 = vpop.permute.xlu0 %2915 }
 0x6e7   :  { %4396 = vmatpush3.msra.mxu0 %v2806_v24 }
 0x6e8   :  { %4397 = vmatprep.subr.mxu0 %v2805_v19  ;;  %v2931_v25 = vpop.permute.xlu1 %2930 }
 0x6e9   :  { %4398 = vmatpush3.msra.mxu0 %v2805_v19 }
 0x6ea   :  { %4399 = vmatprep.subr.mxu0 %v2804_v49 }
 0x6eb   :  { %4400 = vmatpush3.msra.mxu0 %v2804_v49 }
 0x6ec   :  { %4401 = vmatprep.subr.mxu0 %v2803_v50  ;;  %v2921_v58 = vpop.permute.xlu1 %2920 }
 0x6ed   :  { %4402 = vmatpush3.msra.mxu0 %v2803_v50  ;;  %v3162_v50 = vpop.permute.xlu0 %3161 }
 0x6ee   :  { %4403 = vmatprep.subr.mxu0 %v2802_v51 }
 0x6ef   :  { %4404 = vmatpush3.msra.mxu0 %v2802_v51 }
 0x6f0   :  { %4405 = vmatprep.subr.mxu0 %v2801_v1  ;;  %v3157_v19 = vpop.permute.xlu1 %3156 }
 0x6f1   :  { %4406 = vmatpush3.msra.mxu0 %v2801_v1 }
 0x6f2   :  { %4407 = vmatprep.subr.mxu0 %v2800_v42 }
 0x6f3   :  { %4408 = vmatpush3.msra.mxu0 %v2800_v42 }
 0x6f4   :  { %4410 = vmatmul.mubr.msk.f32.vlgmr.msra.gmra.mxu0 %vm2346_vm4, %v2809_v57 }
 0x6f5   :  { %4416 = vmatprep.mubr.msk.f32.mxu0 %vm239_vm2, %v2905_v31 }
 0x7b4   :  { %v4411_v62 = vpop.f32.mrf.mxu0 }
 0x7b5   :  { %v2900_v15 = vadd.f32 %v4411_v62, %v2820_v28  ;;  %v3167_v28 = vpop.permute.xlu1 %3166 }
 0x7b6   :  { %v2894_v45 = vpop.f32.mrf.mxu0 }
 0x7b7   :  { %v2904_v22 = vadd.f32 %v2900_v15, %v6590_v54  ;;  %v2895_v21 = vadd.f32 %v2894_v45, %v2815_v8 }
 0x7b9   :  { %v2903_v53 = vadd.f32 %v2895_v21, %v6591_v32  ;;  %4412 = vmatprep.subr.mxu0 %v2904_v22 }
 0x7ba   :  { %4413 = vmatpush3.msra.mxu0 %v2904_v22 }
 0x7bb   :  { %4414 = vmatprep.subr.mxu0 %v2903_v53 }
 0x7bc   :  { %4415 = vmatpush3.msra.mxu0 %v2903_v53 }
 0x7bd   :  { %4417 = vmatmul.mubr.msk.f32.vlgmr.msra.gmra.mxu0 %vm239_vm2, %v2906_v7  ;;  %4422 = vmatprep.subr.mxu0 %v4618_v33 }
 0x7be   :  { %4419 = vmatprep.mubr.msk.f32.mxu0 %vm239_vm2, %v2907_v44 }
 0x7c1   :  { %4420 = vmatmul.mubr.msk.f32.gmra.mxu0 %vm239_vm2, %v2908_v36 }
 0x7c2   :  { %4430 = vmatprep.mubr.msk.f32.mxu0 %vm4619_vm3, %v4618_v33 }
 0x87d   :  { %v4418_v43 = vpop.f32.mrf.mxu0 }
 0x87e   :  { %v3017_v39 = vadd.f32 %v4418_v43, %v2921_v58 }
 0x87f   :  { %v3011_v4 = vpop.f32.mrf.mxu0 }
 0x880   :  { %v3548_v35 = vmul.f32 -1.442695, %v3017_v39  ;;  %v3012_v10 = vadd.f32 %v3011_v4, %v2916_v6 }
 0x881   :  { %v4421_v17 = vpop.f32.mrf.mxu0 }
 0x882   :  { %v3547_v59 = vmul.f32 -1.442695, %v3012_v10  ;;  %v3027_v60 = vadd.f32 %v4421_v17, %v2931_v25  ;;  %4593 = vpow2.f32 %v3548_v35 }
 0x883   :  { %v3021_v41 = vpop.f32.mrf.mxu0 }
 0x884   :  { %v3550_v2 = vmul.f32 -1.442695, %v3027_v60  ;;  %v3022_v55 = vadd.f32 %v3021_v41, %v2926_v46  ;;  %4595 = vpow2.f32 %v3547_v59 }
 0x886   :  { %4597 = vpow2.f32 %v3550_v2  ;;  %v3549_v18 = vmul.f32 -1.442695, %v3022_v55 }
 0x888   :  { %4599 = vpow2.f32 %v3549_v18 }
 0x88f   :  { %v4594_v34 = vpop.eup %4593 }
 0x890   :  { %v3043_v5 = vadd.f32 1.0, %v4594_v34 }
 0x891   :  { %v4596_v37 = vpop.eup %4595 }
 0x892   :  { %v3042_v30 = vadd.f32 1.0, %v4596_v37 }
 0x893   :  { %v4598_v26 = vpop.eup %4597 }
 0x894   :  { %v3045_v12 = vadd.f32 1.0, %v4598_v26 }
 0x895   :  { %v4600_v16 = vpop.eup %4599 }
 0x896   :  { %4601 = vrcp.f32 %v3045_v12  ;;  %v3044_v9 = vadd.f32 1.0, %v4600_v16 }
 0x897   :  { %4603 = vrcp.f32 %v3043_v5 }
 0x898   :  { %4605 = vrcp.f32 %v3044_v9 }
 0x899   :  { %4607 = vrcp.f32 %v3042_v30 }
 0x8a3   :  { %v4602_v0 = vpop.eup %4601 }
 0x8a4   :  { %v4604_v13 = vpop.eup %4603  ;;  %v3057_v52 = vmul.f32 %v4602_v0, %v3027_v60 }
 0x8a5   :  { %v4606_v61 = vpop.eup %4605  ;;  %v3055_v3 = vmul.f32 %v4604_v13, %v3017_v39 }
 0x8a6   :  { %v3056_v56 = vmul.f32 %v4606_v61, %v3022_v55  ;;  %4423 = vmatpush3.msra.mxu0 %v3057_v52  ;;  %v4608_v11 = vpop.eup %4607 }
 0x8a7   :  { %4424 = vmatprep.subr.mxu0 %v4618_v33  ;;  %v3054_v14 = vmul.f32 %v4608_v11, %v3012_v10 }
 0x8a8   :  { %4425 = vmatpush3.msra.mxu0 %v3056_v56 }
 0x8a9   :  { %4426 = vmatprep.subr.mxu0 %v4618_v33 }
 0x8aa   :  { %4427 = vmatpush3.msra.mxu0 %v3055_v3 }
 0x8ab   :  { %4428 = vmatprep.subr.mxu0 %v4618_v33 }
 0x8ac   :  { %4429 = vmatpush3.msra.mxu0 %v3054_v14 }
 0x8ad   :  { %4431 = vmatmul.mubr.msk.f32.vlgmr.msra.gmra.mxu0 %vm3061_vm9, %v3058_v38 }
 0x8ae   :  { %4433 = vmatprep.mubr.msk.f32.mxu0 %vm4619_vm3, %v4618_v33 }
 0x8b1   :  { %4434 = vmatmul.mubr.msk.f32.gmra.mxu0 %vm3061_vm9, %v3059_v48 }
 0x8b2   :  { %4436 = vmatprep.mubr.msk.f32.mxu0 %vm4619_vm3, %v4618_v33 }
 0x8b5   :  { %4437 = vmatmul.mubr.msk.f32.gmra.mxu0 %vm3061_vm9, %v3060_v40 }
 0x96d   :  { %v3137_v63 = vpop.f32.mrf.mxu0 }
 0x96e   :  { %4472 = vmatmul.mubr.f32.vlgmr.msra.gmra.mxu1 %v3137_v63 }
 0x96f   :  { %v4432_v29 = vpop.f32.mrf.mxu0  ;;  %4474 = vmatprep.mubr.msk.f32.mxu1 %vm4619_vm3, %v4618_v33 }
 0x971   :  { %v3142_v27 = vpop.f32.mrf.mxu0 }
 0x972   :  { %4475 = vmatmul.mubr.f32.gmra.mxu1 %v3142_v27 }
 0x973   :  { %v4435_v47 = vpop.f32.mrf.mxu0  ;;  %4477 = vmatprep.mubr.msk.f32.mxu1 %vm4619_vm3, %v4618_v33 }
 0x975   :  { %v3147_v20 = vpop.f32.mrf.mxu0 }
 0x976   :  { %4478 = vmatmul.mubr.f32.gmra.mxu1 %v3147_v20 }
 0x977   :  { %v4438_v23 = vpop.f32.mrf.mxu0 }
 0xa2e   :  { %v3235_v24 = vpop.f32.mrf.mxu1 }
 0xa2f   :  { %v3236_v1 = vadd.f32 %v3235_v24, %v3157_v19 }
 0xa30   :  { %v4473_v49 = vpop.f32.mrf.mxu1 }
 0xa31   :  { %v3249_v15 = vsel %vm2666_vm8, %v3236_v1, -inf }
 0xa32   :  { %v3240_v51 = vpop.f32.mrf.mxu1 }
 0xa33   :  { %v3241_v42 = vadd.f32 %v3240_v51, %v3162_v50 }
 0xa34   :  { %v4476_v57 = vpop.f32.mrf.mxu1 }
 0xa35   :  { %v3250_v31 = vsel %vm2666_vm8, %v3241_v42, -inf }
 0xa36   :  { %v3245_v62 = vpop.f32.mrf.mxu1  ;;  %v3253_v33 = vmax.f32 %v3249_v15, %v3250_v31 }
 0xa37   :  { %v3246_v8 = vadd.f32 %v3245_v62, %v3167_v28 }
 0xa38   :  { %v4479_v45 = vpop.f32.mrf.mxu1 }
 0xa39   :  { %v3252_v54 = vsel %vm3251_vm10, %v3246_v8, -inf }
 0xa3a   :  { %v3254_v22 = vmax.f32 %v3253_v33, %v3252_v54 }
 0xa3c   :  { %v3255_v21 = vrot.slane %v3254_v22, 4 }
 0xa3e   :  { %v3256_v32 = vmax.f32 %v3254_v22, %v3255_v21 }
 0xa40   :  { %v3257_v53 = vrot.slane %v3256_v32, 2 }
 0xa42   :  { %v3258_v7 = vmax.f32 %v3256_v32, %v3257_v53 }
 0xa44   :  { %v3259_v44 = vrot.slane %v3258_v7, 1 }
 0xa46   :  { %v3260_v36 = vmax.f32 %v3258_v7, %v3259_v44 }
 0xa48   :  { %v3261_v25 = vsub.f32 %v3236_v1, %v3260_v36  ;;  %v3262_v46 = vsub.f32 %v3241_v42, %v3260_v36  ;;  %v3263_v58 = vsub.f32 %v3246_v8, %v3260_v36 }
 0xa4a   :  { %v3264_v43 = vmul.f32 1.442695, %v3261_v25  ;;  %v3266_v39 = vmul.f32 1.442695, %v3262_v46  ;;  %v3268_v6 = vmul.f32 1.442695, %v3263_v58 }
 0xa4c   :  { %4609 = vpow2.f32 %v3264_v43 }
 0xa4d   :  { %4611 = vpow2.f32 %v3266_v39 }
 0xa4e   :  { %4613 = vpow2.f32 %v3268_v6 }
 0xa59   :  { %v4610_v4 = vpop.eup %4609 }
 0xa5a   :  { %v4612_v35 = vpop.eup %4611  ;;  %v3270_v10 = vsel %vm2666_vm8, %v4610_v4, 0.0 }
 0xa5b   :  { %v4614_v17 = vpop.eup %4613  ;;  %v3271_v59 = vsel %vm2666_vm8, %v4612_v35, 0.0 }
 0xa5c   :  { %v3272_v60 = vadd.f32 %v3271_v59, %v3270_v10  ;;  %v3273_v41 = vsel %vm3251_vm10, %v4614_v17, 0.0 }
 0xa5e   :  { %v3274_v2 = vadd.f32 %v3273_v41, %v3272_v60 }
 0xa60   :  { %v3275_v55 = vrot.slane %v3274_v2, 4 }
 0xa62   :  { %v3276_v18 = vadd.f32 %v3275_v55, %v3274_v2 }
 0xa64   :  { %v3277_v34 = vrot.slane %v3276_v18, 2 }
 0xa66   :  { %v3278_v37 = vadd.f32 %v3277_v34, %v3276_v18 }
 0xa68   :  { %v3279_v26 = vrot.slane %v3278_v37, 1 }
 0xa6a   :  { %v3280_v5 = vadd.f32 %v3279_v26, %v3278_v37 }
 0xa6c   :  { %4615 = vrcp.f32 %v3280_v5 }
 0xa79   :  { %v4616_v12 = vpop.eup %4615 }
 0xa7a   :  { %v3282_v16 = vmul.f32 %v4616_v12, %v4610_v4  ;;  %v3283_v30 = vmul.f32 %v4616_v12, %v4612_v35  ;;  %v3284_v9 = vmul.f32 %v4616_v12, %v4614_v17 }
 0xa7c   :  { %3285 = vst.msk [vmem:[%s6406_s20] sm:$0xff] %vm2666_vm8, %v3282_v16  ;;  %3286 = vst.msk [vmem:[%s6406_s20 + $0x8] sm:$0xff] %vm2666_vm8, %v3283_v30 }
 0xa7d   :  { %3287 = vst.msk [vmem:[%s6406_s20 + $0x10] sm:$0x3] %vm3251_vm10, %v3284_v9 }

</bundles_post_ra>
